<compile_context>
chip_gen: v7x
topology: tpu7x:2x2x1
jax: 0.10.0
libtpu: 0.0.40
codegen_flags: <defaults>
</compile_context>

<pallas_src>
import functools

import jax
import jax.numpy as jnp
from jax.experimental import pallas as pl
from jax.experimental.pallas import tpu as pltpu

HIDDEN_SIZE = 8
HIDDEN_DIM = 128

COMPUTE_DTYPE = jnp.bfloat16   # MXU input dtype; accumulation is always f32
TM_MAX = 256                   # row-tile size for all M-tiled matmul kernels

_PARALLEL = pltpu.CompilerParams(dimension_semantics=("parallel",))


def _block_rows(m, tm_max=TM_MAX):
    """Pick an M row-tile: whole array if small, else 256-row tiles (cdiv grid)."""
    if m <= tm_max:
        return m, 1
    return tm_max, pl.cdiv(m, tm_max)


# ----------------------------------------------------------------------------
# Pallas kernels
# ----------------------------------------------------------------------------
def _mm_bias_act_kernel(x_ref, w_ref, b_ref, o_ref, *, act):
    y = jnp.dot(x_ref[...], w_ref[...], preferred_element_type=jnp.float32)
    y = y + b_ref[...]
    if act == "relu":
        y = jnp.maximum(y, 0.0)
    o_ref[...] = y.astype(o_ref.dtype)


def _mm_kernel(x_ref, w_ref, o_ref):
    o_ref[...] = jnp.dot(x_ref[...], w_ref[...],
                         preferred_element_type=jnp.float32).astype(o_ref.dtype)


def _prelu_mm_kernel(x_ref, b_ref, w_ref, o_ref):
    # fused prologue: previous ConvT's bias + ReLU (applied post-col2im), then matmul
    x = jnp.maximum(x_ref[...] + b_ref[...], 0.0).astype(w_ref.dtype)
    o_ref[...] = jnp.dot(x, w_ref[...],
                         preferred_element_type=jnp.float32).astype(o_ref.dtype)


def _bias_sigmoid_kernel(x_ref, b_ref, o_ref):
    y = x_ref[...] + b_ref[...]
    # exact divide keeps out in [0,1] (denominator >= 1.0); exp handles -inf limit
    o_ref[...] = 1.0 / (1.0 + jnp.exp(-y))


def _bottleneck_kernel(h_ref, w3_ref, b3_ref, wml_ref, bml_ref, eps_ref,
                       wd_ref, bd_ref, ml_ref, d_ref):
    # enc3: 1x1-spatial conv == Linear(1600,128), + ReLU
    h = jnp.dot(h_ref[...], w3_ref[...], preferred_element_type=jnp.float32)
    h = jnp.maximum(h + b3_ref[...], 0.0).astype(w3_ref.dtype)
    # mu / logvar heads (weights pre-concatenated -> one dot, one packed store)
    ml = jnp.dot(h, wml_ref[...], preferred_element_type=jnp.float32) + bml_ref[...]
    ml_ref[...] = ml
    mu = ml[:, :HIDDEN_SIZE]
    lv = ml[:, HIDDEN_SIZE:]
    # reparameterize, then folded (decode Linear(8,128) o ConvT1-on-1x1-input) + ReLU
    z = jnp.exp(lv * 0.5) * eps_ref[...] + mu
    d = jnp.dot(z.astype(wd_ref.dtype), wd_ref[...],
                preferred_element_type=jnp.float32) + bd_ref[...]
    d_ref[...] = jnp.maximum(d, 0.0).astype(d_ref.dtype)


# ----------------------------------------------------------------------------
# Pallas wrappers (tiled grids)
# ----------------------------------------------------------------------------
def matmul_bias_act(x, w, b, act="none", out_dtype=COMPUTE_DTYPE):
    """y = act(x @ w + b); M-tiled, bf16 MXU inputs, f32 accumulation."""
    M, K = x.shape
    _, N = w.shape
    TM, gm = _block_rows(M)
    return pl.pallas_call(
        functools.partial(_mm_bias_act_kernel, act=act),
        grid=(gm,),
        in_specs=[pl.BlockSpec((TM, K), lambda i: (i, 0)),
                  pl.BlockSpec((K, N), lambda i: (0, 0)),
                  pl.BlockSpec((1, N), lambda i: (0, 0))],
        out_specs=pl.BlockSpec((TM, N), lambda i: (i, 0)),
        out_shape=jax.ShapeDtypeStruct((M, N), out_dtype),
        compiler_params=_PARALLEL,
    )(x.astype(COMPUTE_DTYPE), w.astype(COMPUTE_DTYPE),
      b.reshape(1, N).astype(jnp.float32))


def matmul_plain(x, w, out_dtype=jnp.float32):
    """y = x @ w (no bias/act) — used for the zero-free ConvT scatter matmul."""
    M, K = x.shape
    _, N = w.shape
    TM, gm = _block_rows(M)
    return pl.pallas_call(
        _mm_kernel,
        grid=(gm,),
        in_specs=[pl.BlockSpec((TM, K), lambda i: (i, 0)),
                  pl.BlockSpec((K, N), lambda i: (0, 0))],
        out_specs=pl.BlockSpec((TM, N), lambda i: (i, 0)),
        out_shape=jax.ShapeDtypeStruct((M, N), out_dtype),
        compiler_params=_PARALLEL,
    )(x.astype(COMPUTE_DTYPE), w.astype(COMPUTE_DTYPE))


def prelu_matmul(x, b_in, w, out_dtype=jnp.float32):
    """y = relu(x + b_in) @ w — fuses the previous ConvT's bias+ReLU epilogue."""
    M, K = x.shape
    _, N = w.shape
    TM, gm = _block_rows(M)
    return pl.pallas_call(
        _prelu_mm_kernel,
        grid=(gm,),
        in_specs=[pl.BlockSpec((TM, K), lambda i: (i, 0)),
                  pl.BlockSpec((1, K), lambda i: (0, 0)),
                  pl.BlockSpec((K, N), lambda i: (0, 0))],
        out_specs=pl.BlockSpec((TM, N), lambda i: (i, 0)),
        out_shape=jax.ShapeDtypeStruct((M, N), out_dtype),
        compiler_params=_PARALLEL,
    )(x.astype(jnp.float32), b_in.reshape(1, K).astype(jnp.float32),
      w.astype(COMPUTE_DTYPE))


def bias_sigmoid(x, b_scalar):
    """out = sigmoid(x + b) on a lane-dense (M, 784) slab."""
    M, N = x.shape
    TM, gm = _block_rows(M)
    b_row = jnp.broadcast_to(b_scalar.reshape(1, 1).astype(jnp.float32), (1, N))
    return pl.pallas_call(
        _bias_sigmoid_kernel,
        grid=(gm,),
        in_specs=[pl.BlockSpec((TM, N), lambda i: (i, 0)),
                  pl.BlockSpec((1, N), lambda i: (0, 0))],
        out_specs=pl.BlockSpec((TM, N), lambda i: (i, 0)),
        out_shape=jax.ShapeDtypeStruct((M, N), jnp.float32),
        compiler_params=_PARALLEL,
    )(x.astype(jnp.float32), b_row)


def bottleneck_decode(h, params, eps):
    """Fused enc3 + (mu,var) heads + reparameterize + (decode o dc1)."""
    B, D = h.shape                                # D = 1600
    DN = params["dec_dc1_w"].shape[1]             # 1600 = 5*5*64
    HS = HIDDEN_SIZE
    TB, gb = _block_rows(B)
    CD = COMPUTE_DTYPE
    # pack mu/var heads into a single (128, 16) weight -> one dot, one packed store
    wml = jnp.concatenate([params["mu_w"], params["var_w"]], axis=1)
    bml = jnp.concatenate([params["mu_b"], params["var_b"]]).reshape(1, 2 * HS)

    ml, d = pl.pallas_call(
        _bottleneck_kernel,
        grid=(gb,),
        in_specs=[
            pl.BlockSpec((TB, D), lambda i: (i, 0)),
            pl.BlockSpec((D, HIDDEN_DIM), lambda i: (0, 0)),
            pl.BlockSpec((1, HIDDEN_DIM), lambda i: (0, 0)),
            pl.BlockSpec((HIDDEN_DIM, 2 * HS), lambda i: (0, 0)),
            pl.BlockSpec((1, 2 * HS), lambda i: (0, 0)),
            pl.BlockSpec((TB, HS), lambda i: (i, 0)),
            pl.BlockSpec((HS, DN), lambda i: (0, 0)),
            pl.BlockSpec((1, DN), lambda i: (0, 0)),
        ],
        out_specs=(
            pl.BlockSpec((TB, 2 * HS), lambda i: (i, 0)),
            pl.BlockSpec((TB, DN), lambda i: (i, 0)),
        ),
        out_shape=(
            jax.ShapeDtypeStruct((B, 2 * HS), jnp.float32),
            jax.ShapeDtypeStruct((B, DN), CD),
        ),
        compiler_params=_PARALLEL,
    )(h.astype(CD),
      params["enc3_w"].astype(CD), params["enc3_b"].reshape(1, -1).astype(jnp.float32),
      wml.astype(CD), bml.astype(jnp.float32),
      eps.astype(jnp.float32),
      params["dec_dc1_w"].astype(CD), params["dec_dc1_b"].reshape(1, -1).astype(jnp.float32))

    return ml[:, :HS], ml[:, HS:], d


# ----------------------------------------------------------------------------
# Glue: im2col (encoder) / col2im overlap-add (decoder) in plain JAX
# ----------------------------------------------------------------------------
def im2col(x, kh, kw, stride):
    """x: (B,H,W,C) -> patches (B,oh,ow,kh*kw*C) ordered (ki,kj,c)."""
    B, H, W, C = x.shape
    oh = (H - kh) // stride + 1
    ow = (W - kw) // stride + 1
    patches = []
    for i in range(kh):
        for j in range(kw):
            patches.append(x[:, i:i + stride * oh:stride, j:j + stride * ow:stride, :])
    p = jnp.stack(patches, axis=-2)                 # (B, oh, ow, kh*kw, C)
    return p.reshape(B, oh, ow, kh * kw * C), oh, ow


def col2im_add(p, stride):
    """Overlap-add ConvT contributions. p: (B,H,W,kh,kw,OC) -> (B,OH,OW,OC)."""
    B, H, W, kh, kw, OC = p.shape
    OH = (H - 1) * stride + kh
    OW = (W - 1) * stride + kw
    y = jnp.zeros((B, OH, OW, OC), p.dtype)
    for ki in range(kh):
        for kj in range(kw):
            y = y.at[:, ki:ki + stride * (H - 1) + 1:stride,
                        kj:kj + stride * (W - 1) + 1:stride, :].add(p[:, :, :, ki, kj, :])
    return y


# ----------------------------------------------------------------------------
# Parameters (PyTorch-default-style uniform init, converted to matmul layouts)
# ----------------------------------------------------------------------------
def init_params(key):
    keys = iter(jax.random.split(key, 18))

    def u(shape, fan_in):
        bound = 1.0 / float(fan_in) ** 0.5
        return jax.random.uniform(next(keys), shape, jnp.float32, -bound, bound)

    def conv(oc, ic, k):
        # Conv2d weight (OC,IC,KH,KW) -> im2col matmul weight (KH*KW*IC, OC)
        w = u((oc, ic, k, k), ic * k * k)
        b = u((oc,), ic * k * k)
        return jnp.transpose(w, (2, 3, 1, 0)).reshape(k * k * ic, oc), b

    def linear(inf, outf):
        w = u((outf, inf), inf)
        b = u((outf,), inf)
        return w.T, b                               # stored (in, out)

    def convT(ic, oc, k):
        # ConvTranspose2d weight (IC,OC,KH,KW) -> scatter matmul weight (IC, KH*KW*OC)
        w = u((ic, oc, k, k), oc * k * k)
        b = u((oc,), oc * k * k)
        return jnp.transpose(w, (0, 2, 3, 1)).reshape(ic, k * k * oc), b

    p = {}
    p["enc1_w"], p["enc1_b"] = conv(32, 1, 4)            # Conv2d(1, 32, 4, stride=2)
    p["enc2_w"], p["enc2_b"] = conv(64, 32, 5)           # Conv2d(32, 64, 5, stride=2)
    p["enc3_w"], p["enc3_b"] = conv(HIDDEN_DIM, 64, 5)   # Conv2d(64, 128, 5)
    p["mu_w"], p["mu_b"] = linear(HIDDEN_DIM, HIDDEN_SIZE)
    p["var_w"], p["var_b"] = linear(HIDDEN_DIM, HIDDEN_SIZE)

    wdec, bdec = linear(HIDDEN_SIZE, HIDDEN_DIM)         # Linear(8, 128)
    w_dc1, b_dc1 = convT(HIDDEN_DIM, 64, 5)              # ConvT(128, 64, 5) on 1x1 input
    # no activation between decode-Linear and dc1 -> fold them into one (8, 1600) linear
    p["dec_dc1_w"] = wdec @ w_dc1                        # (8, 5*5*64)
    p["dec_dc1_b"] = bdec @ w_dc1 + jnp.tile(b_dc1, 5 * 5)

    p["dc2_w"], p["dc2_b"] = convT(64, 32, 5)            # ConvT(64, 32, 5, stride=2)
    p["dc3_w"], p["dc3_b"] = convT(32, 1, 4)             # ConvT(32, 1, 4, stride=2)
    return p


# ----------------------------------------------------------------------------
# Full forward pass: returns (mu, log_var, out) like the PyTorch module
# ----------------------------------------------------------------------------
@jax.jit
def vae_forward(params, x_nchw, eps):
    B = x_nchw.shape[0]
    x = jnp.transpose(x_nchw, (0, 2, 3, 1)).astype(COMPUTE_DTYPE)      # NCHW -> NHWC

    # ---- encoder: 28x28 -> 13x13 -> 5x5 ----
    p1, oh1, ow1 = im2col(x, 4, 4, 2)
    h1 = matmul_bias_act(p1.reshape(B * oh1 * ow1, -1),
                         params["enc1_w"], params["enc1_b"], "relu")
    h1 = h1.reshape(B, oh1, ow1, 32)

    p2, oh2, ow2 = im2col(h1, 5, 5, 2)
    h2 = matmul_bias_act(p2.reshape(B * oh2 * ow2, -1),
                         params["enc2_w"], params["enc2_b"], "relu")
    h2 = h2.reshape(B, oh2 * ow2 * 64)                                 # (B, 1600): enc3's full-window patch

    # ---- fused enc3 + bottleneck + decode + dc1 ----
    mu, logvar, d = bottleneck_decode(h2, params, eps)                 # d: relu(ConvT1) NHWC-flat (B, 1600)

    # ---- dc2: ConvT(64->32, k5, s2) as zero-free scatter matmul + col2im ----
    c2 = matmul_plain(d.reshape(B * 25, 64), params["dc2_w"])          # (B*25, 800) f32 contributions
    y2 = col2im_add(c2.reshape(B, 5, 5, 5, 5, 32), 2)                  # (B,13,13,32) pre-bias/pre-ReLU

    # ---- dc3: ConvT(32->1, k4, s2); dc2's bias+ReLU fused as prologue ----
    c3 = prelu_matmul(y2.reshape(B * 13 * 13, 32), params["dc2_b"], params["dc3_w"])
    y3 = col2im_add(c3.reshape(B, 13, 13, 4, 4, 1), 2)                 # (B,28,28,1) pre-bias

    out = bias_sigmoid(y3.reshape(B, 28 * 28), params["dc3_b"])        # (B,784) lane-dense store
    out = jnp.transpose(out.reshape(B, 28, 28, 1), (0, 3, 1, 2))       # NHWC -> NCHW (B,1,28,28)
    return mu, logvar, out


if __name__ == "__main__":
    key = jax.random.PRNGKey(0)
    kp, kx, ke = jax.random.split(key, 3)

    params = init_params(kp)
    B = 2
    x = jax.random.uniform(kx, (B, 1, 28, 28), jnp.float32)
    # Deterministic stand-in for torch.distributions.Normal(0,1).sample(mu.shape)
    eps = jax.random.normal(ke, (B, HIDDEN_SIZE), jnp.float32)

    mu, log_var, out = jax.block_until_ready(vae_forward(params, x, eps))

    assert mu.shape == (B, HIDDEN_SIZE)
    assert log_var.shape == (B, HIDDEN_SIZE)
    assert out.shape == (B, 1, 28, 28)
    assert bool(jnp.all(jnp.isfinite(out)))
    assert bool(jnp.all((out >= 0.0) & (out <= 1.0)))  # sigmoid output
    print("KERNEL_OK")
</pallas_src>

<mosaic_0001>
module attributes {stable_mosaic.version = 11 : i64} {
  func.func @_mm_bias_act_kernel(%arg0: i32, %arg1: memref<256x16xbf16, #tpu.memory_space<vmem>>, %arg2: memref<16x32xbf16, #tpu.memory_space<vmem>>, %arg3: memref<1x32xf32, #tpu.memory_space<vmem>>, %arg4: memref<256x32xbf16, #tpu.memory_space<vmem>>) attributes {dimension_semantics = [#tpu.dimension_semantics<parallel>], iteration_bounds = array<i64: 2>, scalar_prefetch = 0 : i64, scratch_operands = 0 : i64, tpu.core_type = #tpu.core_type<tc>, window_params = [{transform_indices = @transform_0, window_bounds = array<i64: 256, 16>}, {pipeline_mode = #tpu.pipeline_mode<synchronous>, transform_indices = @transform_1, window_bounds = array<i64: 16, 32>}, {pipeline_mode = #tpu.pipeline_mode<synchronous>, transform_indices = @transform_2, window_bounds = array<i64: 1, 32>}, {transform_indices = @transform_3, window_bounds = array<i64: 256, 32>}]} {
    %c0 = arith.constant 0 : index
    %c0_0 = arith.constant 0 : index
    %0 = vector.load %arg1[%c0, %c0_0] : memref<256x16xbf16, #tpu.memory_space<vmem>>, vector<256x16xbf16>
    %c0_1 = arith.constant 0 : index
    %c0_2 = arith.constant 0 : index
    %1 = vector.load %arg2[%c0_1, %c0_2] : memref<16x32xbf16, #tpu.memory_space<vmem>>, vector<16x32xbf16>
    %cst = arith.constant dense<0.000000e+00> : vector<256x32xf32>
    %2 = tpu.matmul %0, %1, %cst {dimension_numbers = #tpu.dot_dimension_numbers<[1], [0], [0], [1], [0, 0, 1, 1], [], []>} : vector<256x16xbf16>, vector<16x32xbf16>, vector<256x32xf32> -> vector<256x32xf32>
    %c0_3 = arith.constant 0 : index
    %c0_4 = arith.constant 0 : index
    %3 = vector.load %arg3[%c0_3, %c0_4] : memref<1x32xf32, #tpu.memory_space<vmem>>, vector<1x32xf32>
    %4 = vector.broadcast %3 : vector<1x32xf32> to vector<256x32xf32>
    %5 = arith.addf %2, %4 : vector<256x32xf32>
    %cst_5 = arith.constant 0.000000e+00 : f32
    %6 = vector.broadcast %cst_5 : f32 to vector<256x32xf32>
    %7 = arith.maximumf %5, %6 : vector<256x32xf32>
    %8 = arith.truncf %7 : vector<256x32xf32> to vector<256x32xbf16>
    %c0_6 = arith.constant 0 : index
    %c0_7 = arith.constant 0 : index
    %9 = vector.load %arg4[%c0_6, %c0_7] : memref<256x32xbf16, #tpu.memory_space<vmem>>, vector<256x32xbf16>
    tpu.vector_store %arg4[%c0_6, %c0_7], %8 {strides = array<i32>} : memref<256x32xbf16, #tpu.memory_space<vmem>>, vector<256x32xbf16>,
    return
  }
  func.func @transform_0(%arg0: i32) -> (i32, i32) {
    %c0_i32 = arith.constant 0 : i32
    %c0_i32_0 = arith.constant 0 : i32
    return %arg0, %c0_i32 : i32, i32
  }
  func.func @transform_1(%arg0: i32) -> (i32, i32) {
    %c0_i32 = arith.constant 0 : i32
    %c0_i32_0 = arith.constant 0 : i32
    %c0_i32_1 = arith.constant 0 : i32
    return %c0_i32, %c0_i32_0 : i32, i32
  }
  func.func @transform_2(%arg0: i32) -> (i32, i32) {
    %c0_i32 = arith.constant 0 : i32
    %c0_i32_0 = arith.constant 0 : i32
    %c0_i32_1 = arith.constant 0 : i32
    return %c0_i32, %c0_i32_0 : i32, i32
  }
  func.func @transform_3(%arg0: i32) -> (i32, i32) {
    %c0_i32 = arith.constant 0 : i32
    %c0_i32_0 = arith.constant 0 : i32
    return %arg0, %c0_i32 : i32, i32
  }
}

module attributes {stable_mosaic.version = 11 : i64} {
  func.func @_mm_bias_act_kernel(%arg0: i32, %arg1: memref<50x800xbf16, #tpu.memory_space<vmem>>, %arg2: memref<800x64xbf16, #tpu.memory_space<vmem>>, %arg3: memref<1x64xf32, #tpu.memory_space<vmem>>, %arg4: memref<50x64xbf16, #tpu.memory_space<vmem>>) attributes {dimension_semantics = [#tpu.dimension_semantics<parallel>], iteration_bounds = array<i64: 1>, scalar_prefetch = 0 : i64, scratch_operands = 0 : i64, tpu.core_type = #tpu.core_type<tc>, window_params = [{transform_indices = @transform_0, window_bounds = array<i64: 50, 800>}, {pipeline_mode = #tpu.pipeline_mode<synchronous>, transform_indices = @transform_1, window_bounds = array<i64: 800, 64>}, {pipeline_mode = #tpu.pipeline_mode<synchronous>, transform_indices = @transform_2, window_bounds = array<i64: 1, 64>}, {transform_indices = @transform_3, window_bounds = array<i64: 50, 64>}]} {
    %c0 = arith.constant 0 : index
    %c0_0 = arith.constant 0 : index
    %0 = vector.load %arg1[%c0, %c0_0] : memref<50x800xbf16, #tpu.memory_space<vmem>>, vector<50x800xbf16>
    %c0_1 = arith.constant 0 : index
    %c0_2 = arith.constant 0 : index
    %1 = vector.load %arg2[%c0_1, %c0_2] : memref<800x64xbf16, #tpu.memory_space<vmem>>, vector<800x64xbf16>
    %cst = arith.constant dense<0.000000e+00> : vector<50x64xf32>
    %2 = tpu.matmul %0, %1, %cst {dimension_numbers = #tpu.dot_dimension_numbers<[1], [0], [0], [1], [0, 0, 1, 1], [], []>} : vector<50x800xbf16>, vector<800x64xbf16>, vector<50x64xf32> -> vector<50x64xf32>
    %c0_3 = arith.constant 0 : index
    %c0_4 = arith.constant 0 : index
    %3 = vector.load %arg3[%c0_3, %c0_4] : memref<1x64xf32, #tpu.memory_space<vmem>>, vector<1x64xf32>
    %4 = vector.broadcast %3 : vector<1x64xf32> to vector<50x64xf32>
    %5 = arith.addf %2, %4 : vector<50x64xf32>
    %cst_5 = arith.constant 0.000000e+00 : f32
    %6 = vector.broadcast %cst_5 : f32 to vector<50x64xf32>
    %7 = arith.maximumf %5, %6 : vector<50x64xf32>
    %8 = arith.truncf %7 : vector<50x64xf32> to vector<50x64xbf16>
    %c0_6 = arith.constant 0 : index
    %c0_7 = arith.constant 0 : index
    %9 = vector.load %arg4[%c0_6, %c0_7] : memref<50x64xbf16, #tpu.memory_space<vmem>>, vector<50x64xbf16>
    tpu.vector_store %arg4[%c0_6, %c0_7], %8 {strides = array<i32>} : memref<50x64xbf16, #tpu.memory_space<vmem>>, vector<50x64xbf16>,
    return
  }
  func.func @transform_0(%arg0: i32) -> (i32, i32) {
    %c0_i32 = arith.constant 0 : i32
    %c0_i32_0 = arith.constant 0 : i32
    return %arg0, %c0_i32 : i32, i32
  }
  func.func @transform_1(%arg0: i32) -> (i32, i32) {
    %c0_i32 = arith.constant 0 : i32
    %c0_i32_0 = arith.constant 0 : i32
    %c0_i32_1 = arith.constant 0 : i32
    return %c0_i32, %c0_i32_0 : i32, i32
  }
  func.func @transform_2(%arg0: i32) -> (i32, i32) {
    %c0_i32 = arith.constant 0 : i32
    %c0_i32_0 = arith.constant 0 : i32
    %c0_i32_1 = arith.constant 0 : i32
    return %c0_i32, %c0_i32_0 : i32, i32
  }
  func.func @transform_3(%arg0: i32) -> (i32, i32) {
    %c0_i32 = arith.constant 0 : i32
    %c0_i32_0 = arith.constant 0 : i32
    return %arg0, %c0_i32 : i32, i32
  }
}

module attributes {stable_mosaic.version = 11 : i64} {
  func.func @_mm_kernel(%arg0: i32, %arg1: memref<50x64xbf16, #tpu.memory_space<vmem>>, %arg2: memref<64x800xbf16, #tpu.memory_space<vmem>>, %arg3: memref<50x800xf32, #tpu.memory_space<vmem>>) attributes {dimension_semantics = [#tpu.dimension_semantics<parallel>], iteration_bounds = array<i64: 1>, scalar_prefetch = 0 : i64, scratch_operands = 0 : i64, tpu.core_type = #tpu.core_type<tc>, window_params = [{transform_indices = @transform_0, window_bounds = array<i64: 50, 64>}, {pipeline_mode = #tpu.pipeline_mode<synchronous>, transform_indices = @transform_1, window_bounds = array<i64: 64, 800>}, {transform_indices = @transform_2, window_bounds = array<i64: 50, 800>}]} {
    %c0 = arith.constant 0 : index
    %c0_0 = arith.constant 0 : index
    %0 = vector.load %arg1[%c0, %c0_0] : memref<50x64xbf16, #tpu.memory_space<vmem>>, vector<50x64xbf16>
    %c0_1 = arith.constant 0 : index
    %c0_2 = arith.constant 0 : index
    %1 = vector.load %arg2[%c0_1, %c0_2] : memref<64x800xbf16, #tpu.memory_space<vmem>>, vector<64x800xbf16>
    %cst = arith.constant dense<0.000000e+00> : vector<50x800xf32>
    %2 = tpu.matmul %0, %1, %cst {dimension_numbers = #tpu.dot_dimension_numbers<[1], [0], [0], [1], [0, 0, 1, 1], [], []>} : vector<50x64xbf16>, vector<64x800xbf16>, vector<50x800xf32> -> vector<50x800xf32>
    %c0_3 = arith.constant 0 : index
    %c0_4 = arith.constant 0 : index
    %3 = vector.load %arg3[%c0_3, %c0_4] : memref<50x800xf32, #tpu.memory_space<vmem>>, vector<50x800xf32>
    tpu.vector_store %arg3[%c0_3, %c0_4], %2 {strides = array<i32>} : memref<50x800xf32, #tpu.memory_space<vmem>>, vector<50x800xf32>,
    return
  }
  func.func @transform_0(%arg0: i32) -> (i32, i32) {
    %c0_i32 = arith.constant 0 : i32
    %c0_i32_0 = arith.constant 0 : i32
    return %arg0, %c0_i32 : i32, i32
  }
  func.func @transform_1(%arg0: i32) -> (i32, i32) {
    %c0_i32 = arith.constant 0 : i32
    %c0_i32_0 = arith.constant 0 : i32
    %c0_i32_1 = arith.constant 0 : i32
    return %c0_i32, %c0_i32_0 : i32, i32
  }
  func.func @transform_2(%arg0: i32) -> (i32, i32) {
    %c0_i32 = arith.constant 0 : i32
    %c0_i32_0 = arith.constant 0 : i32
    return %arg0, %c0_i32 : i32, i32
  }
}

module attributes {stable_mosaic.version = 11 : i64} {
  func.func @_bottleneck_kernel(%arg0: i32, %arg1: memref<2x1600xbf16, #tpu.memory_space<vmem>>, %arg2: memref<1600x128xbf16, #tpu.memory_space<vmem>>, %arg3: memref<1x128xf32, #tpu.memory_space<vmem>>, %arg4: memref<128x16xbf16, #tpu.memory_space<vmem>>, %arg5: memref<1x16xf32, #tpu.memory_space<vmem>>, %arg6: memref<2x8xf32, #tpu.memory_space<vmem>>, %arg7: memref<8x1600xbf16, #tpu.memory_space<vmem>>, %arg8: memref<1x1600xf32, #tpu.memory_space<vmem>>, %arg9: memref<2x16xf32, #tpu.memory_space<vmem>>, %arg10: memref<2x1600xbf16, #tpu.memory_space<vmem>>) attributes {dimension_semantics = [#tpu.dimension_semantics<parallel>], iteration_bounds = array<i64: 1>, scalar_prefetch = 0 : i64, scratch_operands = 0 : i64, tpu.core_type = #tpu.core_type<tc>, window_params = [{transform_indices = @transform_0, window_bounds = array<i64: 2, 1600>}, {pipeline_mode = #tpu.pipeline_mode<synchronous>, transform_indices = @transform_1, window_bounds = array<i64: 1600, 128>}, {pipeline_mode = #tpu.pipeline_mode<synchronous>, transform_indices = @transform_2, window_bounds = array<i64: 1, 128>}, {pipeline_mode = #tpu.pipeline_mode<synchronous>, transform_indices = @transform_3, window_bounds = array<i64: 128, 16>}, {pipeline_mode = #tpu.pipeline_mode<synchronous>, transform_indices = @transform_4, window_bounds = array<i64: 1, 16>}, {transform_indices = @transform_5, window_bounds = array<i64: 2, 8>}, {pipeline_mode = #tpu.pipeline_mode<synchronous>, transform_indices = @transform_6, window_bounds = array<i64: 8, 1600>}, {pipeline_mode = #tpu.pipeline_mode<synchronous>, transform_indices = @transform_7, window_bounds = array<i64: 1, 1600>}, {transform_indices = @transform_8, window_bounds = array<i64: 2, 16>}, {transform_indices = @transform_9, window_bounds = array<i64: 2, 1600>}]} {
    %c0 = arith.constant 0 : index
    %c0_0 = arith.constant 0 : index
    %0 = vector.load %arg1[%c0, %c0_0] : memref<2x1600xbf16, #tpu.memory_space<vmem>>, vector<2x1600xbf16>
    %c0_1 = arith.constant 0 : index
    %c0_2 = arith.constant 0 : index
    %1 = vector.load %arg2[%c0_1, %c0_2] : memref<1600x128xbf16, #tpu.memory_space<vmem>>, vector<1600x128xbf16>
    %cst = arith.constant dense<0.000000e+00> : vector<2x128xf32>
    %2 = tpu.matmul %0, %1, %cst {dimension_numbers = #tpu.dot_dimension_numbers<[1], [0], [0], [1], [0, 0, 1, 1], [], []>} : vector<2x1600xbf16>, vector<1600x128xbf16>, vector<2x128xf32> -> vector<2x128xf32>
    %c0_3 = arith.constant 0 : index
    %c0_4 = arith.constant 0 : index
    %3 = vector.load %arg3[%c0_3, %c0_4] : memref<1x128xf32, #tpu.memory_space<vmem>>, vector<1x128xf32>
    %4 = vector.broadcast %3 : vector<1x128xf32> to vector<2x128xf32>
    %5 = arith.addf %2, %4 : vector<2x128xf32>
    %cst_5 = arith.constant 0.000000e+00 : f32
    %6 = vector.broadcast %cst_5 : f32 to vector<2x128xf32>
    %7 = arith.maximumf %5, %6 : vector<2x128xf32>
    %8 = arith.truncf %7 : vector<2x128xf32> to vector<2x128xbf16>
    %c0_6 = arith.constant 0 : index
    %c0_7 = arith.constant 0 : index
    %9 = vector.load %arg4[%c0_6, %c0_7] : memref<128x16xbf16, #tpu.memory_space<vmem>>, vector<128x16xbf16>
    %cst_8 = arith.constant dense<0.000000e+00> : vector<2x16xf32>
    %10 = tpu.matmul %8, %9, %cst_8 {dimension_numbers = #tpu.dot_dimension_numbers<[1], [0], [0], [1], [0, 0, 1, 1], [], []>} : vector<2x128xbf16>, vector<128x16xbf16>, vector<2x16xf32> -> vector<2x16xf32>
    %c0_9 = arith.constant 0 : index
    %c0_10 = arith.constant 0 : index
    %11 = vector.load %arg5[%c0_9, %c0_10] : memref<1x16xf32, #tpu.memory_space<vmem>>, vector<1x16xf32>
    %12 = vector.broadcast %11 : vector<1x16xf32> to vector<2x16xf32>
    %13 = arith.addf %10, %12 : vector<2x16xf32>
    %c0_11 = arith.constant 0 : index
    %c0_12 = arith.constant 0 : index
    %14 = vector.load %arg9[%c0_11, %c0_12] : memref<2x16xf32, #tpu.memory_space<vmem>>, vector<2x16xf32>
    tpu.vector_store %arg9[%c0_11, %c0_12], %13 {strides = array<i32>} : memref<2x16xf32, #tpu.memory_space<vmem>>, vector<2x16xf32>,
    %15 = vector.extract_strided_slice %13 {offsets = [0, 0], sizes = [2, 8], strides = [1, 1]} : vector<2x16xf32> to vector<2x8xf32>
    %16 = vector.extract_strided_slice %13 {offsets = [0, 8], sizes = [2, 8], strides = [1, 1]} : vector<2x16xf32> to vector<2x8xf32>
    %cst_13 = arith.constant 5.000000e-01 : f32
    %17 = vector.broadcast %cst_13 : f32 to vector<2x8xf32>
    %18 = arith.mulf %16, %17 : vector<2x8xf32>
    %19 = math.exp %18 : vector<2x8xf32>
    %c0_14 = arith.constant 0 : index
    %c0_15 = arith.constant 0 : index
    %20 = vector.load %arg6[%c0_14, %c0_15] : memref<2x8xf32, #tpu.memory_space<vmem>>, vector<2x8xf32>
    %21 = arith.mulf %19, %20 : vector<2x8xf32>
    %22 = arith.addf %21, %15 : vector<2x8xf32>
    %23 = arith.truncf %22 : vector<2x8xf32> to vector<2x8xbf16>
    %c0_16 = arith.constant 0 : index
    %c0_17 = arith.constant 0 : index
    %24 = vector.load %arg7[%c0_16, %c0_17] : memref<8x1600xbf16, #tpu.memory_space<vmem>>, vector<8x1600xbf16>
    %cst_18 = arith.constant dense<0.000000e+00> : vector<2x1600xf32>
    %25 = tpu.matmul %23, %24, %cst_18 {dimension_numbers = #tpu.dot_dimension_numbers<[1], [0], [0], [1], [0, 0, 1, 1], [], []>} : vector<2x8xbf16>, vector<8x1600xbf16>, vector<2x1600xf32> -> vector<2x1600xf32>
    %c0_19 = arith.constant 0 : index
    %c0_20 = arith.constant 0 : index
    %26 = vector.load %arg8[%c0_19, %c0_20] : memref<1x1600xf32, #tpu.memory_space<vmem>>, vector<1x1600xf32>
    %27 = vector.broadcast %26 : vector<1x1600xf32> to vector<2x1600xf32>
    %28 = arith.addf %25, %27 : vector<2x1600xf32>
    %cst_21 = arith.constant 0.000000e+00 : f32
    %29 = vector.broadcast %cst_21 : f32 to vector<2x1600xf32>
    %30 = arith.maximumf %28, %29 : vector<2x1600xf32>
    %31 = arith.truncf %30 : vector<2x1600xf32> to vector<2x1600xbf16>
    %c0_22 = arith.constant 0 : index
    %c0_23 = arith.constant 0 : index
    %32 = vector.load %arg10[%c0_22, %c0_23] : memref<2x1600xbf16, #tpu.memory_space<vmem>>, vector<2x1600xbf16>
    tpu.vector_store %arg10[%c0_22, %c0_23], %31 {strides = array<i32>} : memref<2x1600xbf16, #tpu.memory_space<vmem>>, vector<2x1600xbf16>,
    return
  }
  func.func @transform_0(%arg0: i32) -> (i32, i32) {
    %c0_i32 = arith.constant 0 : i32
    %c0_i32_0 = arith.constant 0 : i32
    return %arg0, %c0_i32 : i32, i32
  }
  func.func @transform_1(%arg0: i32) -> (i32, i32) {
    %c0_i32 = arith.constant 0 : i32
    %c0_i32_0 = arith.constant 0 : i32
    %c0_i32_1 = arith.constant 0 : i32
    return %c0_i32, %c0_i32_0 : i32, i32
  }
  func.func @transform_2(%arg0: i32) -> (i32, i32) {
    %c0_i32 = arith.constant 0 : i32
    %c0_i32_0 = arith.constant 0 : i32
    %c0_i32_1 = arith.constant 0 : i32
    return %c0_i32, %c0_i32_0 : i32, i32
  }
  func.func @transform_3(%arg0: i32) -> (i32, i32) {
    %c0_i32 = arith.constant 0 : i32
    %c0_i32_0 = arith.constant 0 : i32
    %c0_i32_1 = arith.constant 0 : i32
    return %c0_i32, %c0_i32_0 : i32, i32
  }
  func.func @transform_4(%arg0: i32) -> (i32, i32) {
    %c0_i32 = arith.constant 0 : i32
    %c0_i32_0 = arith.constant 0 : i32
    %c0_i32_1 = arith.constant 0 : i32
    return %c0_i32, %c0_i32_0 : i32, i32
  }
  func.func @transform_5(%arg0: i32) -> (i32, i32) {
    %c0_i32 = arith.constant 0 : i32
    %c0_i32_0 = arith.constant 0 : i32
    return %arg0, %c0_i32 : i32, i32
  }
  func.func @transform_6(%arg0: i32) -> (i32, i32) {
    %c0_i32 = arith.constant 0 : i32
    %c0_i32_0 = arith.constant 0 : i32
    %c0_i32_1 = arith.constant 0 : i32
    return %c0_i32, %c0_i32_0 : i32, i32
  }
  func.func @transform_7(%arg0: i32) -> (i32, i32) {
    %c0_i32 = arith.constant 0 : i32
    %c0_i32_0 = arith.constant 0 : i32
    %c0_i32_1 = arith.constant 0 : i32
    return %c0_i32, %c0_i32_0 : i32, i32
  }
  func.func @transform_8(%arg0: i32) -> (i32, i32) {
    %c0_i32 = arith.constant 0 : i32
    %c0_i32_0 = arith.constant 0 : i32
    return %arg0, %c0_i32 : i32, i32
  }
  func.func @transform_9(%arg0: i32) -> (i32, i32) {
    %c0_i32 = arith.constant 0 : i32
    %c0_i32_0 = arith.constant 0 : i32
    return %arg0, %c0_i32 : i32, i32
  }
}

module attributes {stable_mosaic.version = 11 : i64} {
  func.func @_prelu_mm_kernel(%arg0: i32, %arg1: memref<256x32xf32, #tpu.memory_space<vmem>>, %arg2: memref<1x32xf32, #tpu.memory_space<vmem>>, %arg3: memref<32x16xbf16, #tpu.memory_space<vmem>>, %arg4: memref<256x16xf32, #tpu.memory_space<vmem>>) attributes {dimension_semantics = [#tpu.dimension_semantics<parallel>], iteration_bounds = array<i64: 2>, scalar_prefetch = 0 : i64, scratch_operands = 0 : i64, tpu.core_type = #tpu.core_type<tc>, window_params = [{transform_indices = @transform_0, window_bounds = array<i64: 256, 32>}, {pipeline_mode = #tpu.pipeline_mode<synchronous>, transform_indices = @transform_1, window_bounds = array<i64: 1, 32>}, {pipeline_mode = #tpu.pipeline_mode<synchronous>, transform_indices = @transform_2, window_bounds = array<i64: 32, 16>}, {transform_indices = @transform_3, window_bounds = array<i64: 256, 16>}]} {
    %c0 = arith.constant 0 : index
    %c0_0 = arith.constant 0 : index
    %0 = vector.load %arg1[%c0, %c0_0] : memref<256x32xf32, #tpu.memory_space<vmem>>, vector<256x32xf32>
    %c0_1 = arith.constant 0 : index
    %c0_2 = arith.constant 0 : index
    %1 = vector.load %arg2[%c0_1, %c0_2] : memref<1x32xf32, #tpu.memory_space<vmem>>, vector<1x32xf32>
    %2 = vector.broadcast %1 : vector<1x32xf32> to vector<256x32xf32>
    %3 = arith.addf %0, %2 : vector<256x32xf32>
    %cst = arith.constant 0.000000e+00 : f32
    %4 = vector.broadcast %cst : f32 to vector<256x32xf32>
    %5 = arith.maximumf %3, %4 : vector<256x32xf32>
    %6 = arith.truncf %5 : vector<256x32xf32> to vector<256x32xbf16>
    %c0_3 = arith.constant 0 : index
    %c0_4 = arith.constant 0 : index
    %7 = vector.load %arg3[%c0_3, %c0_4] : memref<32x16xbf16, #tpu.memory_space<vmem>>, vector<32x16xbf16>
    %cst_5 = arith.constant dense<0.000000e+00> : vector<256x16xf32>
    %8 = tpu.matmul %6, %7, %cst_5 {dimension_numbers = #tpu.dot_dimension_numbers<[1], [0], [0], [1], [0, 0, 1, 1], [], []>} : vector<256x32xbf16>, vector<32x16xbf16>, vector<256x16xf32> -> vector<256x16xf32>
    %c0_6 = arith.constant 0 : index
    %c0_7 = arith.constant 0 : index
    %9 = vector.load %arg4[%c0_6, %c0_7] : memref<256x16xf32, #tpu.memory_space<vmem>>, vector<256x16xf32>
    tpu.vector_store %arg4[%c0_6, %c0_7], %8 {strides = array<i32>} : memref<256x16xf32, #tpu.memory_space<vmem>>, vector<256x16xf32>,
    return
  }
  func.func @transform_0(%arg0: i32) -> (i32, i32) {
    %c0_i32 = arith.constant 0 : i32
    %c0_i32_0 = arith.constant 0 : i32
    return %arg0, %c0_i32 : i32, i32
  }
  func.func @transform_1(%arg0: i32) -> (i32, i32) {
    %c0_i32 = arith.constant 0 : i32
    %c0_i32_0 = arith.constant 0 : i32
    %c0_i32_1 = arith.constant 0 : i32
    return %c0_i32, %c0_i32_0 : i32, i32
  }
  func.func @transform_2(%arg0: i32) -> (i32, i32) {
    %c0_i32 = arith.constant 0 : i32
    %c0_i32_0 = arith.constant 0 : i32
    %c0_i32_1 = arith.constant 0 : i32
    return %c0_i32, %c0_i32_0 : i32, i32
  }
  func.func @transform_3(%arg0: i32) -> (i32, i32) {
    %c0_i32 = arith.constant 0 : i32
    %c0_i32_0 = arith.constant 0 : i32
    return %arg0, %c0_i32 : i32, i32
  }
}

module attributes {stable_mosaic.version = 11 : i64} {
  func.func @_bias_sigmoid_kernel(%arg0: i32, %arg1: memref<2x784xf32, #tpu.memory_space<vmem>>, %arg2: memref<1x784xf32, #tpu.memory_space<vmem>>, %arg3: memref<2x784xf32, #tpu.memory_space<vmem>>) attributes {dimension_semantics = [#tpu.dimension_semantics<parallel>], iteration_bounds = array<i64: 1>, scalar_prefetch = 0 : i64, scratch_operands = 0 : i64, tpu.core_type = #tpu.core_type<tc>, window_params = [{transform_indices = @transform_0, window_bounds = array<i64: 2, 784>}, {pipeline_mode = #tpu.pipeline_mode<synchronous>, transform_indices = @transform_1, window_bounds = array<i64: 1, 784>}, {transform_indices = @transform_2, window_bounds = array<i64: 2, 784>}]} {
    %c0 = arith.constant 0 : index
    %c0_0 = arith.constant 0 : index
    %0 = vector.load %arg1[%c0, %c0_0] : memref<2x784xf32, #tpu.memory_space<vmem>>, vector<2x784xf32>
    %c0_1 = arith.constant 0 : index
    %c0_2 = arith.constant 0 : index
    %1 = vector.load %arg2[%c0_1, %c0_2] : memref<1x784xf32, #tpu.memory_space<vmem>>, vector<1x784xf32>
    %2 = vector.broadcast %1 : vector<1x784xf32> to vector<2x784xf32>
    %3 = arith.addf %0, %2 : vector<2x784xf32>
    %cst = arith.constant 0.000000e+00 : f32
    %4 = vector.broadcast %cst : f32 to vector<2x784xf32>
    %5 = arith.subf %4, %3 : vector<2x784xf32>
    %6 = math.exp %5 : vector<2x784xf32>
    %cst_3 = arith.constant 1.000000e+00 : f32
    %7 = vector.broadcast %cst_3 : f32 to vector<2x784xf32>
    %8 = arith.addf %7, %6 : vector<2x784xf32>
    %cst_4 = arith.constant 1.000000e+00 : f32
    %9 = vector.broadcast %cst_4 : f32 to vector<2x784xf32>
    %10 = arith.divf %9, %8 : vector<2x784xf32>
    %c0_5 = arith.constant 0 : index
    %c0_6 = arith.constant 0 : index
    %11 = vector.load %arg3[%c0_5, %c0_6] : memref<2x784xf32, #tpu.memory_space<vmem>>, vector<2x784xf32>
    tpu.vector_store %arg3[%c0_5, %c0_6], %10 {strides = array<i32>} : memref<2x784xf32, #tpu.memory_space<vmem>>, vector<2x784xf32>,
    return
  }
  func.func @transform_0(%arg0: i32) -> (i32, i32) {
    %c0_i32 = arith.constant 0 : i32
    %c0_i32_0 = arith.constant 0 : i32
    return %arg0, %c0_i32 : i32, i32
  }
  func.func @transform_1(%arg0: i32) -> (i32, i32) {
    %c0_i32 = arith.constant 0 : i32
    %c0_i32_0 = arith.constant 0 : i32
    %c0_i32_1 = arith.constant 0 : i32
    return %c0_i32, %c0_i32_0 : i32, i32
  }
  func.func @transform_2(%arg0: i32) -> (i32, i32) {
    %c0_i32 = arith.constant 0 : i32
    %c0_i32_0 = arith.constant 0 : i32
    return %arg0, %c0_i32 : i32, i32
  }
}

</mosaic_0001>

<bundles_post_ra>
// kernel: vae_forward.6
= control target key start
LH: loop header
LB: loop body
LE: loop exit
PB: predicated region body
PF: predicated region fallthrough
CT: control target
= control target key end

     0   :  { %s1452_s12 = smov 0   ;;  %s1454_s13 = smov 0   ;;  %s1765_s0 = inlined_call_operand.vmem [shape: bf16[338,16], index: 0, kind: input, shape index: {}]   ;;  %s1766_s1 = inlined_call_operand.vmem [shape: bf16[16,32], index: 1, kind: input, shape index: {}]   ;;  %s1767_s2 = inlined_call_operand.vmem [shape: f32[1,32], index: 2, kind: input, shape index: {}]   ;;  %s1768_s3 = inlined_call_operand.vmem [shape: bf16[338,32], index: 3, kind: output, shape index: {}]  }
   0x1   :  { %s1456_s14 = smov 0  }
   0x2 LB: > { %s1465_s15 = sadd.s32 4294967295, %s1398_s14   ;;  %s1467_s16 = sadd.s32 1, %s1398_s14   ;;  %s1398_s14 = sphi %s1456_s14, %s1775_s14   ;;  %s1394_s13 = sphi %s1454_s13, %s1774_s13   ;;  %s1390_s12 = sphi %s1452_s12, %s1773_s12  }
   0x3   : > { %s85_s17 = ssub.s32 %s1398_s14, %s1467_s16  ;;  %s88_s18 = sadd.s32 1, %s1394_s13 }
   0x4   : > { %p86_p0 = scmp.eq.s32.totalorder %s85_s17, 0  ;;  %p98_p1 = scmp.ne.s32.totalorder %s1394_s13, %s1390_s12 }
   0x5   : > { %p99_p2 = scmp.eq.s32.totalorder %s1465_s15, 1  ;;  %p1064_p3 = scmp.ge.s32.totalorder %s1398_s14, 1 }
   0x6   : > { %s1475_s19 = scalar_select %p86_p0, %s1394_s13, %s88_s18  }
   0x7   : > { %p1477_p4 = por %p99_p2, %p98_p1  ;;  %p146_p5 = scmp.lt.s32.totalorder %s1398_s14, 3 }
   0x9   : > { %p147_p6 = pnand %p1064_p3, %p146_p5 }
   0xa   : > { %v1327_v0 = vld [vmem:[%s1766_s1] sm:$0xff] (!%p147_p6)   ;;  %s1485_s23 = sshll.u32 (!%p147_p6), %s1465_s15, 5  ;;  %vm320_vm0 = vcmask (!%p147_p6), 130048   ;;  %s170_s29 = sand.u32 (!%p147_p6), 1, %s1390_s12   ;;  %vm690_vm1 = vcmask (!%p147_p6), 257024  }
   0xb   : > { %150 = sbr.rel (%p147_p6) target bundleno = 341 (0x155), region = 32  ;;  %p178_p7 = scmp.lt.s32.totalorder (!%p147_p6), %s1485_s23, 42  ;;  %1203 = vmatprep.subr.bf16.mxu0 (!%p147_p6), %v1327_v0  ;;  %1237 = vmatprep.subr.bf16.mxu1 (!%p147_p6), %v1327_v0  ;;  %v1530_v17 = vld [vmem:[%s1767_s2] ss:$0 sm:$0xff] (!%p147_p6) }
   0xc   : > { %1204 = vmatpush3.bf16.msra.mxu0 (!%p147_p6), %v1327_v0  ;;  %1238 = vmatpush3.bf16.msra.mxu1 (!%p147_p6), %v1327_v0  ;;  %s1065_s5 = sshll.u32 (!%p147_p6), %s170_s29, 7 }
   0xd   : > { %s1540_s6 = scalar_lea.vmem (!%p147_p6), [#allocation2], %s1065_s5  }
  0x12   : > { %s179_s24 = scalar_select %p178_p7, %s1485_s23, 42 }
  0x13   : > { %s731_s7 = ssub.s32 (%p1477_p4), 43, %s1485_s23  ;;  %s1183_s8 = sshll.u32 (%p1477_p4), %s1465_s15, 7 }
  0x14   : > { %s1067_s25 = sshll.u32 %s179_s24, 2  ;;  %p732_p8 = scmp.lt.s32.totalorder (%p1477_p4), %s731_s7, 32 }
  0x15   : > { %s1492_s28 = scalar_lea.vmem %s1765_s0, %s1067_s25  ;;  %s1637_s11 = scalar_lea.vmem (%p1477_p4), %s1768_s3, %s1183_s8  }
  0x16   : > { %v1328_v1 = vld [vmem:[%s1492_s28] sm:$0xff]   ;;  %v1330_v3 = vld [vmem:[%s1492_s28 + $0x8] sm:$0xff]   ;;  %v1332_v5 = vld [vmem:[%s1492_s28 + $0x10] sm:$0xff]  }
  0x17   : > { %v1329_v2 = vld [vmem:[%s1492_s28 + $0x40] sm:$0xff]   ;;  %1205 = vmatprep.mubr.msk.bf16.mxu0 %vm320_vm0, %v1328_v1  ;;  %v1331_v4 = vld [vmem:[%s1492_s28 + $0x48] sm:$0xff]   ;;  %v1333_v6 = vld [vmem:[%s1492_s28 + $0x50] sm:$0xff]  }
  0x18   : > { %1221 = vmatprep.mubr.msk.bf16.mxu1 %vm320_vm0, %v1329_v2  ;;  %1206 = vmatmul.mubr.msk.bf16.vlgmr.msra.gmra.mrb[0].mxu0 %vm320_vm0, %v1330_v3  ;;  %v1334_v7 = vld [vmem:[%s1492_s28 + $0x18] sm:$0xff]   ;;  %v1336_v9 = vld [vmem:[%s1492_s28 + $0x20] sm:$0xff]   ;;  %v1338_v11 = vld [vmem:[%s1492_s28 + $0x28] sm:$0xff]  }
  0x19   : > { %1222 = vmatmul.mubr.msk.bf16.vlgmr.msra.gmra.mrb[0].mxu1 %vm320_vm0, %v1331_v4  ;;  %1209 = vmatprep.mubr.msk.bf16.mxu0 %vm320_vm0, %v1332_v5  ;;  %v1335_v8 = vld [vmem:[%s1492_s28 + $0x58] sm:$0xff]   ;;  %v1337_v10 = vld [vmem:[%s1492_s28 + $0x60] sm:$0xff]   ;;  %v1339_v12 = vld [vmem:[%s1492_s28 + $0x68] sm:$0xff]  }
  0x1a   : > { %1225 = vmatprep.mubr.msk.bf16.mxu1 %vm320_vm0, %v1333_v6  ;;  %v1340_v13 = vld [vmem:[%s1492_s28 + $0x30] sm:$0xff]   ;;  %v1342_v15 = vld [vmem:[%s1492_s28 + $0x38] sm:$0xff]  }
  0x1b   : > { %v1341_v14 = vld [vmem:[%s1492_s28 + $0x70] sm:$0xff]   ;;  %v1343_v16 = vld [vmem:[%s1492_s28 + $0x78] sm:$0xff]  }
  0x20   : > { %1210 = vmatmul.mubr.msk.bf16.gmra.mrb[4].mxu0 %vm320_vm0, %v1334_v7 }
  0x21   : > { %1226 = vmatmul.mubr.msk.bf16.gmra.mrb[4].mxu1 %vm320_vm0, %v1335_v8  ;;  %1213 = vmatprep.mubr.msk.bf16.mxu0 %vm320_vm0, %v1336_v9 }
  0x22   : > { %1229 = vmatprep.mubr.msk.bf16.mxu1 %vm320_vm0, %v1337_v10 }
  0x28   : > { %1214 = vmatmul.mubr.msk.bf16.gmra.mrb[8].mxu0 %vm320_vm0, %v1338_v11 }
  0x29   : > { %1230 = vmatmul.mubr.msk.bf16.gmra.mrb[8].mxu1 %vm320_vm0, %v1339_v12  ;;  %1217 = vmatprep.mubr.msk.bf16.mxu0 %vm320_vm0, %v1340_v13 }
  0x2a   : > { %1233 = vmatprep.mubr.msk.bf16.mxu1 %vm320_vm0, %v1341_v14 }
  0x30   : > { %1218 = vmatmul.mubr.msk.bf16.gmra.mrb[12].mxu0 %vm320_vm0, %v1342_v15 }
  0x31   : > { %1234 = vmatmul.mubr.msk.bf16.gmra.mrb[12].mxu1 %vm320_vm0, %v1343_v16 }
  0xeb   : > { %v1207_v18 = vpop.f32.mrb[0].mxu0 }
  0xec   : > { %v412_v19 = vadd.f32 %v1207_v18, %v1530_v17  ;;  %v1223_v20 = vpop.f32.mrb[0].mxu1  ;;  %v403_v21 = vpop.f32.mrb[1].mxu0 }
  0xed   : > { %v476_v22 = vadd.f32 %v1223_v20, %v1530_v17  ;;  %v404_v23 = vadd.f32 %v1530_v17, %v403_v21  ;;  %v467_v24 = vpop.f32.mrb[1].mxu1  ;;  %v1208_v25 = vpop.f32.mrb[2].mxu0 }
  0xee   : > { %v532_v26 = vmax.f32 %v412_v19, 0.0  ;;  %v468_v27 = vadd.f32 %v1530_v17, %v467_v24  ;;  %v415_v28 = vadd.f32 %v1208_v25, %v1530_v17  ;;  %v1224_v29 = vpop.f32.mrb[2].mxu1  ;;  %v406_v30 = vpop.f32.mrb[3].mxu0 }
  0xef   : > { %v548_v31 = vmax.f32 %v476_v22, 0.0  ;;  %v530_v32 = vmax.f32 %v404_v23, 0.0  ;;  %v479_v33 = vadd.f32 %v1224_v29, %v1530_v17  ;;  %v407_v34 = vadd.f32 %v1530_v17, %v406_v30  ;;  %v470_v35 = vpop.f32.mrb[3].mxu1 }
  0xf0   : > { %v1153_v36 = vpack.c.bf16 %v532_v26, %v532_v26  ;;  %v546_v37 = vmax.f32 %v468_v27, 0.0  ;;  %v533_v38 = vmax.f32 %v415_v28, 0.0  ;;  %v471_v39 = vadd.f32 %v1530_v17, %v470_v35 }
  0xf1   : > { %v1169_v40 = vpack.c.bf16 %v548_v31, %v548_v31  ;;  %v1151_v41 = vpack.c.bf16 %v530_v32, %v530_v32  ;;  %v549_v42 = vmax.f32 %v479_v33, 0.0  ;;  %v531_v43 = vmax.f32 %v407_v34, 0.0 }
  0xf2   : > { %693 = vst.msk [vmem:[%s1540_s6 + $0x8] sm:$0xf] %vm690_vm1, %v1153_v36  ;;  %v1167_v44 = vpack.c.bf16 %v546_v37, %v546_v37  ;;  %v1154_v45 = vpack.c.bf16 %v533_v38, %v533_v38  ;;  %v547_v46 = vmax.f32 %v471_v39, 0.0 }
  0xf3   : > { %709 = vst.msk [vmem:[%s1540_s6 + $0x48] sm:$0xf] %vm690_vm1, %v1169_v40  ;;  %691 = vst.msk [vmem:[%s1540_s6] sm:$0xf] %vm690_vm1, %v1151_v41  ;;  %v1170_v47 = vpack.c.bf16 %v549_v42, %v549_v42  ;;  %v1152_v48 = vpack.c.bf16 %v531_v43, %v531_v43  ;;  %v1211_v49 = vpop.f32.mrb[4].mxu0 }
  0xf4   : > { %707 = vst.msk [vmem:[%s1540_s6 + $0x40] sm:$0xf] %vm690_vm1, %v1167_v44  ;;  %694 = vst.msk [vmem:[%s1540_s6 + $0xc] sm:$0xf] %vm690_vm1, %v1154_v45  ;;  %v1168_v50 = vpack.c.bf16 %v547_v46, %v547_v46  ;;  %v428_v51 = vadd.f32 %v1211_v49, %v1530_v17  ;;  %v1227_v52 = vpop.f32.mrb[4].mxu1  ;;  %v419_v53 = vpop.f32.mrb[5].mxu0 }
  0xf5   : > { %710 = vst.msk [vmem:[%s1540_s6 + $0x4c] sm:$0xf] %vm690_vm1, %v1170_v47  ;;  %692 = vst.msk [vmem:[%s1540_s6 + $0x4] sm:$0xf] %vm690_vm1, %v1152_v48  ;;  %v492_v54 = vadd.f32 %v1227_v52, %v1530_v17  ;;  %v420_v55 = vadd.f32 %v1530_v17, %v419_v53  ;;  %v483_v56 = vpop.f32.mrb[5].mxu1  ;;  %v1212_v57 = vpop.f32.mrb[6].mxu0 }
  0xf6   : > { %708 = vst.msk [vmem:[%s1540_s6 + $0x44] sm:$0xf] %vm690_vm1, %v1168_v50  ;;  %v536_v58 = vmax.f32 %v428_v51, 0.0  ;;  %v484_v59 = vadd.f32 %v1530_v17, %v483_v56  ;;  %v431_v60 = vadd.f32 %v1212_v57, %v1530_v17  ;;  %v1228_v61 = vpop.f32.mrb[6].mxu1  ;;  %v422_v62 = vpop.f32.mrb[7].mxu0 }
  0xf7   : > { %v552_v63 = vmax.f32 %v492_v54, 0.0  ;;  %v534_v0 = vmax.f32 %v420_v55, 0.0  ;;  %v495_v1 = vadd.f32 %v1228_v61, %v1530_v17  ;;  %v423_v2 = vadd.f32 %v1530_v17, %v422_v62  ;;  %v486_v3 = vpop.f32.mrb[7].mxu1 }
  0xf8   : > { %v1157_v4 = vpack.c.bf16 %v536_v58, %v536_v58  ;;  %v550_v5 = vmax.f32 %v484_v59, 0.0  ;;  %v537_v6 = vmax.f32 %v431_v60, 0.0  ;;  %v487_v7 = vadd.f32 %v1530_v17, %v486_v3 }
  0xf9   : > { %v1173_v8 = vpack.c.bf16 %v552_v63, %v552_v63  ;;  %v1155_v9 = vpack.c.bf16 %v534_v0, %v534_v0  ;;  %v553_v10 = vmax.f32 %v495_v1, 0.0  ;;  %v535_v11 = vmax.f32 %v423_v2, 0.0 }
  0xfa   : > { %697 = vst.msk [vmem:[%s1540_s6 + $0x18] sm:$0xf] %vm690_vm1, %v1157_v4  ;;  %v1171_v12 = vpack.c.bf16 %v550_v5, %v550_v5  ;;  %v1158_v13 = vpack.c.bf16 %v537_v6, %v537_v6  ;;  %v551_v14 = vmax.f32 %v487_v7, 0.0 }
  0xfb   : > { %713 = vst.msk [vmem:[%s1540_s6 + $0x58] sm:$0xf] %vm690_vm1, %v1173_v8  ;;  %695 = vst.msk [vmem:[%s1540_s6 + $0x10] sm:$0xf] %vm690_vm1, %v1155_v9  ;;  %v1174_v15 = vpack.c.bf16 %v553_v10, %v553_v10  ;;  %v1156_v16 = vpack.c.bf16 %v535_v11, %v535_v11  ;;  %v1215_v18 = vpop.f32.mrb[8].mxu0 }
  0xfc   : > { %711 = vst.msk [vmem:[%s1540_s6 + $0x50] sm:$0xf] %vm690_vm1, %v1171_v12  ;;  %698 = vst.msk [vmem:[%s1540_s6 + $0x1c] sm:$0xf] %vm690_vm1, %v1158_v13  ;;  %v1172_v19 = vpack.c.bf16 %v551_v14, %v551_v14  ;;  %v444_v20 = vadd.f32 %v1215_v18, %v1530_v17  ;;  %v1231_v21 = vpop.f32.mrb[8].mxu1  ;;  %v435_v22 = vpop.f32.mrb[9].mxu0 }
  0xfd   : > { %714 = vst.msk [vmem:[%s1540_s6 + $0x5c] sm:$0xf] %vm690_vm1, %v1174_v15  ;;  %696 = vst.msk [vmem:[%s1540_s6 + $0x14] sm:$0xf] %vm690_vm1, %v1156_v16  ;;  %v508_v23 = vadd.f32 %v1231_v21, %v1530_v17  ;;  %v436_v24 = vadd.f32 %v1530_v17, %v435_v22  ;;  %v499_v25 = vpop.f32.mrb[9].mxu1  ;;  %v1216_v26 = vpop.f32.mrb[10].mxu0 }
  0xfe   : > { %712 = vst.msk [vmem:[%s1540_s6 + $0x54] sm:$0xf] %vm690_vm1, %v1172_v19  ;;  %v540_v27 = vmax.f32 %v444_v20, 0.0  ;;  %v500_v28 = vadd.f32 %v1530_v17, %v499_v25  ;;  %v447_v29 = vadd.f32 %v1216_v26, %v1530_v17  ;;  %v1232_v30 = vpop.f32.mrb[10].mxu1  ;;  %v438_v31 = vpop.f32.mrb[11].mxu0 }
  0xff   : > { %v556_v32 = vmax.f32 %v508_v23, 0.0  ;;  %v538_v33 = vmax.f32 %v436_v24, 0.0  ;;  %v511_v34 = vadd.f32 %v1232_v30, %v1530_v17  ;;  %v439_v35 = vadd.f32 %v1530_v17, %v438_v31  ;;  %v502_v36 = vpop.f32.mrb[11].mxu1 }
 0x100   : > { %v1161_v37 = vpack.c.bf16 %v540_v27, %v540_v27  ;;  %v554_v38 = vmax.f32 %v500_v28, 0.0  ;;  %v541_v39 = vmax.f32 %v447_v29, 0.0  ;;  %v503_v40 = vadd.f32 %v1530_v17, %v502_v36 }
 0x101   : > { %v1177_v41 = vpack.c.bf16 %v556_v32, %v556_v32  ;;  %v1159_v42 = vpack.c.bf16 %v538_v33, %v538_v33  ;;  %v557_v43 = vmax.f32 %v511_v34, 0.0  ;;  %v539_v44 = vmax.f32 %v439_v35, 0.0 }
 0x102   : > { %701 = vst.msk [vmem:[%s1540_s6 + $0x28] sm:$0xf] %vm690_vm1, %v1161_v37  ;;  %v1175_v45 = vpack.c.bf16 %v554_v38, %v554_v38  ;;  %v1162_v46 = vpack.c.bf16 %v541_v39, %v541_v39  ;;  %v555_v47 = vmax.f32 %v503_v40, 0.0 }
 0x103   : > { %717 = vst.msk [vmem:[%s1540_s6 + $0x68] sm:$0xf] %vm690_vm1, %v1177_v41  ;;  %699 = vst.msk [vmem:[%s1540_s6 + $0x20] sm:$0xf] %vm690_vm1, %v1159_v42  ;;  %v1178_v48 = vpack.c.bf16 %v557_v43, %v557_v43  ;;  %v1160_v49 = vpack.c.bf16 %v539_v44, %v539_v44  ;;  %v1219_v50 = vpop.f32.mrb[12].mxu0 }
 0x104   : > { %715 = vst.msk [vmem:[%s1540_s6 + $0x60] sm:$0xf] %vm690_vm1, %v1175_v45  ;;  %702 = vst.msk [vmem:[%s1540_s6 + $0x2c] sm:$0xf] %vm690_vm1, %v1162_v46  ;;  %v1176_v51 = vpack.c.bf16 %v555_v47, %v555_v47  ;;  %v460_v52 = vadd.f32 %v1219_v50, %v1530_v17  ;;  %v1235_v53 = vpop.f32.mrb[12].mxu1  ;;  %v451_v54 = vpop.f32.mrb[13].mxu0 }
 0x105   : > { %718 = vst.msk [vmem:[%s1540_s6 + $0x6c] sm:$0xf] %vm690_vm1, %v1178_v48  ;;  %700 = vst.msk [vmem:[%s1540_s6 + $0x24] sm:$0xf] %vm690_vm1, %v1160_v49  ;;  %v524_v55 = vadd.f32 %v1235_v53, %v1530_v17  ;;  %v452_v56 = vadd.f32 %v1530_v17, %v451_v54  ;;  %v515_v57 = vpop.f32.mrb[13].mxu1  ;;  %v1220_v58 = vpop.f32.mrb[14].mxu0 }
 0x106   : > { %716 = vst.msk [vmem:[%s1540_s6 + $0x64] sm:$0xf] %vm690_vm1, %v1176_v51  ;;  %v544_v59 = vmax.f32 %v460_v52, 0.0  ;;  %v516_v60 = vadd.f32 %v1530_v17, %v515_v57  ;;  %v463_v61 = vadd.f32 %v1220_v58, %v1530_v17  ;;  %v1236_v62 = vpop.f32.mrb[14].mxu1  ;;  %v454_v63 = vpop.f32.mrb[15].mxu0 }
 0x107   : > { %v560_v0 = vmax.f32 %v524_v55, 0.0  ;;  %v542_v1 = vmax.f32 %v452_v56, 0.0  ;;  %v527_v2 = vadd.f32 %v1236_v62, %v1530_v17  ;;  %v455_v3 = vadd.f32 %v1530_v17, %v454_v63  ;;  %v518_v4 = vpop.f32.mrb[15].mxu1 }
 0x108   : > { %v1165_v5 = vpack.c.bf16 %v544_v59, %v544_v59  ;;  %v558_v6 = vmax.f32 %v516_v60, 0.0  ;;  %v545_v7 = vmax.f32 %v463_v61, 0.0  ;;  %v519_v8 = vadd.f32 %v1530_v17, %v518_v4  ;;  %729 = sbr.rel (!%p1477_p4) target bundleno = 341 (0x155), region = 36 }
 0x109   : > { %v1181_v9 = vpack.c.bf16 %v560_v0, %v560_v0  ;;  %v1163_v10 = vpack.c.bf16 %v542_v1, %v542_v1  ;;  %v561_v11 = vmax.f32 %v527_v2, 0.0  ;;  %v543_v12 = vmax.f32 %v455_v3, 0.0 }
 0x10a   : > { %705 = vst.msk [vmem:[%s1540_s6 + $0x38] sm:$0xf] %vm690_vm1, %v1165_v5  ;;  %v1179_v13 = vpack.c.bf16 %v558_v6, %v558_v6  ;;  %v1166_v14 = vpack.c.bf16 %v545_v7, %v545_v7  ;;  %v559_v15 = vmax.f32 %v519_v8, 0.0 }
 0x10b   : > { %721 = vst.msk [vmem:[%s1540_s6 + $0x78] sm:$0xf] %vm690_vm1, %v1181_v9  ;;  %703 = vst.msk [vmem:[%s1540_s6 + $0x30] sm:$0xf] %vm690_vm1, %v1163_v10  ;;  %v1182_v16 = vpack.c.bf16 %v561_v11, %v561_v11  ;;  %v1164_v18 = vpack.c.bf16 %v543_v12, %v543_v12 }
 0x10c   : > { %719 = vst.msk [vmem:[%s1540_s6 + $0x70] sm:$0xf] %vm690_vm1, %v1179_v13  ;;  %706 = vst.msk [vmem:[%s1540_s6 + $0x3c] sm:$0xf] %vm690_vm1, %v1166_v14  ;;  %v1180_v17 = vpack.c.bf16 %v559_v15, %v559_v15 }
 0x10d   : > { %722 = vst.msk [vmem:[%s1540_s6 + $0x7c] sm:$0xf] %vm690_vm1, %v1182_v16  ;;  %704 = vst.msk [vmem:[%s1540_s6 + $0x34] sm:$0xf] %vm690_vm1, %v1164_v18 }
 0x10e   : > { %720 = vst.msk [vmem:[%s1540_s6 + $0x74] sm:$0xf] %vm690_vm1, %v1180_v17 }
 0x10f   : > { %s1777_s7 = smov (!%p732_p8, %s731_s7), 32 }
 0x110   : > { %s1136_s12 = sshll.u32 %s1777_s7, 6 }
 0x111   : > { %p1139_p9 = scmp.eq.s32.totalorder %s1136_s12, 0 }
 0x112   : > { %s1643_s14 = sshrl.u32 (!%p1139_p9), %s1777_s7, 5 }
 0x113   : > { %740 = sbr.rel (%p1139_p9) target bundleno = 341 (0x155), region = 40  ;;  %p1140_p10 = scmp.le.s32.totalorder (!%p1139_p9), %s1643_s14, 0 }
 0x11a   : > { %1017 = sbr.rel (%p1140_p10) target bundleno = 320 (0x140), region = 112  ;;  %s1770_s15 = smov (!%p1140_p10), %s1637_s11 }
 0x11b   : > { %s1771_s17 = smov (!%p1140_p10), %s1540_s6  ;;  %s1652_s18 = smov (!%p1140_p10), 0  }
 0x11c   : > { %s1654_s20 = smov (!%p1140_p10), 0  }
 0x121 LB: >> { %v756_v19 = vld [vmem:[%s1406_s17] sm:$0xf]  ;;  %v758_v20 = vld [vmem:[%s1406_s17 + $0x4] sm:$0xf]  ;;  %v760_v21 = vld [vmem:[%s1406_s17 + $0x8] sm:$0xf]  ;;  %s1414_s20 = sphi %s1654_s20, %s750_s20   ;;  %s1410_s18 = sphi %s1652_s18, %s1772_s18   ;;  %s1406_s17 = sphi %s1771_s17, %s825_s17   ;;  %s1402_s15 = sphi %s1770_s15, %s826_s15  }
 0x122   : >> { %757 = vst [vmem:[%s1402_s15] sm:$0xf] %v756_v19  ;;  %759 = vst [vmem:[%s1402_s15 + $0x4] sm:$0xf] %v758_v20  ;;  %v762_v22 = vld [vmem:[%s1406_s17 + $0xc] sm:$0xf]  ;;  %s820_s21 = sadd.s32 1, %s1410_s18 }
 0x123   : >> { %761 = vst [vmem:[%s1402_s15 + $0x8] sm:$0xf] %v760_v21  ;;  %v764_v23 = vld [vmem:[%s1406_s17 + $0x10] sm:$0xf]  ;;  %v766_v24 = vld [vmem:[%s1406_s17 + $0x14] sm:$0xf]  ;;  %p821_p11 = scmp.ge.s32.totalorder %s820_s21, %s1643_s14 }
 0x124   : >> { %763 = vst [vmem:[%s1402_s15 + $0xc] sm:$0xf] %v762_v22  ;;  %765 = vst [vmem:[%s1402_s15 + $0x10] sm:$0xf] %v764_v23  ;;  %v768_v25 = vld [vmem:[%s1406_s17 + $0x18] sm:$0xf] }
 0x125   : >> { %767 = vst [vmem:[%s1402_s15 + $0x14] sm:$0xf] %v766_v24  ;;  %v770_v26 = vld [vmem:[%s1406_s17 + $0x1c] sm:$0xf]  ;;  %v772_v27 = vld [vmem:[%s1406_s17 + $0x20] sm:$0xf] }
 0x126   : >> { %769 = vst [vmem:[%s1402_s15 + $0x18] sm:$0xf] %v768_v25  ;;  %771 = vst [vmem:[%s1402_s15 + $0x1c] sm:$0xf] %v770_v26  ;;  %v774_v28 = vld [vmem:[%s1406_s17 + $0x24] sm:$0xf] }
 0x127   : >> { %773 = vst [vmem:[%s1402_s15 + $0x20] sm:$0xf] %v772_v27  ;;  %v776_v29 = vld [vmem:[%s1406_s17 + $0x28] sm:$0xf]  ;;  %v778_v30 = vld [vmem:[%s1406_s17 + $0x2c] sm:$0xf] }
 0x128   : >> { %775 = vst [vmem:[%s1402_s15 + $0x24] sm:$0xf] %v774_v28  ;;  %777 = vst [vmem:[%s1402_s15 + $0x28] sm:$0xf] %v776_v29  ;;  %v780_v31 = vld [vmem:[%s1406_s17 + $0x30] sm:$0xf] }
 0x129   : >> { %779 = vst [vmem:[%s1402_s15 + $0x2c] sm:$0xf] %v778_v30  ;;  %v782_v32 = vld [vmem:[%s1406_s17 + $0x34] sm:$0xf]  ;;  %v784_v33 = vld [vmem:[%s1406_s17 + $0x38] sm:$0xf] }
 0x12a   : >> { %781 = vst [vmem:[%s1402_s15 + $0x30] sm:$0xf] %v780_v31  ;;  %783 = vst [vmem:[%s1402_s15 + $0x34] sm:$0xf] %v782_v32  ;;  %v786_v34 = vld [vmem:[%s1406_s17 + $0x3c] sm:$0xf] }
 0x12b   : >> { %785 = vst [vmem:[%s1402_s15 + $0x38] sm:$0xf] %v784_v33  ;;  %v788_v35 = vld [vmem:[%s1406_s17 + $0x40] sm:$0xf]  ;;  %v790_v36 = vld [vmem:[%s1406_s17 + $0x44] sm:$0xf] }
 0x12c   : >> { %787 = vst [vmem:[%s1402_s15 + $0x3c] sm:$0xf] %v786_v34  ;;  %789 = vst [vmem:[%s1402_s15 + $0x40] sm:$0xf] %v788_v35  ;;  %v792_v37 = vld [vmem:[%s1406_s17 + $0x48] sm:$0xf] }
 0x12d   : >> { %791 = vst [vmem:[%s1402_s15 + $0x44] sm:$0xf] %v790_v36  ;;  %v794_v38 = vld [vmem:[%s1406_s17 + $0x4c] sm:$0xf]  ;;  %v796_v39 = vld [vmem:[%s1406_s17 + $0x50] sm:$0xf] }
 0x12e   : >> { %793 = vst [vmem:[%s1402_s15 + $0x48] sm:$0xf] %v792_v37  ;;  %795 = vst [vmem:[%s1402_s15 + $0x4c] sm:$0xf] %v794_v38  ;;  %v798_v40 = vld [vmem:[%s1406_s17 + $0x54] sm:$0xf] }
 0x12f   : >> { %797 = vst [vmem:[%s1402_s15 + $0x50] sm:$0xf] %v796_v39  ;;  %v800_v41 = vld [vmem:[%s1406_s17 + $0x58] sm:$0xf]  ;;  %v802_v42 = vld [vmem:[%s1406_s17 + $0x5c] sm:$0xf] }
 0x130   : >> { %799 = vst [vmem:[%s1402_s15 + $0x54] sm:$0xf] %v798_v40  ;;  %801 = vst [vmem:[%s1402_s15 + $0x58] sm:$0xf] %v800_v41  ;;  %v804_v43 = vld [vmem:[%s1406_s17 + $0x60] sm:$0xf] }
 0x131   : >> { %803 = vst [vmem:[%s1402_s15 + $0x5c] sm:$0xf] %v802_v42  ;;  %v806_v44 = vld [vmem:[%s1406_s17 + $0x64] sm:$0xf]  ;;  %v808_v45 = vld [vmem:[%s1406_s17 + $0x68] sm:$0xf] }
 0x132   : >> { %805 = vst [vmem:[%s1402_s15 + $0x60] sm:$0xf] %v804_v43  ;;  %807 = vst [vmem:[%s1402_s15 + $0x64] sm:$0xf] %v806_v44  ;;  %v810_v46 = vld [vmem:[%s1406_s17 + $0x6c] sm:$0xf] }
 0x133   : >> { %809 = vst [vmem:[%s1402_s15 + $0x68] sm:$0xf] %v808_v45  ;;  %v812_v47 = vld [vmem:[%s1406_s17 + $0x70] sm:$0xf]  ;;  %v814_v48 = vld [vmem:[%s1406_s17 + $0x74] sm:$0xf] }
 0x134   : >> { %811 = vst [vmem:[%s1402_s15 + $0x6c] sm:$0xf] %v810_v46  ;;  %813 = vst [vmem:[%s1402_s15 + $0x70] sm:$0xf] %v812_v47  ;;  %v816_v49 = vld [vmem:[%s1406_s17 + $0x78] sm:$0xf] }
 0x135   : >> { %815 = vst [vmem:[%s1402_s15 + $0x74] sm:$0xf] %v814_v48  ;;  %v818_v50 = vld [vmem:[%s1406_s17 + $0x7c] sm:$0xf]  ;;  %817 = vst [vmem:[%s1402_s15 + $0x78] sm:$0xf] %v816_v49 }
 0x136   : >> { %819 = vst [vmem:[%s1402_s15 + $0x7c] sm:$0xf] %v818_v50  ;;  %s1779_s21 = smov (%p821_p11, %s820_s21), 0  ;;  %s750_s20 = sadd.s32 1, %s1414_s20  }
 0x137   : >> { %s1141_s22 = sshll.u32 %s1779_s21, 7  ;;  %p749_p12 = scmp.ge.s32.totalorder %s750_s20, %s1643_s14 }
 0x138   : >> { %s825_s17 = scalar_lea.vmem %s1540_s6, %s1141_s22 [#allocation2]   ;;  %s826_s15 = scalar_lea.vmem %s1637_s11, %s1141_s22  }
 0x139   : >> { %s1772_s18 = smov %s1779_s21  ;;  %752 = sbr.rel (!%p749_p12) target bundleno = 289 (0x121), region = 118 }
 0x140 PF: > { %s1747_s23 = sand.u32 31, %s1777_s7   ;;  %s1184_s24 = sshll.u32 %s1643_s14, 7 }
 0x141   : > { %s831_s25 = scalar_lea.vmem %s1540_s6, %s1184_s24 [#allocation2]   ;;  %s833_s26 = scalar_lea.vmem %s1637_s11, %s1184_s24  }
 0x142   : > { %p1146_p13 = scmp.le.s32.totalorder %s1747_s23, 0 }
 0x143   : > { %s1416_s27 = smov (!%p1146_p13), %s833_s26   ;;  %s1420_s28 = smov (!%p1146_p13), %s831_s25  }
 0x144   : > { %1031 = sbr.rel (%p1146_p13) target bundleno = 341 (0x155), region = 123  ;;  %s1424_s29 = smov (!%p1146_p13), 0  }
 0x145   : > { %s1428_s30 = smov (!%p1146_p13), 0  }
 0x14b LB: >> { %v843_v51 = vld [vmem:[%s1422_s28] sm:$0xf]  ;;  %s845_s4 = sadd.s32 1, %s1426_s29  ;;  %s837_s30 = sadd.s32 1, %s1430_s30   ;;  %s1430_s30 = sphi %s1428_s30, %s837_s30   ;;  %s1426_s29 = sphi %s1424_s29, %s1425_s29   ;;  %s1422_s28 = sphi %s1420_s28, %s850_s28   ;;  %s1418_s27 = sphi %s1416_s27, %s851_s27  }
 0x14c   : >> { %844 = vst [vmem:[%s1418_s27] sm:$0xf] %v843_v51  ;;  %p846_p0 = scmp.ge.s32.totalorder %s845_s4, %s1747_s23  ;;  %p836_p1 = scmp.ge.s32.totalorder %s837_s30, %s1747_s23 }
 0x14e   : >> { %s1781_s4 = smov (%p846_p0, %s845_s4), 0  ;;  %839 = sbr.rel (!%p836_p1) target bundleno = 331 (0x14b), region = 129 }
 0x14f   : >> { %s1147_s5 = sshll.u32 %s1781_s4, 2  ;;  %s1425_s29 = smov %s1781_s4  }
 0x150   : >> { %s850_s28 = scalar_lea.vmem %s831_s25, %s1147_s5 [#allocation2]   ;;  %s851_s27 = scalar_lea.vmem %s833_s26, %s1147_s5  }
 0x155 PF: > { %p10_p2 = scmp.ge.s32.totalorder %s1467_s16, 4   ;;  %s1773_s12 = smov %s1394_s13 }
 0x156   : > { %s1774_s13 = smov %s1475_s19  ;;  %s1775_s14 = smov %s1467_s16 }
 0x157   :  { %12 = sbr.rel (!%p10_p2) target bundleno = 2 (0x2), region = 140 }

// kernel: vae_forward.7
= control target key start
LH: loop header
LB: loop body
LE: loop exit
PB: predicated region body
PF: predicated region fallthrough
CT: control target
= control target key end

     0   :  { %vm579_vm0 = vcmask 261120   ;;  %vm884_vm1 = vcmask 519168   ;;  %vm891_vm2 = vcmask 516096   ;;  %s1520_s1 = inlined_call_operand.vmem [shape: bf16[800,64], index: 1, kind: input, shape index: {}]   ;;  %s1521_s0 = inlined_call_operand.vmem [shape: bf16[50,800], index: 0, kind: input, shape index: {}]   ;;  %s1522_s2 = inlined_call_operand.vmem [shape: f32[1,64], index: 2, kind: input, shape index: {}]   ;;  %s1523_s3 = inlined_call_operand.vmem [shape: bf16[50,64], index: 3, kind: output, shape index: {}]  }
   0x1   :  { %v1148_v0 = vld [vmem:[%s1520_s1 + $0x40] sm:$0xff]   ;;  %v1152_v4 = vld [vmem:[%s1520_s1 + $0x48] sm:$0xff]   ;;  %v1156_v8 = vld [vmem:[%s1520_s1 + $0x50] sm:$0xff]  }
   0x2   :  { %v1149_v1 = vld [vmem:[%s1520_s1 + $0xc0] sm:$0xff]   ;;  %994 = vmatprep.subr.bf16.mxu0 %v1148_v0  ;;  %v1153_v5 = vld [vmem:[%s1520_s1 + $0xc8] sm:$0xff]   ;;  %v1157_v9 = vld [vmem:[%s1520_s1 + $0xd0] sm:$0xff]  }
   0x3   :  { %v1150_v2 = vld [vmem:[%s1520_s1] sm:$0xff]   ;;  %1034 = vmatprep.subr.bf16.mxu1 %v1149_v1  ;;  %v1154_v6 = vld [vmem:[%s1520_s1 + $0x8] sm:$0xff]   ;;  %v1158_v10 = vld [vmem:[%s1520_s1 + $0x10] sm:$0xff]  }
   0x4   :  { %v1151_v3 = vld [vmem:[%s1520_s1 + $0x80] sm:$0xff]   ;;  %995 = vmatpush3.bf16.msra.mxu0 %v1150_v2  ;;  %v1155_v7 = vld [vmem:[%s1520_s1 + $0x88] sm:$0xff]   ;;  %v1159_v11 = vld [vmem:[%s1520_s1 + $0x90] sm:$0xff]  }
   0x5   :  { %1035 = vmatpush3.bf16.msra.mxu1 %v1151_v3  ;;  %996 = vmatprep.subr.bf16.mxu0 %v1152_v4  ;;  %v1160_v12 = vld [vmem:[%s1520_s1 + $0x58] sm:$0xff]   ;;  %v1164_v16 = vld [vmem:[%s1520_s1 + $0x60] sm:$0xff]   ;;  %v1168_v20 = vld [vmem:[%s1520_s1 + $0x68] sm:$0xff]  }
   0x6   :  { %1036 = vmatprep.subr.bf16.mxu1 %v1153_v5  ;;  %v1161_v13 = vld [vmem:[%s1520_s1 + $0xd8] sm:$0xff]   ;;  %v1165_v17 = vld [vmem:[%s1520_s1 + $0xe0] sm:$0xff]   ;;  %v1169_v21 = vld [vmem:[%s1520_s1 + $0xe8] sm:$0xff]  }
   0x7   :  { %v1162_v14 = vld [vmem:[%s1520_s1 + $0x18] sm:$0xff]   ;;  %v1166_v18 = vld [vmem:[%s1520_s1 + $0x20] sm:$0xff]   ;;  %v1170_v22 = vld [vmem:[%s1520_s1 + $0x28] sm:$0xff]  }
   0x8   :  { %997 = vmatpush3.bf16.msra.mxu0 %v1154_v6  ;;  %v1163_v15 = vld [vmem:[%s1520_s1 + $0x98] sm:$0xff]   ;;  %v1167_v19 = vld [vmem:[%s1520_s1 + $0xa0] sm:$0xff]   ;;  %v1171_v23 = vld [vmem:[%s1520_s1 + $0xa8] sm:$0xff]  }
   0x9   :  { %1037 = vmatpush3.bf16.msra.mxu1 %v1155_v7  ;;  %998 = vmatprep.subr.bf16.mxu0 %v1156_v8  ;;  %v1172_v24 = vld [vmem:[%s1520_s1 + $0x70] sm:$0xff]   ;;  %v1176_v28 = vld [vmem:[%s1520_s1 + $0x78] sm:$0xff]   ;;  %v1182_v33 = vld [vmem:[%s1521_s0 + $0x4] ss:$28 sps:$4 sm:$0xff]  }
   0xa   :  { %1038 = vmatprep.subr.bf16.mxu1 %v1157_v9  ;;  %v1173_v25 = vld [vmem:[%s1520_s1 + $0xf0] sm:$0xff]   ;;  %v1177_v29 = vld [vmem:[%s1520_s1 + $0xf8] sm:$0xff]   ;;  %v1183_v34 = vld [vmem:[%s1521_s0 + $0x8] ss:$28 sps:$4 sm:$0xff]   ;;  %624 = vmatprep.mubr.bf16.mxu0 %v1182_v33 }
   0xb   :  { %v1174_v26 = vld [vmem:[%s1520_s1 + $0x30] sm:$0xff]   ;;  %v1178_v30 = vld [vmem:[%s1520_s1 + $0x38] sm:$0xff]   ;;  %v1185_v35 = vld [vmem:[%s1521_s0 + $0xc] ss:$28 sps:$4 sm:$0xff]  }
   0xc   :  { %999 = vmatpush3.bf16.msra.mxu0 %v1158_v10  ;;  %v1175_v27 = vld [vmem:[%s1520_s1 + $0xb0] sm:$0xff]   ;;  %v1179_v31 = vld [vmem:[%s1520_s1 + $0xb8] sm:$0xff]   ;;  %v1186_v36 = vld [vmem:[%s1520_s1 + $0x140] sm:$0xff]   ;;  %688 = vmatprep.mubr.bf16.mxu1 %v1185_v35 }
   0xd   :  { %1039 = vmatpush3.bf16.msra.mxu1 %v1159_v11  ;;  %1000 = vmatprep.subr.bf16.mxu0 %v1160_v12  ;;  %v1180_v32 = vld [vmem:[%s1521_s0] ss:$28 sps:$4 sm:$0xff]   ;;  %v1188_v38 = vld [vmem:[%s1520_s1 + $0x148] sm:$0xff]   ;;  %v1194_v42 = vld [vmem:[%s1521_s0 + $0x38] ss:$28 sps:$4 sm:$0xff]  }
   0xe   :  { %1040 = vmatprep.subr.bf16.mxu1 %v1161_v13  ;;  %v1187_v37 = vld [vmem:[%s1520_s1 + $0x100] sm:$0xff]   ;;  %v1189_v39 = vld [vmem:[%s1520_s1 + $0x108] sm:$0xff]   ;;  %v1190_v40 = vld [vmem:[%s1521_s0 + $0x3c] ss:$28 sps:$4 sm:$0xff]  }
   0xf   :  { %v1192_v41 = vld [vmem:[%s1521_s0 + $0x44] ss:$28 sps:$4 sm:$0xff]   ;;  %v1196_v44 = vld [vmem:[%s1520_s1 + $0x150] sm:$0xff]   ;;  %v1198_v46 = vld [vmem:[%s1520_s1 + $0x158] sm:$0xff]  }
  0x10   :  { %1001 = vmatpush3.bf16.msra.mxu0 %v1162_v14  ;;  %v1195_v43 = vld [vmem:[%s1521_s0 + $0x40] ss:$28 sps:$4 sm:$0xff]   ;;  %v1197_v45 = vld [vmem:[%s1520_s1 + $0x110] sm:$0xff]   ;;  %v1208_v54 = vld [vmem:[%s1520_s1 + $0x168] sm:$0xff]  }
  0x11   :  { %1041 = vmatpush3.bf16.msra.mxu1 %v1163_v15  ;;  %1002 = vmatprep.subr.bf16.mxu0 %v1164_v16  ;;  %v1199_v47 = vld [vmem:[%s1520_s1 + $0x118] sm:$0xff]   ;;  %v1200_v48 = vld [vmem:[%s1521_s0 + $0x74] ss:$28 sps:$4 sm:$0xff]   ;;  %v1206_v51 = vld [vmem:[%s1520_s1 + $0x160] sm:$0xff]  }
  0x12   :  { %1042 = vmatprep.subr.bf16.mxu1 %v1165_v17  ;;  %v1202_v49 = vld [vmem:[%s1521_s0 + $0x7c] ss:$28 sps:$4 sm:$0xff]   ;;  %v1204_v50 = vld [vmem:[%s1521_s0 + $0x70] ss:$28 sps:$4 sm:$0xff]   ;;  %v1207_v53 = vld [vmem:[%s1520_s1 + $0x120] sm:$0xff]  }
  0x13   :  { %v1205_v52 = vld [vmem:[%s1521_s0 + $0x78] ss:$28 sps:$4 sm:$0xff]   ;;  %v39_v55 = vld [vmem:[%s1521_s0 + $0xa8] sm:$0x11]  ;;  %v1223_v5 = vld [vmem:[%s1520_s1 + $0x180] sm:$0xff]  }
  0x14   :  { %1003 = vmatpush3.bf16.msra.mxu0 %v1166_v18  ;;  %v40_v56 = vld [vmem:[%s1521_s0 + $0xb0] sm:$0x11]  ;;  %v920_v57 = vcombine.high %v39_v55, %v39_v55  ;;  %v1209_v59 = vld [vmem:[%s1520_s1 + $0x128] sm:$0xff]   ;;  %v919_v61 = vcombine.low %v39_v55, %v39_v55  ;;  %v41_v1 = vld [vmem:[%s1521_s0 + $0xb8] sm:$0x11] }
  0x15   :  { %1043 = vmatpush3.bf16.msra.mxu1 %v1167_v19  ;;  %1004 = vmatprep.subr.bf16.mxu0 %v1168_v20  ;;  %v922_v58 = vcombine.high %v40_v56, %v40_v56  ;;  %v1214_v60 = vld [vmem:[%s1520_s1 + $0x170] sm:$0xff]   ;;  %v921_v62 = vcombine.low %v40_v56, %v40_v56  ;;  %v1216_v2 = vld [vmem:[%s1520_s1 + $0x178] sm:$0xff]   ;;  %v924_v3 = vcombine.high %v41_v1, %v41_v1  ;;  %v1225_v8 = vld [vmem:[%s1521_s0 + $0x4c] ss:$28 sps:$4 sm:$0xff]  }
  0x16   :  { %1044 = vmatprep.subr.bf16.mxu1 %v1169_v21  ;;  %v1215_v63 = vld [vmem:[%s1520_s1 + $0x130] sm:$0xff]   ;;  %v1217_v4 = vld [vmem:[%s1520_s1 + $0x138] sm:$0xff]   ;;  %v923_v7 = vcombine.low %v41_v1, %v41_v1  ;;  %v1224_v10 = vld [vmem:[%s1520_s1 + $0x188] sm:$0xff]  }
  0x17   :  { %v1220_v0 = vld [vmem:[%s1521_s0 + $0x14] ss:$28 sps:$4 sm:$0xff]   ;;  %v1228_v11 = vld [vmem:[%s1521_s0 + $0x48] ss:$28 sps:$4 sm:$0xff]   ;;  %v1233_v15 = vld [vmem:[%s1521_s0 + $0x80] ss:$28 sps:$4 sm:$0xff]  }
  0x18   :  { %1005 = vmatpush3.bf16.msra.mxu0 %v1170_v22  ;;  %v1218_v6 = vld [vmem:[%s1521_s0 + $0x10] ss:$28 sps:$4 sm:$0xff]   ;;  %v1227_v9 = vld [vmem:[%s1521_s0 + $0x18] ss:$28 sps:$4 sm:$0xff]   ;;  %v1230_v13 = vld [vmem:[%s1521_s0 + $0x84] ss:$28 sps:$4 sm:$0xff]  }
  0x19   :  { %1045 = vmatpush3.bf16.msra.mxu1 %v1171_v23  ;;  %1006 = vmatprep.subr.bf16.mxu0 %v1172_v24  ;;  %v1229_v12 = vld [vmem:[%s1521_s0 + $0x50] ss:$28 sps:$4 sm:$0xff]   ;;  %v1232_v14 = vld [vmem:[%s1521_s0 + $0x88] ss:$28 sps:$4 sm:$0xff]   ;;  %v897_v18 = vld [vmem:[%s1522_s2] ss:$0 sm:$0xff] }
  0x1a   :  { %1046 = vmatprep.subr.bf16.mxu1 %v1173_v25  ;;  %v1234_v16 = vld [vmem:[%s1521_s0 + $0xc0] ss:$0 sps:$4 sm:$0x11]  }
  0x1c   :  { %1007 = vmatpush3.bf16.msra.mxu0 %v1174_v26 }
  0x1d   :  { %1047 = vmatpush3.bf16.msra.mxu1 %v1175_v27  ;;  %1008 = vmatprep.subr.bf16.mxu0 %v1176_v28 }
  0x1e   :  { %1048 = vmatprep.subr.bf16.mxu1 %v1177_v29 }
  0x20   :  { %1009 = vmatpush3.bf16.msra.mxu0 %v1178_v30 }
  0x21   :  { %1049 = vmatpush3.bf16.msra.mxu1 %v1179_v31  ;;  %1074 = vmatprep.subr.bf16.mxu0 %v1186_v36 }
  0x22   :  { %1132 = vmatprep.subr.bf16.mxu1 %v1186_v36 }
  0x23   :  { %625 = vmatmul.mubr.bf16.vlgmr.msra.gmra.mrb[0].mxu0 %v1180_v32 }
  0x24   :  { %689 = vmatmul.mubr.bf16.vlgmr.msra.gmra.mrb[0].mxu1 %v1183_v34  ;;  %1075 = vmatpush3.bf16.msra.mxu0 %v1187_v37 }
  0x25   :  { %1140 = vmatpush3.bf16.msra.mxu1 %v1187_v37  ;;  %1076 = vmatprep.subr.bf16.mxu0 %v1188_v38 }
  0x26   :  { %1133 = vmatprep.subr.bf16.mxu1 %v1188_v38  ;;  %632 = vmatprep.mubr.bf16.mxu0 %v1190_v40 }
  0x27   :  { %696 = vmatprep.mubr.bf16.mxu1 %v1192_v41 }
  0x28   :  { %1077 = vmatpush3.bf16.msra.mxu0 %v1189_v39 }
  0x29   :  { %1141 = vmatpush3.bf16.msra.mxu1 %v1189_v39  ;;  %1078 = vmatprep.subr.bf16.mxu0 %v1196_v44 }
  0x2a   :  { %1134 = vmatprep.subr.bf16.mxu1 %v1196_v44 }
  0x2b   :  { %633 = vmatmul.mubr.bf16.gmra.mrb[4].mxu0 %v1194_v42 }
  0x2c   :  { %697 = vmatmul.mubr.bf16.gmra.mrb[4].mxu1 %v1195_v43  ;;  %1079 = vmatpush3.bf16.msra.mxu0 %v1197_v45 }
  0x2d   :  { %1142 = vmatpush3.bf16.msra.mxu1 %v1197_v45  ;;  %1080 = vmatprep.subr.bf16.mxu0 %v1198_v46 }
  0x2e   :  { %1135 = vmatprep.subr.bf16.mxu1 %v1198_v46  ;;  %640 = vmatprep.mubr.bf16.mxu0 %v1200_v48 }
  0x2f   :  { %704 = vmatprep.mubr.bf16.mxu1 %v1202_v49 }
  0x30   :  { %1081 = vmatpush3.bf16.msra.mxu0 %v1199_v47 }
  0x31   :  { %1143 = vmatpush3.bf16.msra.mxu1 %v1199_v47  ;;  %1082 = vmatprep.subr.bf16.mxu0 %v1206_v51 }
  0x32   :  { %1136 = vmatprep.subr.bf16.mxu1 %v1206_v51 }
  0x33   :  { %641 = vmatmul.mubr.bf16.gmra.mrb[8].mxu0 %v1204_v50 }
  0x34   :  { %705 = vmatmul.mubr.bf16.gmra.mrb[8].mxu1 %v1205_v52  ;;  %1083 = vmatpush3.bf16.msra.mxu0 %v1207_v53 }
  0x35   :  { %1144 = vmatpush3.bf16.msra.mxu1 %v1207_v53  ;;  %1084 = vmatprep.subr.bf16.mxu0 %v1208_v54 }
  0x36   :  { %1137 = vmatprep.subr.bf16.mxu1 %v1208_v54  ;;  %648 = vmatprep.mubr.bf16.mxu0 %v920_v57 }
  0x37   :  { %712 = vmatprep.mubr.bf16.mxu1 %v922_v58 }
  0x38   :  { %1085 = vmatpush3.bf16.msra.mxu0 %v1209_v59 }
  0x39   :  { %1145 = vmatpush3.bf16.msra.mxu1 %v1209_v59  ;;  %1086 = vmatprep.subr.bf16.mxu0 %v1214_v60 }
  0x3a   :  { %1138 = vmatprep.subr.bf16.mxu1 %v1214_v60 }
  0x3b   :  { %649 = vmatmul.mubr.bf16.gmra.mrb[12].mxu0 %v919_v61 }
  0x3c   :  { %713 = vmatmul.mubr.bf16.gmra.mrb[12].mxu1 %v921_v62  ;;  %752 = vmatprep.mubr.bf16.mxu0 %v1220_v0 }
  0x3d   :  { %1087 = vmatpush3.bf16.msra.mxu0 %v1215_v63  ;;  %776 = vmatprep.mubr.bf16.mxu1 %v924_v3 }
  0x3e   :  { %1146 = vmatpush3.bf16.msra.mxu1 %v1215_v63  ;;  %1088 = vmatprep.subr.bf16.mxu0 %v1216_v2 }
  0x3f   :  { %1139 = vmatprep.subr.bf16.mxu1 %v1216_v2 }
  0x41   :  { %1089 = vmatpush3.bf16.msra.mxu0 %v1217_v4 }
  0x42   :  { %1147 = vmatpush3.bf16.msra.mxu1 %v1217_v4 }
  0x43   :  { %1120 = vmatprep.subr.bf16.mxu1 %v1223_v5 }
  0x44   :  { %753 = vmatmul.mubr.bf16.vlgmr.msra.gmra.mrb[16].mxu0 %v1218_v6 }
  0x45   :  { %777 = vmatmul.mubr.bf16.vlgmr.msra.gmra.mrb[16].mxu1 %v923_v7  ;;  %760 = vmatprep.mubr.bf16.mxu0 %v1225_v8 }
  0x46   :  { %1121 = vmatpush3.bf16.msra.mxu1 %v1223_v5  ;;  %1124 = vmatprep.mubr.msk.bf16.mxu1 %vm579_vm0, %v1227_v9 }
  0x47   :  { %1122 = vmatprep.subr.bf16.mxu1 %v1224_v10 }
  0x4a   :  { %1123 = vmatpush3.bf16.msra.mxu1 %v1224_v10 }
  0x4c   :  { %761 = vmatmul.mubr.bf16.gmra.mrb[20].mxu0 %v1228_v11 }
  0x4d   :  { %1125 = vmatmul.mubr.msk.bf16.vlgmr.msra.gmra.mrb[20].mxu1 %vm579_vm0, %v1229_v12  ;;  %768 = vmatprep.mubr.bf16.mxu0 %v1230_v13 }
  0x4e   :  { %1128 = vmatprep.mubr.msk.bf16.mxu1 %vm579_vm0, %v1232_v14 }
  0x54   :  { %769 = vmatmul.mubr.bf16.gmra.mrb[24].mxu0 %v1233_v15 }
  0x55   :  { %1129 = vmatmul.mubr.msk.bf16.gmra.mrb[24].mxu1 %vm579_vm0, %v1234_v16 }
  0xf6   :  { %v1010_v17 = vpop.f32.mrb[0].mxu0 }
  0xf7   :  { %v1011_v19 = vpop.f32.mrb[1].mxu0  ;;  %v1050_v20 = vpop.f32.mrb[0].mxu1 }
  0xf8   :  { %v1012_v21 = vadd.f32 %v1011_v19, %v1010_v17  ;;  %v1013_v22 = vpop.f32.mrb[2].mxu0  ;;  %v1051_v23 = vpop.f32.mrb[1].mxu1 }
  0xf9   :  { %v1014_v24 = vpop.f32.mrb[3].mxu0  ;;  %v1052_v25 = vadd.f32 %v1051_v23, %v1050_v20  ;;  %v1053_v26 = vpop.f32.mrb[2].mxu1 }
  0xfa   :  { %v627_v27 = vadd.f32 %v1012_v21, %v897_v18  ;;  %v1015_v28 = vadd.f32 %v1014_v24, %v1013_v22  ;;  %v1054_v29 = vpop.f32.mrb[3].mxu1 }
  0xfb   :  { %v1055_v30 = vadd.f32 %v1054_v29, %v1053_v26 }
  0xfc   :  { %v630_v31 = vadd.f32 %v1015_v28, %v897_v18  ;;  %v691_v32 = vadd.f32 %v1052_v25, %v627_v27 }
  0xfe   :  { %v694_v33 = vadd.f32 %v1055_v30, %v630_v31  ;;  %v1016_v34 = vpop.f32.mrb[4].mxu0 }
  0xff   :  { %v1017_v35 = vpop.f32.mrb[5].mxu0  ;;  %v1056_v36 = vpop.f32.mrb[4].mxu1 }
 0x100   :  { %v1018_v37 = vadd.f32 %v1017_v35, %v1016_v34  ;;  %v1019_v38 = vpop.f32.mrb[6].mxu0  ;;  %v1057_v39 = vpop.f32.mrb[5].mxu1 }
 0x101   :  { %v1020_v40 = vpop.f32.mrb[7].mxu0  ;;  %v1058_v41 = vadd.f32 %v1057_v39, %v1056_v36  ;;  %v1059_v42 = vpop.f32.mrb[6].mxu1 }
 0x102   :  { %v635_v43 = vadd.f32 %v1018_v37, %v897_v18  ;;  %v1021_v44 = vadd.f32 %v1020_v40, %v1019_v38  ;;  %v1060_v45 = vpop.f32.mrb[7].mxu1 }
 0x103   :  { %v1061_v46 = vadd.f32 %v1060_v45, %v1059_v42 }
 0x104   :  { %v638_v47 = vadd.f32 %v1021_v44, %v897_v18  ;;  %v699_v48 = vadd.f32 %v1058_v41, %v635_v43 }
 0x106   :  { %v702_v49 = vadd.f32 %v1061_v46, %v638_v47  ;;  %v1022_v50 = vpop.f32.mrb[8].mxu0 }
 0x107   :  { %v1023_v51 = vpop.f32.mrb[9].mxu0  ;;  %v1062_v52 = vpop.f32.mrb[8].mxu1 }
 0x108   :  { %v1024_v53 = vadd.f32 %v1023_v51, %v1022_v50  ;;  %v1025_v54 = vpop.f32.mrb[10].mxu0  ;;  %v1063_v55 = vpop.f32.mrb[9].mxu1 }
 0x109   :  { %v1026_v56 = vpop.f32.mrb[11].mxu0  ;;  %v1064_v57 = vadd.f32 %v1063_v55, %v1062_v52  ;;  %v1065_v58 = vpop.f32.mrb[10].mxu1 }
 0x10a   :  { %v643_v59 = vadd.f32 %v1024_v53, %v897_v18  ;;  %v1027_v60 = vadd.f32 %v1026_v56, %v1025_v54  ;;  %v1066_v61 = vpop.f32.mrb[11].mxu1 }
 0x10b   :  { %v1067_v62 = vadd.f32 %v1066_v61, %v1065_v58 }
 0x10c   :  { %v646_v63 = vadd.f32 %v1027_v60, %v897_v18  ;;  %v1487_v0 = vadd.f32 %v1064_v57, %v643_v59 }
 0x10e   :  { %v1489_v1 = vadd.f32 %v1067_v62, %v646_v63  ;;  %v1028_v2 = vpop.f32.mrb[12].mxu0 }
 0x10f   :  { %v1029_v3 = vpop.f32.mrb[13].mxu0  ;;  %v1068_v4 = vpop.f32.mrb[12].mxu1 }
 0x110   :  { %v1030_v5 = vadd.f32 %v1029_v3, %v1028_v2  ;;  %v1031_v6 = vpop.f32.mrb[14].mxu0  ;;  %v1069_v7 = vpop.f32.mrb[13].mxu1 }
 0x111   :  { %v1032_v8 = vpop.f32.mrb[15].mxu0  ;;  %v1070_v9 = vadd.f32 %v1069_v7, %v1068_v4  ;;  %v1071_v10 = vpop.f32.mrb[14].mxu1 }
 0x112   :  { %v651_v11 = vadd.f32 %v1030_v5, %v897_v18  ;;  %v1072_v12 = vpop.f32.mrb[15].mxu1 }
 0x114   :  { %v715_v13 = vadd.f32 %v1070_v9, %v651_v11 }
 0x117   :  { %v1090_v14 = vpop.f32.mrb[16].mxu0 }
 0x118   :  { %v1108_v15 = vpop.f32.mrb[16].mxu1  ;;  %v1091_v16 = vpop.f32.mrb[17].mxu0 }
 0x119   :  { %v1092_v17 = vadd.f32 %v1091_v16, %v1090_v14  ;;  %v1109_v19 = vpop.f32.mrb[17].mxu1  ;;  %v1093_v20 = vpop.f32.mrb[18].mxu0 }
 0x11a   :  { %v1110_v21 = vadd.f32 %v1109_v19, %v1108_v15  ;;  %v1094_v22 = vpop.f32.mrb[19].mxu0  ;;  %v1111_v23 = vpop.f32.mrb[18].mxu1 }
 0x11b   :  { %v1095_v24 = vadd.f32 %v1094_v22, %v1093_v20  ;;  %v1112_v25 = vpop.f32.mrb[19].mxu1  ;;  %v755_v26 = vadd.f32 %v1092_v17, %v691_v32 }
 0x11c   :  { %v779_v27 = vadd.f32 %v1110_v21, %v715_v13 }
 0x11d   :  { %v758_v28 = vadd.f32 %v1095_v24, %v694_v33 }
 0x11f   :  { %v1096_v29 = vpop.f32.mrb[20].mxu0 }
 0x120   :  { %v1126_v30 = vpop.f32.mrb[20].mxu1  ;;  %v1097_v31 = vpop.f32.mrb[21].mxu0 }
 0x121   :  { %v1098_v18 = vadd.f32 %v1097_v31, %v1096_v29  ;;  %v818_v34 = vpop.f32.mrb[21].mxu1  ;;  %v1099_v35 = vpop.f32.mrb[22].mxu0 }
 0x122   :  { %v819_v36 = vadd.f32 %v818_v34, %v755_v26  ;;  %v1127_v37 = vpop.f32.mrb[22].mxu1  ;;  %v1100_v38 = vpop.f32.mrb[23].mxu0 }
 0x123   :  { %v763_v39 = vadd.f32 %v1098_v18, %v699_v48  ;;  %v1101_v40 = vadd.f32 %v1100_v38, %v1099_v35  ;;  %v821_v41 = vpop.f32.mrb[23].mxu1 }
 0x124   :  { %v848_v42 = vmax.f32 %v819_v36, 0.0  ;;  %v822_v43 = vadd.f32 %v821_v41, %v758_v28 }
 0x125   :  { %v827_v44 = vadd.f32 %v1126_v30, %v763_v39  ;;  %v766_v45 = vadd.f32 %v1101_v40, %v702_v49 }
 0x126   :  { %v987_v32 = vpack.c.bf16 %v848_v42, %v848_v42  ;;  %v849_v46 = vmax.f32 %v822_v43, 0.0 }
 0x127   :  { %v850_v33 = vmax.f32 %v827_v44, 0.0  ;;  %v830_v47 = vadd.f32 %v1127_v37, %v766_v45  ;;  %v1102_v50 = vpop.f32.mrb[24].mxu0 }
 0x128   :  { %885 = vst.msk [vmem:[%s1523_s3] sm:$0xf] %vm884_vm1, %v987_v32  ;;  %v988_v51 = vpack.c.bf16 %v849_v46, %v849_v46  ;;  %v1130_v52 = vpop.f32.mrb[24].mxu1  ;;  %v1103_v48 = vpop.f32.mrb[25].mxu0 }
 0x129   :  { %v989_v53 = vpack.c.bf16 %v850_v33, %v850_v33  ;;  %v851_v54 = vmax.f32 %v830_v47, 0.0  ;;  %v843_v55 = vadd.f32 %v1130_v52, %v779_v27  ;;  %v1104_v56 = vadd.f32 %v1103_v48, %v1102_v50  ;;  %v1105_v57 = vpop.f32.mrb[26].mxu0  ;;  %v834_v58 = vpop.f32.mrb[25].mxu1 }
 0x12a   :  { %886 = vst.msk [vmem:[%s1523_s3 + $0x4] sm:$0xf] %vm884_vm1, %v988_v51  ;;  %v1106_v49 = vpop.f32.mrb[27].mxu0  ;;  %v1131_v59 = vpop.f32.mrb[26].mxu1 }
 0x12b   :  { %887 = vst.msk [vmem:[%s1523_s3 + $0x8] sm:$0xf] %vm884_vm1, %v989_v53  ;;  %v990_v60 = vpack.c.bf16 %v851_v54, %v851_v54  ;;  %v854_v61 = vmax.f32 %v843_v55, 0.0  ;;  %v1107_v62 = vadd.f32 %v1106_v49, %v1105_v57  ;;  %v771_v63 = vadd.f32 %v1104_v56, %v1487_v0  ;;  %v837_v2 = vpop.f32.mrb[27].mxu1 }
 0x12d   :  { %888 = vst.msk [vmem:[%s1523_s3 + $0xc] sm:$0xf] %vm884_vm1, %v990_v60  ;;  %v993_v3 = vpack.c.bf16 %v854_v61, %v854_v61  ;;  %v835_v4 = vadd.f32 %v834_v58, %v771_v63  ;;  %v774_v5 = vadd.f32 %v1107_v62, %v1489_v1 }
 0x12f   :  { %892 = vst.msk [vmem:[%s1523_s3 + $0x18] sm:$0x1] %vm891_vm2, %v993_v3  ;;  %v852_v6 = vmax.f32 %v835_v4, 0.0  ;;  %v838_v7 = vadd.f32 %v837_v2, %v774_v5 }
 0x131   :  { %v991_v8 = vpack.c.bf16 %v852_v6, %v852_v6  ;;  %v853_v9 = vmax.f32 %v838_v7, 0.0 }
 0x133   :  { %889 = vst.msk [vmem:[%s1523_s3 + $0x10] sm:$0xf] %vm884_vm1, %v991_v8  ;;  %v992_v0 = vpack.c.bf16 %v853_v9, %v853_v9 }
 0x135   :  { %890 = vst.msk [vmem:[%s1523_s3 + $0x14] sm:$0xf] %vm884_vm1, %v992_v0 }

// kernel: vae_forward.9
= control target key start
LH: loop header
LB: loop body
LE: loop exit
PB: predicated region body
PF: predicated region fallthrough
CT: control target
= control target key end

     0   :  { %v675_v1 = vmov 0   ;;  %vm213_vm0 = vcmask 523264   ;;  %vm509_vm1 = vcmask 261120   ;;  %vm552_vm2 = vcmask 254976   ;;  %s968_s1 = inlined_call_operand.vmem [shape: bf16[64,800], index: 1, kind: input, shape index: {}]   ;;  %s969_s0 = inlined_call_operand.vmem [shape: bf16[50,64], index: 0, kind: input, shape index: {}]   ;;  %s970_s2 = inlined_call_operand.vmem [shape: f32[50,800], index: 2, kind: output, shape index: {}]  }
   0x1   :  { %v631_v0 = vld [vmem:[%s968_s1 + $0x4] ss:$28 sps:$4 sm:$0xff]   ;;  %258 = vmatprep.mubr.bf16.mxu0 %v675_v1  ;;  %329 = vmatprep.mubr.bf16.mxu1 %v675_v1  ;;  %v634_v3 = vld [vmem:[%s968_s1 + $0x3c] ss:$28 sps:$4 sm:$0xff]   ;;  %v637_v5 = vld [vmem:[%s968_s1 + $0x74] ss:$28 sps:$4 sm:$0xff]  }
   0x2   :  { %v633_v2 = vld [vmem:[%s968_s1] ss:$28 sps:$4 sm:$0xff]   ;;  %226 = vmatprep.subr.bf16.mxu0 %v631_v0  ;;  %v636_v4 = vld [vmem:[%s968_s1 + $0x38] ss:$28 sps:$4 sm:$0xff]   ;;  %v643_v6 = vld [vmem:[%s968_s1 + $0xc] ss:$28 sps:$4 sm:$0xff]  }
   0x3   :  { %227 = vmatpush1.bf16.msra.mxu0 %v633_v2  ;;  %v645_v7 = vld [vmem:[%s968_s1 + $0x8] ss:$28 sps:$4 sm:$0xff]   ;;  %v639_v8 = vld [vmem:[%s968_s1 + $0x70] ss:$28 sps:$4 sm:$0xff]   ;;  %297 = vmatprep.subr.bf16.mxu1 %v643_v6  ;;  %v652_v11 = vld [vmem:[%s968_s1 + $0x40] ss:$28 sps:$4 sm:$0xff]  }
   0x4   :  { %228 = vmatprep.subr.bf16.mxu0 %v634_v3  ;;  %v640_v9 = vld [vmem:[%s968_s1 + $0xac] ss:$28 sps:$4 sm:$0xff]   ;;  %298 = vmatpush1.bf16.msra.mxu1 %v645_v7  ;;  %v650_v10 = vld [vmem:[%s968_s1 + $0x44] ss:$28 sps:$4 sm:$0xff]   ;;  %v653_v13 = vld [vmem:[%s968_s1 + $0x7c] ss:$28 sps:$4 sm:$0xff]  }
   0x5   :  { %v642_v12 = vld [vmem:[%s968_s1 + $0xa8] ss:$28 sps:$4 sm:$0xff]   ;;  %299 = vmatprep.subr.bf16.mxu1 %v650_v10  ;;  %v649_v14 = vld [vmem:[%s968_s1 + $0x14] ss:$28 sps:$4 sm:$0xff]   ;;  %v665_v26 = vld [vmem:[%s968_s1 + $0x80] ss:$28 sps:$4 sm:$0xff]  }
   0x6   :  { %v646_v15 = vld [vmem:[%s969_s0] sm:$0xff]   ;;  %v655_v16 = vld [vmem:[%s968_s1 + $0x78] ss:$28 sps:$4 sm:$0xff]   ;;  %v647_v18 = vld [vmem:[%s968_s1 + $0x10] ss:$28 sps:$4 sm:$0xff]  }
   0x7   :  { %229 = vmatpush1.bf16.msra.mxu0 %v636_v4  ;;  %v660_v17 = vld [vmem:[%s968_s1 + $0xb4] ss:$28 sps:$4 sm:$0xff]   ;;  %v659_v19 = vld [vmem:[%s968_s1 + $0x4c] ss:$28 sps:$4 sm:$0xff]   ;;  %v667_v23 = vld [vmem:[%s968_s1 + $0x84] ss:$28 sps:$4 sm:$0xff]  }
   0x8   :  { %230 = vmatprep.subr.bf16.mxu0 %v637_v5  ;;  %300 = vmatpush1.bf16.msra.mxu1 %v652_v11  ;;  %v662_v20 = vld [vmem:[%s968_s1 + $0xb0] ss:$28 sps:$4 sm:$0xff]   ;;  %v663_v21 = vld [vmem:[%s968_s1 + $0x18] ss:$28 sps:$4 sm:$0xff]   ;;  %v657_v22 = vld [vmem:[%s968_s1 + $0x48] ss:$28 sps:$4 sm:$0xff]  }
   0x9   :  { %301 = vmatprep.subr.bf16.mxu1 %v653_v13  ;;  %v656_v24 = vld [vmem:[%s969_s0 + $0x8] sm:$0xff]   ;;  %v672_v27 = vld [vmem:[%s968_s1 + $0xbc] ss:$28 sps:$4 sm:$0xff]   ;;  %v664_v30 = vld [vmem:[%s969_s0 + $0x10] sm:$0xff]  }
   0xa   :  { %v668_v25 = vld [vmem:[%s968_s1 + $0x50] ss:$28 sps:$4 sm:$0xff]   ;;  %v673_v28 = vld [vmem:[%s968_s1 + $0x88] ss:$28 sps:$4 sm:$0xff]   ;;  %v670_v29 = vld [vmem:[%s968_s1 + $0xb8] ss:$28 sps:$4 sm:$0xff]  }
   0xb   :  { %231 = vmatpush1.bf16.msra.mxu0 %v639_v8  ;;  %v674_v31 = vld [vmem:[%s968_s1 + $0xc0] ss:$28 sps:$4 sm:$0xff]   ;;  %v669_v32 = vld [vmem:[%s969_s0 + $0x18] ss:$0 sps:$4 sm:$0x11]  }
   0xc   :  { %232 = vmatprep.subr.bf16.mxu0 %v640_v9  ;;  %302 = vmatpush1.bf16.msra.mxu1 %v655_v16 }
   0xd   :  { %303 = vmatprep.subr.bf16.mxu1 %v660_v17 }
   0xf   :  { %233 = vmatpush1.bf16.msra.mxu0 %v642_v12 }
  0x10   :  { %368 = vmatprep.subr.bf16.mxu0 %v649_v14  ;;  %304 = vmatpush1.bf16.msra.mxu1 %v662_v20 }
  0x11   :  { %614 = vmatprep.subr.bf16.mxu1 %v663_v21 }
  0x12   :  { %590 = vmatmul.mubr.msk.bf16.vlgmr.msra.gmra.mrb[0].mxu0 %vm213_vm0, %v646_v15 }
  0x13   :  { %369 = vmatpush1.bf16.msra.mxu0 %v647_v18  ;;  %268 = vmatprep.mubr.bf16.mxu0 %v675_v1 }
  0x14   :  { %370 = vmatprep.subr.bf16.mxu0 %v659_v19  ;;  %594 = vmatmul.mubr.msk.bf16.vlgmr.msra.gmra.mrb[0].mxu1 %vm213_vm0, %v646_v15 }
  0x15   :  { %615 = vmatpush3.bf16.msra.mxu1 %v663_v21  ;;  %339 = vmatprep.mubr.bf16.mxu1 %v675_v1 }
  0x16   :  { %616 = vmatprep.subr.bf16.mxu1 %v668_v25 }
  0x17   :  { %371 = vmatpush1.bf16.msra.mxu0 %v657_v22 }
  0x18   :  { %372 = vmatprep.subr.bf16.mxu0 %v667_v23 }
  0x19   :  { %617 = vmatpush3.bf16.msra.mxu1 %v668_v25 }
  0x1a   :  { %591 = vmatmul.mubr.msk.bf16.gmra.mrb[4].mxu0 %vm213_vm0, %v656_v24  ;;  %618 = vmatprep.subr.bf16.mxu1 %v673_v28 }
  0x1b   :  { %278 = vmatprep.mubr.bf16.mxu0 %v675_v1  ;;  %373 = vmatpush1.bf16.msra.mxu0 %v665_v26 }
  0x1c   :  { %374 = vmatprep.subr.bf16.mxu0 %v672_v27  ;;  %595 = vmatmul.mubr.msk.bf16.gmra.mrb[4].mxu1 %vm213_vm0, %v656_v24 }
  0x1d   :  { %349 = vmatprep.mubr.bf16.mxu1 %v675_v1  ;;  %619 = vmatpush3.bf16.msra.mxu1 %v673_v28 }
  0x1e   :  { %620 = vmatprep.subr.bf16.mxu1 %v674_v31 }
  0x1f   :  { %375 = vmatpush1.bf16.msra.mxu0 %v670_v29 }
  0x21   :  { %621 = vmatpush3.bf16.msra.mxu1 %v674_v31 }
  0x22   :  { %592 = vmatmul.mubr.msk.bf16.gmra.mrb[8].mxu0 %vm213_vm0, %v664_v30 }
  0x23   :  { %288 = vmatprep.mubr.bf16.mxu0 %v675_v1 }
  0x24   :  { %596 = vmatmul.mubr.msk.bf16.gmra.mrb[8].mxu1 %vm213_vm0, %v664_v30 }
  0x25   :  { %359 = vmatprep.mubr.bf16.mxu1 %v675_v1 }
  0x2a   :  { %593 = vmatmul.mubr.msk.bf16.gmra.mrb[12].mxu0 %vm213_vm0, %v669_v32 }
  0x2b   :  { %400 = vmatprep.mubr.bf16.mxu0 %v675_v1 }
  0x2c   :  { %597 = vmatmul.mubr.msk.bf16.gmra.mrb[12].mxu1 %vm213_vm0, %v669_v32 }
  0x2d   :  { %622 = vmatprep.mubr.msk.bf16.mxu1 %vm213_vm0, %v646_v15 }
  0x32   :  { %598 = vmatmul.mubr.msk.bf16.vlgmr.msra.gmra.mrb[16].mxu0 %vm213_vm0, %v646_v15 }
  0x33   :  { %410 = vmatprep.mubr.bf16.mxu0 %v675_v1 }
  0x34   :  { %623 = vmatmul.mubr.msk.bf16.vlgmr.msra.gmra.mrb[16].mxu1 %vm213_vm0, %v656_v24 }
  0x35   :  { %626 = vmatprep.mubr.msk.bf16.mxu1 %vm213_vm0, %v664_v30 }
  0x3a   :  { %599 = vmatmul.mubr.msk.bf16.gmra.mrb[20].mxu0 %vm213_vm0, %v656_v24 }
  0x3b   :  { %420 = vmatprep.mubr.bf16.mxu0 %v675_v1 }
  0x3c   :  { %627 = vmatmul.mubr.msk.bf16.gmra.mrb[20].mxu1 %vm213_vm0, %v669_v32 }
  0x42   :  { %600 = vmatmul.mubr.msk.bf16.gmra.mrb[24].mxu0 %vm213_vm0, %v664_v30 }
  0x43   :  { %430 = vmatprep.mubr.bf16.mxu0 %v675_v1 }
  0x4a   :  { %601 = vmatmul.mubr.msk.bf16.gmra.mrb[28].mxu0 %vm213_vm0, %v669_v32 }
  0xe5   :  { %v260_v33 = vpop.f32.mrb[0].mxu0 }
  0xe6   :  { %503 = vst [vmem:[%s970_s2] sm:$0xff] %v260_v33  ;;  %v262_v34 = vpop.f32.mrb[1].mxu0 }
  0xe7   :  { %504 = vst [vmem:[%s970_s2 + $0x8] sm:$0xff] %v262_v34  ;;  %v264_v35 = vpop.f32.mrb[2].mxu0  ;;  %v331_v37 = vpop.f32.mrb[0].mxu1 }
  0xe8   :  { %511 = vst [vmem:[%s970_s2 + $0x38] sm:$0xff] %v264_v35  ;;  %v266_v36 = vpop.f32.mrb[3].mxu0  ;;  %505 = vst [vmem:[%s970_s2 + $0x10] sm:$0xff] %v331_v37  ;;  %v333_v38 = vpop.f32.mrb[1].mxu1 }
  0xe9   :  { %512 = vst [vmem:[%s970_s2 + $0x40] sm:$0xff] %v266_v36  ;;  %506 = vst [vmem:[%s970_s2 + $0x18] sm:$0xff] %v333_v38  ;;  %v335_v40 = vpop.f32.mrb[2].mxu1 }
  0xea   :  { %513 = vst [vmem:[%s970_s2 + $0x48] sm:$0xff] %v335_v40  ;;  %v337_v42 = vpop.f32.mrb[3].mxu1 }
  0xeb   :  { %514 = vst [vmem:[%s970_s2 + $0x50] sm:$0xff] %v337_v42 }
  0xed   :  { %v270_v39 = vpop.f32.mrb[4].mxu0 }
  0xee   :  { %518 = vst [vmem:[%s970_s2 + $0x70] sm:$0xff] %v270_v39  ;;  %v272_v41 = vpop.f32.mrb[5].mxu0 }
  0xef   :  { %519 = vst [vmem:[%s970_s2 + $0x78] sm:$0xff] %v272_v41  ;;  %v274_v43 = vpop.f32.mrb[6].mxu0  ;;  %v341_v45 = vpop.f32.mrb[4].mxu1 }
  0xf0   :  { %525 = vst [vmem:[%s970_s2 + $0xa8] sm:$0xff] %v274_v43  ;;  %v276_v44 = vpop.f32.mrb[7].mxu0  ;;  %520 = vst [vmem:[%s970_s2 + $0x80] sm:$0xff] %v341_v45  ;;  %v343_v46 = vpop.f32.mrb[5].mxu1 }
  0xf1   :  { %526 = vst [vmem:[%s970_s2 + $0xb0] sm:$0xff] %v276_v44  ;;  %521 = vst [vmem:[%s970_s2 + $0x88] sm:$0xff] %v343_v46  ;;  %v345_v48 = vpop.f32.mrb[6].mxu1 }
  0xf2   :  { %527 = vst [vmem:[%s970_s2 + $0xb8] sm:$0xff] %v345_v48  ;;  %v347_v50 = vpop.f32.mrb[7].mxu1 }
  0xf3   :  { %528 = vst [vmem:[%s970_s2 + $0xc0] sm:$0xff] %v347_v50 }
  0xf5   :  { %v280_v47 = vpop.f32.mrb[8].mxu0 }
  0xf6   :  { %532 = vst [vmem:[%s970_s2 + $0xe0] sm:$0xff] %v280_v47  ;;  %v282_v49 = vpop.f32.mrb[9].mxu0 }
  0xf7   :  { %533 = vst [vmem:[%s970_s2 + $0xe8] sm:$0xff] %v282_v49  ;;  %v284_v51 = vpop.f32.mrb[10].mxu0  ;;  %v351_v53 = vpop.f32.mrb[8].mxu1 }
  0xf8   :  { %539 = vst [vmem:[%s970_s2 + $0x118] sm:$0xff] %v284_v51  ;;  %v286_v52 = vpop.f32.mrb[11].mxu0  ;;  %534 = vst [vmem:[%s970_s2 + $0xf0] sm:$0xff] %v351_v53  ;;  %v353_v54 = vpop.f32.mrb[9].mxu1 }
  0xf9   :  { %540 = vst [vmem:[%s970_s2 + $0x120] sm:$0xff] %v286_v52  ;;  %535 = vst [vmem:[%s970_s2 + $0xf8] sm:$0xff] %v353_v54  ;;  %v355_v56 = vpop.f32.mrb[10].mxu1 }
  0xfa   :  { %541 = vst [vmem:[%s970_s2 + $0x128] sm:$0xff] %v355_v56  ;;  %v357_v58 = vpop.f32.mrb[11].mxu1 }
  0xfb   :  { %542 = vst [vmem:[%s970_s2 + $0x130] sm:$0xff] %v357_v58 }
  0xfd   :  { %v290_v55 = vpop.f32.mrb[12].mxu0 }
  0xfe   :  { %546 = vst [vmem:[%s970_s2 + $0x150] sm:$0x3] %v290_v55  ;;  %v292_v57 = vpop.f32.mrb[13].mxu0 }
  0xff   :  { %547 = vst [vmem:[%s970_s2 + $0x158] sm:$0x3] %v292_v57  ;;  %v294_v59 = vpop.f32.mrb[14].mxu0  ;;  %v361_v61 = vpop.f32.mrb[12].mxu1 }
 0x100   :  { %v295_v60 = vpop.f32.mrb[15].mxu0  ;;  %548 = vst [vmem:[%s970_s2 + $0x160] sm:$0x3] %v361_v61  ;;  %v363_v62 = vpop.f32.mrb[13].mxu1 }
 0x101   :  { %549 = vst [vmem:[%s970_s2 + $0x168] sm:$0x3] %v363_v62  ;;  %v365_v0 = vpop.f32.mrb[14].mxu1 }
 0x102   :  { %v366_v2 = vpop.f32.mrb[15].mxu1 }
 0x105   :  { %v402_v63 = vpop.f32.mrb[16].mxu0 }
 0x106   :  { %507 = vst [vmem:[%s970_s2 + $0x20] sm:$0xff] %v402_v63  ;;  %v404_v1 = vpop.f32.mrb[17].mxu0 }
 0x107   :  { %508 = vst [vmem:[%s970_s2 + $0x28] sm:$0xff] %v404_v1  ;;  %v406_v3 = vpop.f32.mrb[18].mxu0  ;;  %v624_v5 = vpop.f32.mrb[16].mxu1 }
 0x108   :  { %515 = vst [vmem:[%s970_s2 + $0x58] sm:$0xff] %v406_v3  ;;  %v408_v4 = vpop.f32.mrb[19].mxu0  ;;  %524 = vst.msk [vmem:[%s970_s2 + $0xa0] sm:$0xff] %vm509_vm1, %v624_v5  ;;  %v473_v6 = vpop.f32.mrb[17].mxu1 }
 0x109   :  { %516 = vst [vmem:[%s970_s2 + $0x60] sm:$0xff] %v408_v4  ;;  %510 = vst.msk [vmem:[%s970_s2 + $0x30] sm:$0xff] %vm509_vm1, %v473_v6  ;;  %v625_v8 = vpop.f32.mrb[18].mxu1 }
 0x10a   :  { %531 = vst.msk [vmem:[%s970_s2 + $0xd8] sm:$0xff] %vm509_vm1, %v625_v8  ;;  %v476_v10 = vpop.f32.mrb[19].mxu1 }
 0x10b   :  { %517 = vst.msk [vmem:[%s970_s2 + $0x68] sm:$0xff] %vm509_vm1, %v476_v10 }
 0x10d   :  { %v412_v7 = vpop.f32.mrb[20].mxu0 }
 0x10e   :  { %522 = vst [vmem:[%s970_s2 + $0x90] sm:$0xff] %v412_v7  ;;  %v414_v9 = vpop.f32.mrb[21].mxu0 }
 0x10f   :  { %523 = vst [vmem:[%s970_s2 + $0x98] sm:$0xff] %v414_v9  ;;  %v416_v11 = vpop.f32.mrb[22].mxu0  ;;  %v628_v13 = vpop.f32.mrb[20].mxu1 }
 0x110   :  { %529 = vst [vmem:[%s970_s2 + $0xc8] sm:$0xff] %v416_v11  ;;  %v418_v12 = vpop.f32.mrb[23].mxu0  ;;  %553 = vst.msk [vmem:[%s970_s2 + $0x180] sm:$0x3] %vm552_vm2, %v628_v13  ;;  %v489_v14 = vpop.f32.mrb[21].mxu1 }
 0x111   :  { %530 = vst [vmem:[%s970_s2 + $0xd0] sm:$0xff] %v418_v12  ;;  %538 = vst.msk [vmem:[%s970_s2 + $0x110] sm:$0xff] %vm509_vm1, %v489_v14  ;;  %v629_v16 = vpop.f32.mrb[22].mxu1 }
 0x112   :  { %v492_v18 = vpop.f32.mrb[23].mxu1 }
 0x113   :  { %545 = vst.msk [vmem:[%s970_s2 + $0x148] sm:$0xff] %vm509_vm1, %v492_v18 }
 0x115   :  { %v422_v15 = vpop.f32.mrb[24].mxu0 }
 0x116   :  { %536 = vst [vmem:[%s970_s2 + $0x100] sm:$0xff] %v422_v15  ;;  %v424_v17 = vpop.f32.mrb[25].mxu0 }
 0x117   :  { %537 = vst [vmem:[%s970_s2 + $0x108] sm:$0xff] %v424_v17  ;;  %v426_v19 = vpop.f32.mrb[26].mxu0 }
 0x118   :  { %543 = vst [vmem:[%s970_s2 + $0x138] sm:$0xff] %v426_v19  ;;  %v428_v20 = vpop.f32.mrb[27].mxu0 }
 0x119   :  { %544 = vst [vmem:[%s970_s2 + $0x140] sm:$0xff] %v428_v20 }
 0x11d   :  { %v432_v21 = vpop.f32.mrb[28].mxu0 }
 0x11e   :  { %550 = vst [vmem:[%s970_s2 + $0x170] sm:$0x3] %v432_v21  ;;  %v434_v22 = vpop.f32.mrb[29].mxu0 }
 0x11f   :  { %551 = vst [vmem:[%s970_s2 + $0x178] sm:$0x3] %v434_v22  ;;  %v436_v23 = vpop.f32.mrb[30].mxu0 }
 0x120   :  { %v437_v24 = vpop.f32.mrb[31].mxu0 }

// kernel: vae_forward.8
= control target key start
LH: loop header
LB: loop body
LE: loop exit
PB: predicated region body
PF: predicated region fallthrough
CT: control target
= control target key end

     0   :  { %v2407_v21 = vmov 1966171168   ;;  %v247_v23 = vlaneseq  ;;  %vm2409_vm0 = vmmov 0   ;;  %vm943_vm1 = vcmask 523264   ;;  %s2410_s15 = smov 8   ;;  %s2950_s1 = inlined_call_operand.vmem [shape: bf16[1600,128], index: 1, kind: input, shape index: {}]   ;;  %s2951_s0 = inlined_call_operand.vmem [shape: bf16[2,1600], index: 0, kind: input, shape index: {}]   ;;  %s2952_s3 = inlined_call_operand.vmem [shape: bf16[128,16], index: 3, kind: input, shape index: {}]   ;;  %s2953_s5 = inlined_call_operand.vmem [shape: f32[2,8], index: 5, kind: input, shape index: {}]   ;;  %s2954_s2 = inlined_call_operand.vmem [shape: f32[1,128], index: 2, kind: input, shape index: {}]   ;;  %s2955_s6 = inlined_call_operand.vmem [shape: bf16[8,1600], index: 6, kind: input, shape index: {}]   ;;  %s2956_s4 = inlined_call_operand.vmem [shape: f32[1,16], index: 4, kind: input, shape index: {}]   ;;  %s2957_s8 = inlined_call_operand.vmem [shape: f32[2,16], index: 8, kind: output, shape index: {0}]   ;;  %s2958_s7 = inlined_call_operand.vmem [shape: f32[1,1600], index: 7, kind: input, shape index: {}]   ;;  %s2959_s9 = inlined_call_operand.vmem [shape: bf16[2,1600], index: 9, kind: output, shape index: {1}]  }
   0x1   :  { %v2282_v0 = vld [vmem:[%s2950_s1 + $0x40] sm:$0xff]   ;;  %v2286_v4 = vld [vmem:[%s2950_s1 + $0x48] sm:$0xff]   ;;  %v2290_v8 = vld [vmem:[%s2950_s1 + $0x50] sm:$0xff]   ;;  %v245_v22 = vunpack.c.l.s4 %v2407_v21  ;;  %vm1473_vm2 = vcmask 1043456   ;;  %vm1340_vm3 = vcmask 123904   ;;  %vm1469_vm4 = vcmask 64512  }
   0x2   :  { %v2283_v1 = vld [vmem:[%s2950_s1] sm:$0xff]   ;;  %2090 = vmatprep.subr.bf16.mxu0 %v2282_v0  ;;  %v2287_v5 = vld [vmem:[%s2950_s1 + $0x8] sm:$0xff]   ;;  %v2291_v9 = vld [vmem:[%s2950_s1 + $0x10] sm:$0xff]   ;;  %v2538_v29 = vshrl.u32 %v247_v23, 7  ;;  %vm1929_vm5 = vcmask 1040384   ;;  %vm1930_vm6 = vcmask 1041409  }
   0x3   :  { %v2284_v2 = vld [vmem:[%s2950_s1 + $0xc0] sm:$0xff]   ;;  %2091 = vmatpush3.bf16.msra.mxu0 %v2283_v1  ;;  %v2288_v6 = vld [vmem:[%s2950_s1 + $0xc8] sm:$0xff]   ;;  %v2292_v10 = vld [vmem:[%s2950_s1 + $0xd0] sm:$0xff]   ;;  %v246_v28 = vunpack.c.0.s8 %v245_v22  ;;  %vm1932_vm8 = vcmask 1042434   ;;  %vm1934_vm10 = vcmask 1043459   ;;  %vm1936_vm12 = vcmask 520196  }
   0x4   :  { %v2285_v3 = vld [vmem:[%s2950_s1 + $0x80] sm:$0xff]   ;;  %2112 = vmatprep.subr.bf16.mxu1 %v2284_v2  ;;  %2092 = vmatprep.subr.bf16.mxu0 %v2286_v4  ;;  %v2289_v7 = vld [vmem:[%s2950_s1 + $0x88] sm:$0xff]   ;;  %v2293_v11 = vld [vmem:[%s2950_s1 + $0x90] sm:$0xff]  }
   0x5   :  { %2113 = vmatpush3.bf16.msra.mxu1 %v2285_v3  ;;  %v2294_v12 = vld [vmem:[%s2950_s1 + $0x58] sm:$0xff]   ;;  %v2298_v16 = vld [vmem:[%s2950_s1 + $0x60] sm:$0xff]   ;;  %v2302_v20 = vld [vmem:[%s2950_s1 + $0x68] sm:$0xff]   ;;  %v2553_v34 = vsub.s32 %v246_v28, %v2538_v29 }
   0x6   :  { %2114 = vmatprep.subr.bf16.mxu1 %v2288_v6  ;;  %v2295_v13 = vld [vmem:[%s2950_s1 + $0x18] sm:$0xff]   ;;  %v2299_v17 = vld [vmem:[%s2950_s1 + $0x20] sm:$0xff]   ;;  %v2303_v24 = vld [vmem:[%s2950_s1 + $0x28] sm:$0xff]  }
   0x7   :  { %2093 = vmatpush3.bf16.msra.mxu0 %v2287_v5  ;;  %v2296_v14 = vld [vmem:[%s2950_s1 + $0xd8] sm:$0xff]   ;;  %v2300_v18 = vld [vmem:[%s2950_s1 + $0xe0] sm:$0xff]   ;;  %v2304_v25 = vld [vmem:[%s2950_s1 + $0xe8] sm:$0xff]  }
   0x8   :  { %2094 = vmatprep.subr.bf16.mxu0 %v2290_v8  ;;  %v2297_v15 = vld [vmem:[%s2950_s1 + $0x98] sm:$0xff]   ;;  %v2301_v19 = vld [vmem:[%s2950_s1 + $0xa0] sm:$0xff]   ;;  %v2305_v26 = vld [vmem:[%s2950_s1 + $0xa8] sm:$0xff]  }
   0x9   :  { %2115 = vmatpush3.bf16.msra.mxu1 %v2289_v7  ;;  %v2306_v27 = vld [vmem:[%s2950_s1 + $0x70] sm:$0xff]   ;;  %v2310_v33 = vld [vmem:[%s2950_s1 + $0x78] sm:$0xff]   ;;  %v32_v37 = vld [vmem:[%s2951_s0] sm:$0xff] }
   0xa   :  { %2116 = vmatprep.subr.bf16.mxu1 %v2292_v10  ;;  %v2307_v30 = vld [vmem:[%s2950_s1 + $0x30] sm:$0xff]   ;;  %v2311_v35 = vld [vmem:[%s2950_s1 + $0x38] sm:$0xff]   ;;  %v243_v38 = vcombine.high %v32_v37, %v32_v37  ;;  %v250_v39 = vrot.slane %v32_v37, %v2553_v34  ;;  %v2316_v41 = vld [vmem:[%s2950_s1 + $0x140] sm:$0xff]  }
   0xb   :  { %2095 = vmatpush3.bf16.msra.mxu0 %v2291_v9  ;;  %v2308_v31 = vld [vmem:[%s2950_s1 + $0xf0] sm:$0xff]   ;;  %v2312_v36 = vld [vmem:[%s2950_s1 + $0xf8] sm:$0xff]   ;;  %v2318_v45 = vld [vmem:[%s2950_s1 + $0x1c0] sm:$0xff]  }
   0xc   :  { %2096 = vmatprep.subr.bf16.mxu0 %v2294_v12  ;;  %v2309_v32 = vld [vmem:[%s2950_s1 + $0xb0] sm:$0xff]   ;;  %v2315_v40 = vld [vmem:[%s2950_s1 + $0xb8] sm:$0xff]   ;;  %v258_v42 = vcombine.high %v250_v39, %v250_v39  ;;  %v266_v43 = vrot.slane %v250_v39, %v2553_v34  ;;  %v2573_v44 = vrot.slane %v243_v38, %v2553_v34  ;;  %v2317_v47 = vld [vmem:[%s2950_s1 + $0x100] sm:$0xff]  }
   0xd   :  { %2117 = vmatpush3.bf16.msra.mxu1 %v2293_v11  ;;  %v2320_v50 = vld [vmem:[%s2950_s1 + $0x148] sm:$0xff]   ;;  %v2319_v52 = vld [vmem:[%s2950_s1 + $0x180] sm:$0xff]   ;;  %v2324_v57 = vld [vmem:[%s2950_s1 + $0x150] sm:$0xff]  }
   0xe   :  { %2118 = vmatprep.subr.bf16.mxu1 %v2296_v14  ;;  %v280_v46 = vrot.slane %v258_v42, %v2553_v34  ;;  %v259_v48 = vcombine.high %v2573_v44, %v2573_v44  ;;  %v288_v49 = vcombine.high %v266_v43, %v266_v43  ;;  %v2322_v54 = vld [vmem:[%s2950_s1 + $0x1c8] sm:$0xff]   ;;  %v2326_v59 = vld [vmem:[%s2950_s1 + $0x1d0] sm:$0xff]   ;;  %v2328_v61 = vld [vmem:[%s2950_s1 + $0x158] sm:$0xff]  }
   0xf   :  { %2097 = vmatpush3.bf16.msra.mxu0 %v2295_v13  ;;  %v2321_v55 = vld [vmem:[%s2950_s1 + $0x108] sm:$0xff]   ;;  %v2325_v60 = vld [vmem:[%s2950_s1 + $0x110] sm:$0xff]   ;;  %v2330_v63 = vld [vmem:[%s2950_s1 + $0x1d8] sm:$0xff]  }
  0x10   :  { %2098 = vmatprep.subr.bf16.mxu0 %v2298_v16  ;;  %979 = vmatprep.mubr.bf16.mxu0 %v280_v46  ;;  %v290_v51 = vcombine.high %v280_v46, %v280_v46  ;;  %v287_v53 = vrot.slane %v259_v48, %v2553_v34  ;;  %v2323_v58 = vld [vmem:[%s2950_s1 + $0x188] sm:$0xff]   ;;  %v2327_v62 = vld [vmem:[%s2950_s1 + $0x190] sm:$0xff]   ;;  %v2329_v0 = vld [vmem:[%s2950_s1 + $0x118] sm:$0xff]  }
  0x11   :  { %2119 = vmatpush3.bf16.msra.mxu1 %v2297_v15  ;;  %v2332_v1 = vld [vmem:[%s2950_s1 + $0x160] sm:$0xff]   ;;  %v2331_v2 = vld [vmem:[%s2950_s1 + $0x198] sm:$0xff]   ;;  %v2636_v5 = vld [vmem:[%s2951_s0 + $0x8] sm:$0x1f] }
  0x12   :  { %2120 = vmatprep.subr.bf16.mxu1 %v2300_v18  ;;  %1019 = vmatprep.mubr.bf16.mxu1 %v290_v51  ;;  %v291_v56 = vcombine.high %v287_v53, %v287_v53  ;;  %v2334_v3 = vld [vmem:[%s2950_s1 + $0x1e0] sm:$0xff]   ;;  %v2336_v6 = vld [vmem:[%s2950_s1 + $0x168] sm:$0xff]   ;;  %v2340_v10 = vld [vmem:[%s2950_s1 + $0x170] sm:$0xff]   ;;  %v2658_v12 = vrot.slane %v2636_v5, %v2553_v34 }
  0x13   :  { %2099 = vmatpush3.bf16.msra.mxu0 %v2299_v17  ;;  %v2333_v4 = vld [vmem:[%s2950_s1 + $0x120] sm:$0xff]   ;;  %v2338_v8 = vld [vmem:[%s2950_s1 + $0x1e8] sm:$0xff]   ;;  %v2342_v13 = vld [vmem:[%s2950_s1 + $0x1f0] sm:$0xff]  }
  0x14   :  { %2100 = vmatprep.subr.bf16.mxu0 %v2302_v20  ;;  %v2335_v7 = vld [vmem:[%s2950_s1 + $0x1a0] sm:$0xff]   ;;  %v2337_v9 = vld [vmem:[%s2950_s1 + $0x128] sm:$0xff]   ;;  %v2341_v14 = vld [vmem:[%s2950_s1 + $0x130] sm:$0xff]   ;;  %v307_v17 = vcombine.high %v2658_v12, %v2658_v12  ;;  %v273_v20 = vrot.slane %v2573_v44, %v2553_v34 }
  0x15   :  { %2121 = vmatpush3.bf16.msra.mxu1 %v2301_v19  ;;  %v2339_v11 = vld [vmem:[%s2950_s1 + $0x1a8] sm:$0xff]   ;;  %v2344_v15 = vld [vmem:[%s2950_s1 + $0x178] sm:$0xff]   ;;  %v2343_v16 = vld [vmem:[%s2950_s1 + $0x1b0] sm:$0xff]  }
  0x16   :  { %2122 = vmatprep.subr.bf16.mxu1 %v2304_v25  ;;  %v2346_v18 = vld [vmem:[%s2950_s1 + $0x1f8] sm:$0xff]   ;;  %v2348_v21 = vld [vmem:[%s2950_s1 + $0x240] sm:$0xff]   ;;  %v328_v23 = vrot.slane %v307_v17, %v2553_v34  ;;  %v2357_v37 = vld [vmem:[%s2950_s1 + $0x210] sm:$0xff]  }
  0x17   :  { %2101 = vmatpush3.bf16.msra.mxu0 %v2303_v24  ;;  %v2345_v19 = vld [vmem:[%s2950_s1 + $0x138] sm:$0xff]   ;;  %v2350_v24 = vld [vmem:[%s2950_s1 + $0x2c0] sm:$0xff]   ;;  %v2359_v39 = vld [vmem:[%s2950_s1 + $0x290] sm:$0xff]  }
  0x18   :  { %2102 = vmatprep.subr.bf16.mxu0 %v2306_v27  ;;  %v2347_v22 = vld [vmem:[%s2950_s1 + $0x1b8] sm:$0xff]   ;;  %v2349_v25 = vld [vmem:[%s2950_s1 + $0x200] sm:$0xff]   ;;  %v2352_v27 = vld [vmem:[%s2950_s1 + $0x248] sm:$0xff]  }
  0x19   :  { %2123 = vmatpush3.bf16.msra.mxu1 %v2305_v26  ;;  %v289_v26 = vcombine.high %v273_v20, %v273_v20  ;;  %v2351_v28 = vld [vmem:[%s2950_s1 + $0x280] sm:$0xff]   ;;  %v2360_v38 = vld [vmem:[%s2950_s1 + $0x258] sm:$0xff]   ;;  %v2368_v46 = vld [vmem:[%s2950_s1 + $0x268] sm:$0xff]  }
  0x1a   :  { %2124 = vmatprep.subr.bf16.mxu1 %v2308_v31  ;;  %v2354_v31 = vld [vmem:[%s2950_s1 + $0x2c8] sm:$0xff]   ;;  %v2364_v42 = vld [vmem:[%s2950_s1 + $0x260] sm:$0xff]   ;;  %vm1931_vm7 = vmor %vm1930_vm6, %vm1929_vm5 }
  0x1b   :  { %2103 = vmatpush3.bf16.msra.mxu0 %v2307_v30  ;;  %v330_v30 = vcombine.high %v328_v23, %v328_v23  ;;  %v2366_v44 = vld [vmem:[%s2950_s1 + $0x2e0] sm:$0xff]   ;;  %v2370_v48 = vld [vmem:[%s2950_s1 + $0x2e8] sm:$0xff]   ;;  %vm1933_vm9 = vmor %vm1932_vm8, %vm1931_vm7 }
  0x1c   :  { %2104 = vmatprep.subr.bf16.mxu0 %v2310_v33  ;;  %v2356_v33 = vld [vmem:[%s2950_s1 + $0x250] sm:$0xff]   ;;  %v2371_v51 = vld [vmem:[%s2950_s1 + $0x2a8] sm:$0xff]   ;;  %vm1935_vm11 = vmor %vm1934_vm10, %vm1933_vm9 }
  0x1d   :  { %2125 = vmatpush3.bf16.msra.mxu1 %v2309_v32  ;;  %v2353_v32 = vld [vmem:[%s2950_s1 + $0x208] sm:$0xff]   ;;  %vm1937_vm13 = vmor %vm1936_vm12, %vm1935_vm11 }
  0x1e   :  { %2126 = vmatprep.subr.bf16.mxu1 %v2312_v36  ;;  %v2358_v36 = vld [vmem:[%s2950_s1 + $0x2d0] sm:$0xff]  }
  0x1f   :  { %2105 = vmatpush3.bf16.msra.mxu0 %v2311_v35  ;;  %v2355_v35 = vld [vmem:[%s2950_s1 + $0x288] sm:$0xff]  }
  0x20   :  { %2134 = vmatprep.subr.bf16.mxu0 %v2316_v41  ;;  %v2361_v41 = vld [vmem:[%s2950_s1 + $0x218] sm:$0xff]  }
  0x21   :  { %2127 = vmatpush3.bf16.msra.mxu1 %v2315_v40  ;;  %v2362_v40 = vld [vmem:[%s2950_s1 + $0x2d8] sm:$0xff]  }
  0x22   :  { %2156 = vmatprep.subr.bf16.mxu1 %v2318_v45  ;;  %980 = vmatmul.mubr.bf16.vlgmr.msra.gmra.mrb[0].mxu0 %v266_v43  ;;  %v2363_v43 = vld [vmem:[%s2950_s1 + $0x298] sm:$0xff]   ;;  %v2365_v45 = vld [vmem:[%s2950_s1 + $0x220] sm:$0xff]  }
  0x23   :  { %2135 = vmatpush3.bf16.msra.mxu0 %v2317_v47  ;;  %1059 = vmatprep.mubr.bf16.mxu0 %v287_v53  ;;  %v2367_v47 = vld [vmem:[%s2950_s1 + $0x2a0] sm:$0xff]   ;;  %v2373_v53 = vld [vmem:[%s2950_s1 + $0x230] sm:$0xff]  }
  0x24   :  { %1020 = vmatmul.mubr.bf16.vlgmr.msra.gmra.mrb[0].mxu1 %v288_v49  ;;  %2136 = vmatprep.subr.bf16.mxu0 %v2320_v50  ;;  %v2369_v49 = vld [vmem:[%s2950_s1 + $0x228] sm:$0xff]   ;;  %v2372_v50 = vld [vmem:[%s2950_s1 + $0x270] sm:$0xff]  }
  0x25   :  { %2157 = vmatpush3.bf16.msra.mxu1 %v2319_v52  ;;  %1099 = vmatprep.mubr.bf16.mxu1 %v291_v56  ;;  %v2374_v52 = vld [vmem:[%s2950_s1 + $0x2f0] sm:$0xff]   ;;  %v2378_v56 = vld [vmem:[%s2950_s1 + $0x2f8] sm:$0xff]  }
  0x26   :  { %2158 = vmatprep.subr.bf16.mxu1 %v2322_v54  ;;  %v2376_v54 = vld [vmem:[%s2950_s1 + $0x278] sm:$0xff]  }
  0x27   :  { %2137 = vmatpush3.bf16.msra.mxu0 %v2321_v55  ;;  %v2375_v55 = vld [vmem:[%s2950_s1 + $0x2b0] sm:$0xff]  }
  0x28   :  { %2138 = vmatprep.subr.bf16.mxu0 %v2324_v57  ;;  %v2377_v57 = vld [vmem:[%s2950_s1 + $0x238] sm:$0xff]  }
  0x29   :  { %2159 = vmatpush3.bf16.msra.mxu1 %v2323_v58  ;;  %v314_v58 = vrot.slane %v2658_v12, %v2553_v34  ;;  %v2391_v12 = vld [vmem:[%s2952_s3 + $0x38] sm:$0xff]  }
  0x2a   :  { %2160 = vmatprep.subr.bf16.mxu1 %v2326_v59  ;;  %v2379_v59 = vld [vmem:[%s2950_s1 + $0x2b8] sm:$0xff]  }
  0x2b   :  { %2139 = vmatpush3.bf16.msra.mxu0 %v2325_v60  ;;  %v2380_v60 = vld [vmem:[%s2950_s1 + $0x300] sm:$0xff]  }
  0x2c   :  { %2140 = vmatprep.subr.bf16.mxu0 %v2328_v61  ;;  %v2408_v61 = vmov 0.0  }
  0x2d   :  { %2161 = vmatpush3.bf16.msra.mxu1 %v2327_v62  ;;  %v329_v62 = vcombine.high %v314_v58, %v314_v58 }
  0x2e   :  { %2162 = vmatprep.subr.bf16.mxu1 %v2330_v63  ;;  %v2381_v63 = vld [vmem:[%s2950_s1 + $0x308] sm:$0xff]  }
  0x2f   :  { %2141 = vmatpush3.bf16.msra.mxu0 %v2329_v0  ;;  %v292_v0 = vcombine.high %v2636_v5, %v2636_v5  ;;  %v2384_v5 = vld [vmem:[%s2952_s3] sm:$0xff]  }
  0x30   :  { %2142 = vmatprep.subr.bf16.mxu0 %v2332_v1  ;;  %v2382_v1 = vld [vmem:[%s2950_s1 + $0x310] sm:$0xff]  }
  0x31   :  { %2163 = vmatpush3.bf16.msra.mxu1 %v2331_v2  ;;  %v306_v2 = vrot.slane %v292_v0, %v2553_v34  ;;  %v1358_v0 = vld [vmem:[%s2955_s6 + $0x8] sm:$0xff] }
  0x32   :  { %2164 = vmatprep.subr.bf16.mxu1 %v2334_v3  ;;  %v2383_v3 = vld [vmem:[%s2950_s1 + $0x318] sm:$0xff]  }
  0x33   :  { %2143 = vmatpush3.bf16.msra.mxu0 %v2333_v4  ;;  %v321_v4 = vrot.slane %v306_v2, %v2553_v34 }
  0x34   :  { %2144 = vmatprep.subr.bf16.mxu0 %v2336_v6  ;;  %v2385_v6 = vld [vmem:[%s2952_s3 + $0x8] sm:$0xff]  }
  0x35   :  { %2165 = vmatpush3.bf16.msra.mxu1 %v2335_v7  ;;  %v2386_v7 = vld [vmem:[%s2952_s3 + $0x10] sm:$0xff]  }
  0x36   :  { %2166 = vmatprep.subr.bf16.mxu1 %v2338_v8  ;;  %v2387_v8 = vld [vmem:[%s2952_s3 + $0x18] sm:$0xff]  }
  0x37   :  { %2145 = vmatpush3.bf16.msra.mxu0 %v2337_v9  ;;  %v2388_v9 = vld [vmem:[%s2952_s3 + $0x20] sm:$0xff]  }
  0x38   :  { %2146 = vmatprep.subr.bf16.mxu0 %v2340_v10  ;;  %v2389_v10 = vld [vmem:[%s2952_s3 + $0x28] sm:$0xff]  }
  0x39   :  { %2167 = vmatpush3.bf16.msra.mxu1 %v2339_v11  ;;  %v2390_v11 = vld [vmem:[%s2952_s3 + $0x30] sm:$0xff]  }
  0x3a   :  { %2168 = vmatprep.subr.bf16.mxu1 %v2342_v13  ;;  %v1345_v13 = vld [vmem:[%s2953_s5] sm:$0x3] }
  0x3b   :  { %2147 = vmatpush3.bf16.msra.mxu0 %v2341_v14  ;;  %1347 = vrot.lane.b32.xlu0 %v1345_v13, %s2410_s15 }
  0x3c   :  { %2148 = vmatprep.subr.bf16.mxu0 %v2344_v15  ;;  %v1947_v15 = vld [vmem:[%s2954_s2] ss:$0 sm:$0xff] }
  0x3d   :  { %2169 = vmatpush3.bf16.msra.mxu1 %v2343_v16 }
  0x3e   :  { %2170 = vmatprep.subr.bf16.mxu1 %v2346_v18 }
  0x3f   :  { %2149 = vmatpush3.bf16.msra.mxu0 %v2345_v19 }
  0x40   :  { %2178 = vmatprep.subr.bf16.mxu0 %v2348_v21 }
  0x41   :  { %2171 = vmatpush3.bf16.msra.mxu1 %v2347_v22 }
  0x42   :  { %1060 = vmatmul.mubr.bf16.vlgmr.msra.gmra.mrb[4].mxu0 %v273_v20  ;;  %2200 = vmatprep.subr.bf16.mxu1 %v2350_v24 }
  0x43   :  { %2179 = vmatpush3.bf16.msra.mxu0 %v2349_v25  ;;  %1139 = vmatprep.mubr.bf16.mxu0 %v328_v23 }
  0x44   :  { %1100 = vmatmul.mubr.bf16.vlgmr.msra.gmra.mrb[4].mxu1 %v289_v26  ;;  %2180 = vmatprep.subr.bf16.mxu0 %v2352_v27 }
  0x45   :  { %2201 = vmatpush3.bf16.msra.mxu1 %v2351_v28  ;;  %1179 = vmatprep.mubr.bf16.mxu1 %v330_v30 }
  0x46   :  { %2202 = vmatprep.subr.bf16.mxu1 %v2354_v31 }
  0x47   :  { %2181 = vmatpush3.bf16.msra.mxu0 %v2353_v32 }
  0x48   :  { %2182 = vmatprep.subr.bf16.mxu0 %v2356_v33 }
  0x49   :  { %2203 = vmatpush3.bf16.msra.mxu1 %v2355_v35 }
  0x4a   :  { %2204 = vmatprep.subr.bf16.mxu1 %v2358_v36 }
  0x4b   :  { %2183 = vmatpush3.bf16.msra.mxu0 %v2357_v37 }
  0x4c   :  { %2184 = vmatprep.subr.bf16.mxu0 %v2360_v38 }
  0x4d   :  { %2205 = vmatpush3.bf16.msra.mxu1 %v2359_v39 }
  0x4e   :  { %2206 = vmatprep.subr.bf16.mxu1 %v2362_v40 }
  0x4f   :  { %2185 = vmatpush3.bf16.msra.mxu0 %v2361_v41 }
  0x50   :  { %2186 = vmatprep.subr.bf16.mxu0 %v2364_v42 }
  0x51   :  { %2207 = vmatpush3.bf16.msra.mxu1 %v2363_v43 }
  0x52   :  { %2208 = vmatprep.subr.bf16.mxu1 %v2366_v44 }
  0x53   :  { %2187 = vmatpush3.bf16.msra.mxu0 %v2365_v45 }
  0x54   :  { %2188 = vmatprep.subr.bf16.mxu0 %v2368_v46 }
  0x55   :  { %2209 = vmatpush3.bf16.msra.mxu1 %v2367_v47 }
  0x56   :  { %2210 = vmatprep.subr.bf16.mxu1 %v2370_v48 }
  0x57   :  { %2189 = vmatpush3.bf16.msra.mxu0 %v2369_v49 }
  0x58   :  { %2190 = vmatprep.subr.bf16.mxu0 %v2372_v50 }
  0x59   :  { %2211 = vmatpush3.bf16.msra.mxu1 %v2371_v51 }
  0x5a   :  { %2212 = vmatprep.subr.bf16.mxu1 %v2374_v52 }
  0x5b   :  { %2191 = vmatpush3.bf16.msra.mxu0 %v2373_v53 }
  0x5c   :  { %2192 = vmatprep.subr.bf16.mxu0 %v2376_v54 }
  0x5d   :  { %2213 = vmatpush3.bf16.msra.mxu1 %v2375_v55 }
  0x5e   :  { %2214 = vmatprep.subr.bf16.mxu1 %v2378_v56 }
  0x5f   :  { %2193 = vmatpush3.bf16.msra.mxu0 %v2377_v57 }
  0x60   :  { %2238 = vmatprep.subr.bf16.mxu0 %v2408_v61 }
  0x61   :  { %2215 = vmatpush3.bf16.msra.mxu1 %v2379_v59 }
  0x62   :  { %1140 = vmatmul.mubr.bf16.vlgmr.msra.gmra.mrb[8].mxu0 %v314_v58  ;;  %2250 = vmatprep.subr.bf16.mxu1 %v2408_v61 }
  0x63   :  { %2239 = vmatpush3.bf16.msra.mxu0 %v2380_v60  ;;  %2246 = vmatprep.mubr.msk.bf16.mxu0 %vm2409_vm0, %v2408_v61  ;;  %v1357_v60 = vld [vmem:[%s2955_s6] sm:$0xff] }
  0x64   :  { %1180 = vmatmul.mubr.bf16.vlgmr.msra.gmra.mrb[8].mxu1 %v329_v62  ;;  %2240 = vmatprep.subr.bf16.mxu0 %v2408_v61  ;;  %v1360_v62 = vld [vmem:[%s2955_s6 + $0x18] sm:$0xff]  ;;  %v2058_v2 = vcombine.low %v1357_v60, %v1357_v60 }
  0x65   :  { %2266 = vmatprep.mubr.msk.bf16.mxu1 %vm2409_vm0, %v2408_v61  ;;  %2251 = vmatpush3.bf16.msra.mxu1 %v2384_v5  ;;  %v2061_v5 = vcombine.high %v1358_v0, %v1358_v0 }
  0x66   :  { %2252 = vmatprep.subr.bf16.mxu1 %v2408_v61 }
  0x67   :  { %2241 = vmatpush3.bf16.msra.mxu0 %v2381_v63  ;;  %v2411_v63 = vmov 0  }
  0x68   :  { %2242 = vmatprep.subr.bf16.mxu0 %v2408_v61 }
  0x69   :  { %2253 = vmatpush3.bf16.msra.mxu1 %v2385_v6  ;;  %v2049_v6 = vld [vmem:[%s2956_s4] ss:$0 sm:$0xff] }
  0x6a   :  { %2254 = vmatprep.subr.bf16.mxu1 %v2408_v61 }
  0x6b   :  { %2243 = vmatpush3.bf16.msra.mxu0 %v2382_v1  ;;  %v2059_v1 = vcombine.high %v1357_v60, %v1357_v60  ;;  %v2919_v60 = vld [vmem:[%s2958_s7 + $0x8] sm:$0x1f] }
  0x6c   :  { %2244 = vmatprep.subr.bf16.mxu0 %v2408_v61 }
  0x6d   :  { %2255 = vmatpush3.bf16.msra.mxu1 %v2386_v7  ;;  %v1475_v7 = vsel %vm1473_vm2, %v2058_v2, 0 }
  0x6e   :  { %2256 = vmatprep.subr.bf16.mxu1 %v2408_v61 }
  0x6f   :  { %2245 = vmatpush3.bf16.msra.mxu0 %v2383_v3  ;;  %v2065_v3 = vcombine.high %v1360_v62, %v1360_v62 }
  0x70   :  { %2071 = vmatprep.subr.msk.bf16.mxu0 %vm1473_vm2, %v2059_v1 }
  0x71   :  { %2257 = vmatpush3.bf16.msra.mxu1 %v2387_v8 }
  0x72   :  { %2247 = vmatmul.mubr.msk.bf16.vlgmr.msra.gmra.mrb[12].mxu0 %vm943_vm1, %v321_v4  ;;  %2258 = vmatprep.subr.bf16.mxu1 %v2408_v61  ;;  %v2064_v4 = vcombine.low %v1360_v62, %v1360_v62  ;;  %v1382_v62 = vsub.s32 3, %v2538_v29 }
  0x73   :  { %1545 = vmatprep.mubr.bf16.mxu0 %v2411_v63  ;;  %1514 = vmatpush1.bf16.msra.mxu0 %v1475_v7 }
  0x74   :  { %v1493_v8 = vsel %vm1473_vm2, %v2064_v4, 0  ;;  %2073 = vmatprep.subr.msk.bf16.mxu0 %vm1473_vm2, %v2061_v5 }
  0x75   :  { %2259 = vmatpush3.bf16.msra.mxu1 %v2388_v9 }
  0x76   :  { %2260 = vmatprep.subr.bf16.mxu1 %v2408_v61 }
  0x79   :  { %2261 = vmatpush3.bf16.msra.mxu1 %v2389_v10 }
  0x7a   :  { %2262 = vmatprep.subr.bf16.mxu1 %v2408_v61 }
  0x7d   :  { %2263 = vmatpush3.bf16.msra.mxu1 %v2390_v11 }
  0x7e   :  { %2264 = vmatprep.subr.bf16.mxu1 %v2408_v61 }
  0x81   :  { %2265 = vmatpush3.bf16.msra.mxu1 %v2391_v12 }
  0x82   :  { %2077 = vmatprep.subr.msk.bf16.mxu1 %vm1473_vm2, %v2065_v3 }
  0xf5   :  { %v2106_v14 = vpop.f32.mrb[0].mxu0 }
  0xf6   :  { %v2107_v16 = vpop.f32.mrb[1].mxu0 }
  0xf7   :  { %v2108_v17 = vadd.f32 %v2107_v16, %v2106_v14  ;;  %v2109_v18 = vpop.f32.mrb[2].mxu0  ;;  %v2128_v19 = vpop.f32.mrb[0].mxu1  ;;  %v1362_v16 = vld [vmem:[%s2955_s6 + $0x28] sm:$0xff] }
  0xf8   :  { %v2110_v20 = vpop.f32.mrb[3].mxu0  ;;  %v2129_v21 = vpop.f32.mrb[1].mxu1 }
  0xf9   :  { %v982_v22 = vadd.f32 %v2108_v17, %v1947_v15  ;;  %v2130_v23 = vadd.f32 %v2129_v21, %v2128_v19  ;;  %v2131_v24 = vpop.f32.mrb[2].mxu1  ;;  %v2069_v17 = vcombine.high %v1362_v16, %v1362_v16  ;;  %v1348_v19 = vpop.permute.xlu0 %1347 }
  0xfa   :  { %v2132_v25 = vpop.f32.mrb[3].mxu1  ;;  %v2060_v24 = vcombine.low %v1358_v0, %v1358_v0 }
  0xfb   :  { %v1022_v26 = vadd.f32 %v2130_v23, %v982_v22  ;;  %v2068_v25 = vcombine.low %v1362_v16, %v1362_v16 }
 0x115   :  { %v2150_v27 = vpop.f32.mrb[4].mxu0 }
 0x116   :  { %v2151_v28 = vpop.f32.mrb[5].mxu0 }
 0x117   :  { %v2152_v30 = vadd.f32 %v2151_v28, %v2150_v27  ;;  %v2153_v31 = vpop.f32.mrb[6].mxu0  ;;  %v2172_v32 = vpop.f32.mrb[4].mxu1  ;;  %v1481_v27 = vsel %vm1473_vm2, %v2060_v24, 0  ;;  %v1505_v28 = vsel %vm1473_vm2, %v2068_v25, 0 }
 0x118   :  { %v2154_v33 = vpop.f32.mrb[7].mxu0  ;;  %v2173_v35 = vpop.f32.mrb[5].mxu1 }
 0x119   :  { %v1062_v36 = vadd.f32 %v2152_v30, %v1022_v26  ;;  %v2174_v37 = vadd.f32 %v2173_v35, %v2172_v32  ;;  %v2175_v38 = vpop.f32.mrb[6].mxu1  ;;  %v1359_v26 = vld [vmem:[%s2955_s6 + $0x10] sm:$0xff]  ;;  %v1361_v33 = vld [vmem:[%s2955_s6 + $0x20] sm:$0xff] }
 0x11a   :  { %v2176_v39 = vpop.f32.mrb[7].mxu1  ;;  %v2063_v30 = vcombine.high %v1359_v26, %v1359_v26  ;;  %v2062_v32 = vcombine.low %v1359_v26, %v1359_v26 }
 0x11b   :  { %v1102_v40 = vadd.f32 %v2174_v37, %v1062_v36  ;;  %v2067_v36 = vcombine.high %v1361_v33, %v1361_v33  ;;  %v2066_v37 = vcombine.low %v1361_v33, %v1361_v33  ;;  %v2404_v39 = vld [vmem:[%s2955_s6 + $0x30] ss:$0 sps:$4 sm:$0xff]  }
 0x11c   :  { %v1487_v35 = vsel %vm1473_vm2, %v2062_v32, 0 }
 0x11d   :  { %v1499_v38 = vsel %vm1473_vm2, %v2066_v37, 0 }
 0x135   :  { %v2194_v41 = vpop.f32.mrb[8].mxu0 }
 0x136   :  { %v2195_v42 = vpop.f32.mrb[9].mxu0 }
 0x137   :  { %v2196_v43 = vadd.f32 %v2195_v42, %v2194_v41  ;;  %v2197_v44 = vpop.f32.mrb[10].mxu0  ;;  %v2216_v45 = vpop.f32.mrb[8].mxu1  ;;  %v1370_v41 = vsub.s32 0, %v2538_v29  ;;  %v1394_v42 = vsub.s32 6, %v2538_v29 }
 0x138   :  { %v2198_v46 = vpop.f32.mrb[11].mxu0  ;;  %v2217_v47 = vpop.f32.mrb[9].mxu1  ;;  %v1374_v44 = vsub.s32 1, %v2538_v29 }
 0x139   :  { %v1142_v48 = vadd.f32 %v2196_v43, %v1102_v40  ;;  %v2218_v49 = vadd.f32 %v2217_v47, %v2216_v45  ;;  %v2219_v50 = vpop.f32.mrb[10].mxu1  ;;  %v1511_v40 = vsel %vm1473_vm2, %v2404_v39, 0  ;;  %v1364_v43 = vld [vmem:[%s2958_s7] sm:$0xff]  ;;  %v1398_v45 = vsub.s32 7, %v2538_v29 }
 0x13a   :  { %v2220_v51 = vpop.f32.mrb[11].mxu1  ;;  %v1371_v46 = vrot.slane %v1364_v43, %v1370_v41  ;;  %v1395_v47 = vrot.slane %v1364_v43, %v1394_v42 }
 0x13b   :  { %v1182_v52 = vadd.f32 %v2218_v49, %v1142_v48  ;;  %v1399_v48 = vrot.slane %v1364_v43, %v1398_v45 }
 0x145   :  { %v1221_v53 = vpop.f32.mrb[12].mxu0 }
 0x146   :  { %v1222_v54 = vadd.f32 %v1221_v53, %v1182_v52  ;;  %v2248_v55 = vpop.f32.mrb[13].mxu0 }
 0x147   :  { %v1224_v56 = vpop.f32.mrb[14].mxu0  ;;  %v1378_v55 = vsub.s32 2, %v2538_v29 }
 0x148   :  { %v1227_v57 = vmax.f32 %v1222_v54, 0.0  ;;  %v2249_v58 = vpop.f32.mrb[15].mxu0 }
 0x149   :  { %v1379_v5 = vrot.slane %v1364_v43, %v1378_v55 }
 0x14a   :  { %v1228_v59 = vpack.c.bf16 %v1227_v57, %v1227_v57 }
 0x14c   :  { %2267 = vmatmul.mubr.bf16.vlgmr.msra.gmra.mrb[12].mxu1 %v1228_v59 }
 0x14d   :  { %1668 = vmatprep.mubr.bf16.mxu1 %v2411_v63  ;;  %1637 = vmatpush1.bf16.msra.mxu1 %v1493_v8 }
 0x14e   :  { %2081 = vmatprep.subr.msk.bf16.mxu1 %vm1473_vm2, %v2069_v17  ;;  %v1386_v17 = vsub.s32 4, %v2538_v29 }
 0x21f   :  { %v1334_v9 = vpop.f32.mrb[12].mxu1 }
 0x220   :  { %v1335_v10 = vadd.f32 %v2049_v6, %v1334_v9  ;;  %v2268_v11 = vpop.f32.mrb[13].mxu1  ;;  %v1411_v6 = vrot.slane %v2919_v60, %v1378_v55  ;;  %v1383_v9 = vrot.slane %v1364_v43, %v1382_v62 }
 0x221   :  { %v1337_v12 = vpop.f32.mrb[14].mxu1 }
 0x222   :  { %1341 = vst.msk [vmem:[%s2957_s8] sm:$0x3] %vm1340_vm3, %v1335_v10  ;;  %1352 = vrot.lane.b32.xlu0 %v1335_v10, %s2410_s15  ;;  %v2269_v13 = vpop.f32.mrb[15].mxu1  ;;  %v1342_v14 = vmul.f32 0.5, %v1335_v10  ;;  %s2412_s8 = smov 120   ;;  %v1415_v10 = vrot.slane %v2919_v60, %v1382_v62 }
 0x224   :  { %v1343_v15 = vmul.f32 1.442695, %v1342_v14 }
 0x226   :  { %2405 = vpow2.f32 %v1343_v15 }
 0x230   :  { %v2406_v18 = vpop.eup %2405 }
 0x231   :  { %v1350_v20 = vmul.f32 %v2406_v18, %v1348_v19 }
 0x294   :  { %v1353_v21 = vpop.permute.xlu0 %1352 }
 0x295   :  { %v1355_v22 = vadd.f32 %v1353_v21, %v1350_v20 }
 0x297   :  { %v1356_v23 = vpack.c.bf16 %v1355_v22, %v1355_v22  ;;  %v1390_v22 = vsub.s32 5, %v2538_v29  ;;  %v1419_v29 = vrot.slane %v2919_v60, %v1386_v17 }
 0x299   :  { %1434 = vrot.lane.b32.xlu1 %v1356_v23, %s2412_s8  ;;  %v1391_v33 = vrot.slane %v1364_v43, %v1390_v22 }
 0x30b   :  { %v1435_v31 = vpop.permute.xlu1 %1434 }
 0x30c   :  { %2072 = vmatmul.mubr.msk.bf16.vlgmr.msra.gmra.mrb[16].mxu0 %vm1469_vm4, %v1435_v31  ;;  %2078 = vmatmul.mubr.msk.bf16.vlgmr.msra.gmra.mrb[16].mxu1 %vm1469_vm4, %v1435_v31 }
 0x30d   :  { %1555 = vmatpush1.bf16.msra.mxu0 %v1481_v27  ;;  %1719 = vmatpush1.bf16.msra.mxu1 %v1505_v28 }
 0x30e   :  { %1586 = vmatprep.mubr.bf16.mxu0 %v2411_v63  ;;  %2075 = vmatprep.subr.msk.bf16.mxu0 %vm1473_vm2, %v2063_v30  ;;  %v1387_v30 = vrot.slane %v1364_v43, %v1386_v17 }
 0x30f   :  { %1750 = vmatprep.mubr.bf16.mxu1 %v2411_v63 }
 0x314   :  { %2074 = vmatmul.mubr.msk.bf16.vlgmr.msra.gmra.mrb[20].mxu0 %vm1469_vm4, %v1435_v31  ;;  %2082 = vmatmul.mubr.msk.bf16.vlgmr.msra.gmra.mrb[20].mxu1 %vm1469_vm4, %v1435_v31 }
 0x315   :  { %1596 = vmatpush1.bf16.msra.mxu0 %v1487_v35  ;;  %1627 = vmatprep.mubr.bf16.mxu0 %v2411_v63 }
 0x316   :  { %2079 = vmatprep.subr.msk.bf16.mxu0 %vm1473_vm2, %v2067_v36 }
 0x31c   :  { %2076 = vmatmul.mubr.msk.bf16.vlgmr.msra.gmra.mrb[24].mxu0 %vm1469_vm4, %v1435_v31 }
 0x31d   :  { %1678 = vmatpush1.bf16.msra.mxu0 %v1499_v38  ;;  %1709 = vmatprep.mubr.bf16.mxu0 %v2411_v63 }
 0x31e   :  { %2270 = vmatprep.subr.bf16.mxu0 %v2408_v61 }
 0x324   :  { %2080 = vmatmul.mubr.msk.bf16.vlgmr.msra.gmra.mrb[28].mxu0 %vm1469_vm4, %v1435_v31 }
 0x325   :  { %2271 = vmatpush3.bf16.msra.mxu0 %v1511_v40  ;;  %2272 = vmatprep.mubr.msk.bf16.mxu0 %vm2409_vm0, %v2408_v61  ;;  %v1375_v61 = vrot.slane %v1364_v43, %v1374_v44  ;;  %v1407_v43 = vrot.slane %v2919_v60, %v1374_v44 }
 0x32c   :  { %2273 = vmatmul.mubr.msk.bf16.vlgmr.msra.gmra.mrb[32].mxu0 %vm1469_vm4, %v1435_v31 }
 0x3df   :  { %v1547_v49 = vpop.f32.mrb[16].mxu0  ;;  %v1670_v50 = vpop.f32.mrb[16].mxu1 }
 0x3e0   :  { %v1548_v51 = vadd.f32 %v1547_v49, %v1371_v46  ;;  %v1671_v52 = vadd.f32 %v1670_v50, %v1395_v47  ;;  %v1549_v53 = vpop.f32.mrb[17].mxu0  ;;  %v1672_v54 = vpop.f32.mrb[17].mxu1 }
 0x3e1   :  { %v1550_v56 = vadd.f32 %v1549_v53, %v1375_v61  ;;  %v1673_v57 = vadd.f32 %v1672_v54, %v1399_v48  ;;  %v1551_v58 = vpop.f32.mrb[18].mxu0  ;;  %v1674_v59 = vpop.f32.mrb[18].mxu1  ;;  %v1403_v48 = vrot.slane %v2919_v60, %v1370_v41 }
 0x3e2   :  { %v1799_v63 = vmax.f32 %v1548_v51, 0.0  ;;  %v1805_v0 = vmax.f32 %v1671_v52, 0.0  ;;  %v1552_v1 = vpop.f32.mrb[19].mxu0  ;;  %v1675_v2 = vpop.f32.mrb[19].mxu1 }
 0x3e3   :  { %v1800_v3 = vmax.f32 %v1550_v56, 0.0  ;;  %v1806_v4 = vmax.f32 %v1673_v57, 0.0 }
 0x3e5   :  { %v2084_v7 = vpack.c.bf16 %v1800_v3, %v1799_v63  ;;  %v2087_v8 = vpack.c.bf16 %v1806_v4, %v1805_v0 }
 0x3e7   :  { %v1588_v11 = vpop.f32.mrb[20].mxu0  ;;  %v1752_v12 = vpop.f32.mrb[20].mxu1  ;;  %v1848_v35 = vrot.slane %v2084_v7, %v2553_v34  ;;  %v1869_v50 = vrot.slane %v2087_v8, %v2553_v34 }
 0x3e8   :  { %v1589_v13 = vadd.f32 %v1588_v11, %v1379_v5  ;;  %v1753_v14 = vadd.f32 %v1752_v12, %v1411_v6  ;;  %v1590_v15 = vpop.f32.mrb[21].mxu0  ;;  %v1754_v16 = vpop.f32.mrb[21].mxu1 }
 0x3e9   :  { %v1591_v18 = vadd.f32 %v1590_v15, %v1383_v9  ;;  %v1755_v19 = vadd.f32 %v1754_v16, %v1415_v10  ;;  %v1592_v20 = vpop.f32.mrb[22].mxu0  ;;  %v1756_v21 = vpop.f32.mrb[22].mxu1 }
 0x3ea   :  { %v1801_v23 = vmax.f32 %v1589_v13, 0.0  ;;  %v1809_v24 = vmax.f32 %v1753_v14, 0.0  ;;  %v1593_v25 = vpop.f32.mrb[23].mxu0  ;;  %v1757_v26 = vpop.f32.mrb[23].mxu1 }
 0x3eb   :  { %v1802_v27 = vmax.f32 %v1591_v18, 0.0  ;;  %v1810_v28 = vmax.f32 %v1755_v19, 0.0 }
 0x3ed   :  { %v2085_v31 = vpack.c.bf16 %v1802_v27, %v1801_v23  ;;  %v2089_v32 = vpack.c.bf16 %v1810_v28, %v1809_v24 }
 0x3ef   :  { %v1855_v36 = vrot.slane %v2085_v31, %v2553_v34  ;;  %v1629_v37 = vpop.f32.mrb[24].mxu0  ;;  %v1902_v1 = vrot.slane %v2089_v32, %v2553_v34 }
 0x3f0   :  { %v1630_v38 = vadd.f32 %v1629_v37, %v1387_v30  ;;  %v1631_v39 = vpop.f32.mrb[25].mxu0 }
 0x3f1   :  { %v1870_v40 = vcombine.low %v1848_v35, %v1855_v36  ;;  %v1632_v42 = vadd.f32 %v1631_v39, %v1391_v33  ;;  %v1633_v45 = vpop.f32.mrb[26].mxu0 }
 0x3f2   :  { %v1803_v46 = vmax.f32 %v1630_v38, 0.0  ;;  %v1634_v47 = vpop.f32.mrb[27].mxu0 }
 0x3f3   :  { %v1804_v61 = vmax.f32 %v1632_v42, 0.0  ;;  %v1878_v62 = vrot.slane %v1870_v40, %v2553_v34 }
 0x3f5   :  { %v2086_v49 = vpack.c.bf16 %v1804_v61, %v1803_v46 }
 0x3f7   :  { %v1862_v51 = vrot.slane %v2086_v49, %v2553_v34  ;;  %v1711_v52 = vpop.f32.mrb[28].mxu0 }
 0x3f8   :  { %v1712_v53 = vadd.f32 %v1711_v52, %v1403_v48  ;;  %v1713_v54 = vpop.f32.mrb[29].mxu0 }
 0x3f9   :  { %v1871_v55 = vcombine.low %v1862_v51, %v1869_v50  ;;  %v1714_v56 = vadd.f32 %v1713_v54, %v1407_v43  ;;  %v1715_v57 = vpop.f32.mrb[30].mxu0 }
 0x3fa   :  { %v1807_v58 = vmax.f32 %v1712_v53, 0.0  ;;  %v1716_v59 = vpop.f32.mrb[31].mxu0 }
 0x3fb   :  { %v1885_v41 = vrot.slane %v1871_v55, %v2553_v34  ;;  %v1808_v63 = vmax.f32 %v1714_v56, 0.0 }
 0x3fd   :  { %v1886_v44 = vcombine.low %v1878_v62, %v1885_v41  ;;  %v2088_v0 = vpack.c.bf16 %v1808_v63, %v1807_v58 }
 0x3ff   :  { %1928 = vst [vmem:[%s2959_s9] sm:$0xff] %v1886_v44  ;;  %v1895_v2 = vrot.slane %v2088_v0, %v2553_v34  ;;  %v1793_v3 = vpop.f32.mrb[32].mxu0 }
 0x400   :  { %v1794_v4 = vadd.f32 %v1793_v3, %v1419_v29  ;;  %v2274_v5 = vpop.f32.mrb[33].mxu0 }
 0x401   :  { %v1910_v6 = vcombine.low %v1895_v2, %v1902_v1  ;;  %v1796_v7 = vpop.f32.mrb[34].mxu0 }
 0x402   :  { %v1811_v60 = vmax.f32 %v1794_v4, 0.0  ;;  %v2275_v8 = vpop.f32.mrb[35].mxu0 }
 0x403   :  { %v1917_v11 = vrot.slane %v1910_v6, %v2553_v34 }
 0x404   :  { %v1824_v9 = vpack.c.bf16 %v1811_v60, %v1811_v60 }
 0x406   :  { %v1909_v10 = vrot.slane %v1824_v9, %v2553_v34 }
 0x408   :  { %v1924_v12 = vrot.slane %v1909_v10, %v2553_v34 }
 0x40a   :  { %v1925_v13 = vcombine.low %v1917_v11, %v1924_v12 }
 0x40c   :  { %1938 = vst.msk [vmem:[%s2959_s9 + $0x8] sm:$0x1f] %vm1937_vm13, %v1925_v13 }

// kernel: vae_forward.10
= control target key start
LH: loop header
LB: loop body
LE: loop exit
PB: predicated region body
PF: predicated region fallthrough
CT: control target
= control target key end

     0   :  { %s1212_s12 = smov 0   ;;  %s1214_s13 = smov 0   ;;  %s1548_s0 = inlined_call_operand.vmem [shape: f32[338,32], index: 0, kind: input, shape index: {}]   ;;  %s1549_s1 = inlined_call_operand.vmem [shape: f32[1,32], index: 1, kind: input, shape index: {}]   ;;  %s1550_s2 = inlined_call_operand.vmem [shape: bf16[32,16], index: 2, kind: input, shape index: {}]   ;;  %s1551_s3 = inlined_call_operand.vmem [shape: f32[338,16], index: 3, kind: output, shape index: {}]  }
   0x1   :  { %s1216_s14 = smov 0  }
   0x2 LB: > { %s1225_s15 = sadd.s32 4294967295, %s1158_s14   ;;  %s1227_s16 = sadd.s32 1, %s1158_s14   ;;  %s1158_s14 = sphi %s1216_s14, %s1560_s14   ;;  %s1154_s13 = sphi %s1214_s13, %s1559_s13   ;;  %s1150_s12 = sphi %s1212_s12, %s1558_s12  }
   0x3   : > { %s85_s17 = ssub.s32 %s1158_s14, %s1227_s16  ;;  %s88_s18 = sadd.s32 1, %s1154_s13 }
   0x4   : > { %p86_p0 = scmp.eq.s32.totalorder %s85_s17, 0  ;;  %p98_p1 = scmp.ne.s32.totalorder %s1154_s13, %s1150_s12 }
   0x5   : > { %p99_p2 = scmp.eq.s32.totalorder %s1225_s15, 1  ;;  %p913_p3 = scmp.ge.s32.totalorder %s1158_s14, 1 }
   0x6   : > { %s1235_s19 = scalar_select %p86_p0, %s1154_s13, %s88_s18  }
   0x7   : > { %p1237_p4 = por %p99_p2, %p98_p1  ;;  %p146_p5 = scmp.lt.s32.totalorder %s1158_s14, 3 }
   0x9   : > { %p147_p6 = pnand %p913_p3, %p146_p5 }
   0xa   : > { %v1102_v0 = vld [vmem:[%s1550_s2] sm:$0xff] (!%p147_p6)   ;;  %s1245_s23 = sshll.u32 (!%p147_p6), %s1225_s15, 5  ;;  %v1103_v1 = vld [vmem:[%s1550_s2 + $0x8] sm:$0xff] (!%p147_p6)   ;;  %vm328_vm0 = vcmask (!%p147_p6), 261120   ;;  %s170_s6 = sand.u32 (!%p147_p6), 1, %s1150_s12   ;;  %vm538_vm1 = vcmask (!%p147_p6), 130048  }
   0xb   : > { %150 = sbr.rel (%p147_p6) target bundleno = 328 (0x148), region = 32  ;;  %p178_p7 = scmp.lt.s32.totalorder (!%p147_p6), %s1245_s23, 42  ;;  %974 = vmatprep.subr.bf16.mxu0 (!%p147_p6), %v1102_v0  ;;  %1010 = vmatprep.subr.bf16.mxu1 (!%p147_p6), %v1102_v0  ;;  %v1255_v2 = vld [vmem:[%s1549_s1] ss:$0 sm:$0xff] (!%p147_p6) }
   0xc   : > { %975 = vmatpush3.bf16.msra.mxu0 (!%p147_p6), %v1102_v0  ;;  %1012 = vmatpush3.bf16.msra.mxu1 (!%p147_p6), %v1102_v0  ;;  %s914_s7 = sshll.u32 (!%p147_p6), %s170_s6, 8 }
   0xd   : > { %976 = vmatprep.subr.bf16.mxu0 (!%p147_p6), %v1103_v1  ;;  %1011 = vmatprep.subr.bf16.mxu1 (!%p147_p6), %v1103_v1  ;;  %s1343_s8 = scalar_lea.vmem (!%p147_p6), [#allocation2], %s914_s7  }
  0x10   : > { %977 = vmatpush3.bf16.msra.mxu0 (!%p147_p6), %v1103_v1  ;;  %1013 = vmatpush3.bf16.msra.mxu1 (!%p147_p6), %v1103_v1 }
  0x12   : > { %s179_s26 = scalar_select %p178_p7, %s1245_s23, 42 }
  0x13   : > { %s579_s9 = ssub.s32 (%p1237_p4), 43, %s1245_s23  ;;  %s953_s10 = sshll.u32 (%p1237_p4), %s1225_s15, 8 }
  0x14   : > { %s916_s27 = sshll.u32 %s179_s26, 3  ;;  %p580_p8 = scmp.lt.s32.totalorder (%p1237_p4), %s579_s9, 32 }
  0x15   : > { %s1260_s5 = scalar_lea.vmem %s1548_s0, %s916_s27  ;;  %s1416_s14 = scalar_lea.vmem (%p1237_p4), %s1551_s3, %s953_s10  }
  0x16   : > { %v193_v3 = vld [vmem:[%s1260_s5] sm:$0xff]  ;;  %v194_v4 = vld [vmem:[%s1260_s5 + $0x8] sm:$0xff]  ;;  %v195_v10 = vld [vmem:[%s1260_s5 + $0x10] sm:$0xff] }
  0x17   : > { %v209_v5 = vld [vmem:[%s1260_s5 + $0x80] sm:$0xff]  ;;  %v232_v6 = vadd.f32 %v1255_v2, %v193_v3  ;;  %v233_v7 = vadd.f32 %v1255_v2, %v194_v4  ;;  %v210_v8 = vld [vmem:[%s1260_s5 + $0x88] sm:$0xff]  ;;  %v196_v11 = vld [vmem:[%s1260_s5 + $0x18] sm:$0xff]  ;;  %v234_v13 = vadd.f32 %v1255_v2, %v195_v10 }
  0x18   : > { %v248_v9 = vadd.f32 %v1255_v2, %v209_v5  ;;  %v249_v12 = vadd.f32 %v1255_v2, %v210_v8  ;;  %v235_v14 = vadd.f32 %v1255_v2, %v196_v11  ;;  %v211_v15 = vld [vmem:[%s1260_s5 + $0x90] sm:$0xff]  ;;  %v212_v16 = vld [vmem:[%s1260_s5 + $0x98] sm:$0xff]  ;;  %v197_v17 = vld [vmem:[%s1260_s5 + $0x20] sm:$0xff] }
  0x19   : > { %v264_v18 = vmax.f32 %v232_v6, 0.0  ;;  %v265_v19 = vmax.f32 %v233_v7, 0.0  ;;  %v250_v21 = vadd.f32 %v1255_v2, %v211_v15  ;;  %v198_v22 = vld [vmem:[%s1260_s5 + $0x28] sm:$0xff]  ;;  %v213_v23 = vld [vmem:[%s1260_s5 + $0xa0] sm:$0xff]  ;;  %v266_v25 = vmax.f32 %v234_v13, 0.0  ;;  %v199_v29 = vld [vmem:[%s1260_s5 + $0x30] sm:$0xff] }
  0x1a   : > { %v280_v20 = vmax.f32 %v248_v9, 0.0  ;;  %v281_v24 = vmax.f32 %v249_v12, 0.0  ;;  %v267_v26 = vmax.f32 %v235_v14, 0.0  ;;  %v251_v27 = vadd.f32 %v1255_v2, %v212_v16  ;;  %v214_v28 = vld [vmem:[%s1260_s5 + $0xa8] sm:$0xff]  ;;  %v200_v34 = vld [vmem:[%s1260_s5 + $0x38] sm:$0xff]  ;;  %v215_v35 = vld [vmem:[%s1260_s5 + $0xb0] sm:$0xff] }
  0x1b   : > { %v296_v30 = vpack.c.bf16 %v265_v19, %v264_v18  ;;  %v282_v31 = vmax.f32 %v250_v21, 0.0  ;;  %v236_v32 = vadd.f32 %v1255_v2, %v197_v17  ;;  %v237_v33 = vadd.f32 %v1255_v2, %v198_v22  ;;  %v216_v40 = vld [vmem:[%s1260_s5 + $0xb8] sm:$0xff]  ;;  %v201_v45 = vld [vmem:[%s1260_s5 + $0x40] sm:$0xff]  ;;  %v202_v46 = vld [vmem:[%s1260_s5 + $0x48] sm:$0xff] }
  0x1c   : > { %v304_v36 = vpack.c.bf16 %v281_v24, %v280_v20  ;;  %v297_v37 = vpack.c.bf16 %v267_v26, %v266_v25  ;;  %v283_v38 = vmax.f32 %v251_v27, 0.0  ;;  %v252_v39 = vadd.f32 %v1255_v2, %v213_v23  ;;  %v217_v51 = vld [vmem:[%s1260_s5 + $0xc0] sm:$0xff]  ;;  %v218_v52 = vld [vmem:[%s1260_s5 + $0xc8] sm:$0xff]  ;;  %v203_v57 = vld [vmem:[%s1260_s5 + $0x50] sm:$0xff] }
  0x1d   : > { %978 = vmatprep.mubr.msk.bf16.mxu0 %vm328_vm0, %v296_v30  ;;  %v268_v41 = vmax.f32 %v236_v32, 0.0  ;;  %v269_v42 = vmax.f32 %v237_v33, 0.0  ;;  %v253_v43 = vadd.f32 %v1255_v2, %v214_v28  ;;  %v238_v44 = vadd.f32 %v1255_v2, %v199_v29  ;;  %v204_v62 = vld [vmem:[%s1260_s5 + $0x58] sm:$0xff]  ;;  %v219_v4 = vld [vmem:[%s1260_s5 + $0xd0] sm:$0xff]  ;;  %v205_v10 = vld [vmem:[%s1260_s5 + $0x60] sm:$0xff] }
  0x1e   : > { %994 = vmatprep.mubr.msk.bf16.mxu1 %vm328_vm0, %v304_v36  ;;  %979 = vmatmul.mubr.msk.bf16.vlgmr.msra.gmra.mrb[0].mxu0 %vm328_vm0, %v297_v37  ;;  %v305_v47 = vpack.c.bf16 %v283_v38, %v282_v31  ;;  %v284_v48 = vmax.f32 %v252_v39, 0.0  ;;  %v239_v49 = vadd.f32 %v1255_v2, %v200_v34  ;;  %v254_v50 = vadd.f32 %v1255_v2, %v215_v35  ;;  %v220_v5 = vld [vmem:[%s1260_s5 + $0xd8] sm:$0xff]  ;;  %v206_v11 = vld [vmem:[%s1260_s5 + $0x68] sm:$0xff]  ;;  %v221_v15 = vld [vmem:[%s1260_s5 + $0xe0] sm:$0xff] }
  0x1f   : > { %v298_v53 = vpack.c.bf16 %v269_v42, %v268_v41  ;;  %v285_v54 = vmax.f32 %v253_v43, 0.0  ;;  %v270_v55 = vmax.f32 %v238_v44, 0.0  ;;  %v255_v56 = vadd.f32 %v1255_v2, %v216_v40  ;;  %v222_v16 = vld [vmem:[%s1260_s5 + $0xe8] sm:$0xff]  ;;  %v207_v30 = vld [vmem:[%s1260_s5 + $0x70] sm:$0xff]  ;;  %v208_v31 = vld [vmem:[%s1260_s5 + $0x78] sm:$0xff] }
  0x20   : > { %995 = vmatmul.mubr.msk.bf16.vlgmr.msra.gmra.mrb[0].mxu1 %vm328_vm0, %v305_v47  ;;  %v271_v58 = vmax.f32 %v239_v49, 0.0  ;;  %v286_v59 = vmax.f32 %v254_v50, 0.0  ;;  %v240_v60 = vadd.f32 %v1255_v2, %v201_v45  ;;  %v241_v61 = vadd.f32 %v1255_v2, %v202_v46  ;;  %v223_v36 = vld [vmem:[%s1260_s5 + $0xf0] sm:$0xff]  ;;  %v224_v37 = vld [vmem:[%s1260_s5 + $0xf8] sm:$0xff] }
  0x21   : > { %982 = vmatprep.mubr.msk.bf16.mxu0 %vm328_vm0, %v298_v53  ;;  %v306_v63 = vpack.c.bf16 %v285_v54, %v284_v48  ;;  %v287_v0 = vmax.f32 %v255_v56, 0.0  ;;  %v256_v1 = vadd.f32 %v1255_v2, %v217_v51  ;;  %v257_v3 = vadd.f32 %v1255_v2, %v218_v52 }
  0x22   : > { %v299_v6 = vpack.c.bf16 %v271_v58, %v270_v55  ;;  %v272_v7 = vmax.f32 %v240_v60, 0.0  ;;  %v273_v8 = vmax.f32 %v241_v61, 0.0  ;;  %v242_v9 = vadd.f32 %v1255_v2, %v203_v57 }
  0x23   : > { %998 = vmatprep.mubr.msk.bf16.mxu1 %vm328_vm0, %v306_v63  ;;  %v288_v12 = vmax.f32 %v256_v1, 0.0  ;;  %v289_v13 = vmax.f32 %v257_v3, 0.0  ;;  %v243_v14 = vadd.f32 %v1255_v2, %v204_v62  ;;  %v307_v17 = vpack.c.bf16 %v287_v0, %v286_v59 }
  0x24   : > { %v300_v18 = vpack.c.bf16 %v273_v8, %v272_v7  ;;  %v258_v19 = vadd.f32 %v1255_v2, %v219_v4  ;;  %v259_v20 = vadd.f32 %v1255_v2, %v220_v5  ;;  %v244_v22 = vadd.f32 %v1255_v2, %v205_v10 }
  0x25   : > { %v308_v21 = vpack.c.bf16 %v289_v13, %v288_v12  ;;  %v245_v23 = vadd.f32 %v1255_v2, %v206_v11  ;;  %v274_v24 = vmax.f32 %v242_v9, 0.0  ;;  %v275_v25 = vmax.f32 %v243_v14, 0.0 }
  0x26   : > { %983 = vmatmul.mubr.msk.bf16.gmra.mrb[4].mxu0 %vm328_vm0, %v299_v6  ;;  %v260_v26 = vadd.f32 %v1255_v2, %v221_v15  ;;  %v261_v27 = vadd.f32 %v1255_v2, %v222_v16  ;;  %v276_v28 = vmax.f32 %v244_v22, 0.0  ;;  %v290_v32 = vmax.f32 %v258_v19, 0.0 }
  0x27   : > { %986 = vmatprep.mubr.msk.bf16.mxu0 %vm328_vm0, %v300_v18  ;;  %v277_v29 = vmax.f32 %v245_v23, 0.0  ;;  %v291_v33 = vmax.f32 %v259_v20, 0.0  ;;  %v301_v38 = vpack.c.bf16 %v275_v25, %v274_v24  ;;  %v246_v39 = vadd.f32 %v1255_v2, %v207_v30 }
  0x28   : > { %999 = vmatmul.mubr.msk.bf16.gmra.mrb[4].mxu1 %vm328_vm0, %v307_v17  ;;  %v292_v34 = vmax.f32 %v260_v26, 0.0  ;;  %v293_v35 = vmax.f32 %v261_v27, 0.0  ;;  %v247_v40 = vadd.f32 %v1255_v2, %v208_v31  ;;  %v262_v43 = vadd.f32 %v1255_v2, %v223_v36 }
  0x29   : > { %1002 = vmatprep.mubr.msk.bf16.mxu1 %vm328_vm0, %v308_v21  ;;  %v302_v41 = vpack.c.bf16 %v277_v29, %v276_v28  ;;  %v309_v42 = vpack.c.bf16 %v291_v33, %v290_v32  ;;  %v263_v44 = vadd.f32 %v1255_v2, %v224_v37  ;;  %v278_v46 = vmax.f32 %v246_v39, 0.0 }
  0x2a   : > { %v310_v45 = vpack.c.bf16 %v293_v35, %v292_v34  ;;  %v279_v47 = vmax.f32 %v247_v40, 0.0  ;;  %v294_v48 = vmax.f32 %v262_v43, 0.0 }
  0x2b   : > { %v295_v49 = vmax.f32 %v263_v44, 0.0 }
  0x2c   : > { %v303_v50 = vpack.c.bf16 %v279_v47, %v278_v46 }
  0x2d   : > { %v311_v51 = vpack.c.bf16 %v295_v49, %v294_v48 }
  0x2e   : > { %987 = vmatmul.mubr.msk.bf16.gmra.mrb[8].mxu0 %vm328_vm0, %v301_v38 }
  0x2f   : > { %990 = vmatprep.mubr.msk.bf16.mxu0 %vm328_vm0, %v302_v41 }
  0x30   : > { %1003 = vmatmul.mubr.msk.bf16.gmra.mrb[8].mxu1 %vm328_vm0, %v309_v42 }
  0x31   : > { %1006 = vmatprep.mubr.msk.bf16.mxu1 %vm328_vm0, %v310_v45 }
  0x36   : > { %991 = vmatmul.mubr.msk.bf16.gmra.mrb[12].mxu0 %vm328_vm0, %v303_v50 }
  0x38   : > { %1007 = vmatmul.mubr.msk.bf16.gmra.mrb[12].mxu1 %vm328_vm0, %v311_v51 }
  0xf1   : > { %v980_v2 = vpop.f32.mrb[0].mxu0 }
  0xf2   : > { %541 = vst.msk [vmem:[%s1343_s8 + $0x10] sm:$0xff] %vm538_vm1, %v980_v2  ;;  %v411_v52 = vpop.f32.mrb[1].mxu0 }
  0xf3   : > { %v996_v53 = vpop.f32.mrb[0].mxu1  ;;  %539 = vst.msk [vmem:[%s1343_s8] sm:$0xff] %vm538_vm1, %v411_v52  ;;  %v981_v54 = vpop.f32.mrb[2].mxu0 }
  0xf4   : > { %557 = vst.msk [vmem:[%s1343_s8 + $0x90] sm:$0xff] %vm538_vm1, %v996_v53  ;;  %v475_v55 = vpop.f32.mrb[1].mxu1  ;;  %542 = vst.msk [vmem:[%s1343_s8 + $0x18] sm:$0xff] %vm538_vm1, %v981_v54  ;;  %v414_v56 = vpop.f32.mrb[3].mxu0 }
  0xf5   : > { %555 = vst.msk [vmem:[%s1343_s8 + $0x80] sm:$0xff] %vm538_vm1, %v475_v55  ;;  %v997_v57 = vpop.f32.mrb[2].mxu1  ;;  %540 = vst.msk [vmem:[%s1343_s8 + $0x8] sm:$0xff] %vm538_vm1, %v414_v56 }
  0xf6   : > { %558 = vst.msk [vmem:[%s1343_s8 + $0x98] sm:$0xff] %vm538_vm1, %v997_v57  ;;  %v478_v58 = vpop.f32.mrb[3].mxu1 }
  0xf7   : > { %556 = vst.msk [vmem:[%s1343_s8 + $0x88] sm:$0xff] %vm538_vm1, %v478_v58 }
  0xf9   : > { %v984_v59 = vpop.f32.mrb[4].mxu0 }
  0xfa   : > { %545 = vst.msk [vmem:[%s1343_s8 + $0x30] sm:$0xff] %vm538_vm1, %v984_v59  ;;  %v427_v60 = vpop.f32.mrb[5].mxu0 }
  0xfb   : > { %v1000_v61 = vpop.f32.mrb[4].mxu1  ;;  %543 = vst.msk [vmem:[%s1343_s8 + $0x20] sm:$0xff] %vm538_vm1, %v427_v60  ;;  %v985_v62 = vpop.f32.mrb[6].mxu0 }
  0xfc   : > { %561 = vst.msk [vmem:[%s1343_s8 + $0xb0] sm:$0xff] %vm538_vm1, %v1000_v61  ;;  %v491_v63 = vpop.f32.mrb[5].mxu1  ;;  %546 = vst.msk [vmem:[%s1343_s8 + $0x38] sm:$0xff] %vm538_vm1, %v985_v62  ;;  %v430_v0 = vpop.f32.mrb[7].mxu0 }
  0xfd   : > { %559 = vst.msk [vmem:[%s1343_s8 + $0xa0] sm:$0xff] %vm538_vm1, %v491_v63  ;;  %v1001_v1 = vpop.f32.mrb[6].mxu1  ;;  %544 = vst.msk [vmem:[%s1343_s8 + $0x28] sm:$0xff] %vm538_vm1, %v430_v0 }
  0xfe   : > { %562 = vst.msk [vmem:[%s1343_s8 + $0xb8] sm:$0xff] %vm538_vm1, %v1001_v1  ;;  %v494_v3 = vpop.f32.mrb[7].mxu1 }
  0xff   : > { %560 = vst.msk [vmem:[%s1343_s8 + $0xa8] sm:$0xff] %vm538_vm1, %v494_v3 }
 0x101   : > { %v988_v4 = vpop.f32.mrb[8].mxu0 }
 0x102   : > { %549 = vst.msk [vmem:[%s1343_s8 + $0x50] sm:$0xff] %vm538_vm1, %v988_v4  ;;  %v443_v5 = vpop.f32.mrb[9].mxu0 }
 0x103   : > { %v1004_v6 = vpop.f32.mrb[8].mxu1  ;;  %547 = vst.msk [vmem:[%s1343_s8 + $0x40] sm:$0xff] %vm538_vm1, %v443_v5  ;;  %v989_v7 = vpop.f32.mrb[10].mxu0 }
 0x104   : > { %565 = vst.msk [vmem:[%s1343_s8 + $0xd0] sm:$0xff] %vm538_vm1, %v1004_v6  ;;  %v507_v8 = vpop.f32.mrb[9].mxu1  ;;  %550 = vst.msk [vmem:[%s1343_s8 + $0x58] sm:$0xff] %vm538_vm1, %v989_v7  ;;  %v446_v9 = vpop.f32.mrb[11].mxu0 }
 0x105   : > { %563 = vst.msk [vmem:[%s1343_s8 + $0xc0] sm:$0xff] %vm538_vm1, %v507_v8  ;;  %v1005_v10 = vpop.f32.mrb[10].mxu1  ;;  %548 = vst.msk [vmem:[%s1343_s8 + $0x48] sm:$0xff] %vm538_vm1, %v446_v9 }
 0x106   : > { %566 = vst.msk [vmem:[%s1343_s8 + $0xd8] sm:$0xff] %vm538_vm1, %v1005_v10  ;;  %v510_v11 = vpop.f32.mrb[11].mxu1 }
 0x107   : > { %564 = vst.msk [vmem:[%s1343_s8 + $0xc8] sm:$0xff] %vm538_vm1, %v510_v11 }
 0x109   : > { %v992_v12 = vpop.f32.mrb[12].mxu0  ;;  %577 = sbr.rel (!%p1237_p4) target bundleno = 328 (0x148), region = 36 }
 0x10a   : > { %553 = vst.msk [vmem:[%s1343_s8 + $0x70] sm:$0xff] %vm538_vm1, %v992_v12  ;;  %v459_v13 = vpop.f32.mrb[13].mxu0 }
 0x10b   : > { %v1008_v14 = vpop.f32.mrb[12].mxu1  ;;  %551 = vst.msk [vmem:[%s1343_s8 + $0x60] sm:$0xff] %vm538_vm1, %v459_v13  ;;  %v993_v15 = vpop.f32.mrb[14].mxu0 }
 0x10c   : > { %569 = vst.msk [vmem:[%s1343_s8 + $0xf0] sm:$0xff] %vm538_vm1, %v1008_v14  ;;  %v523_v16 = vpop.f32.mrb[13].mxu1  ;;  %554 = vst.msk [vmem:[%s1343_s8 + $0x78] sm:$0xff] %vm538_vm1, %v993_v15  ;;  %v462_v17 = vpop.f32.mrb[15].mxu0 }
 0x10d   : > { %567 = vst.msk [vmem:[%s1343_s8 + $0xe0] sm:$0xff] %vm538_vm1, %v523_v16  ;;  %v1009_v18 = vpop.f32.mrb[14].mxu1  ;;  %552 = vst.msk [vmem:[%s1343_s8 + $0x68] sm:$0xff] %vm538_vm1, %v462_v17 }
 0x10e   : > { %570 = vst.msk [vmem:[%s1343_s8 + $0xf8] sm:$0xff] %vm538_vm1, %v1009_v18  ;;  %v526_v19 = vpop.f32.mrb[15].mxu1 }
 0x10f   : > { %568 = vst.msk [vmem:[%s1343_s8 + $0xe8] sm:$0xff] %vm538_vm1, %v526_v19 }
 0x110   : > { %s1562_s9 = smov (!%p580_p8, %s579_s9), 32 }
 0x111   : > { %s938_s17 = sshll.u32 %s1562_s9, 7 }
 0x112   : > { %p941_p9 = scmp.eq.s32.totalorder %s938_s17, 0 }
 0x113   : > { %s1422_s18 = sshrl.u32 (!%p941_p9), %s1562_s9, 5 }
 0x114   : > { %588 = sbr.rel (%p941_p9) target bundleno = 328 (0x148), region = 40  ;;  %p942_p10 = scmp.le.s32.totalorder (!%p941_p9), %s1422_s18, 0 }
 0x11b   : > { %866 = sbr.rel (%p942_p10) target bundleno = 307 (0x133), region = 116  ;;  %s1553_s15 = smov (!%p942_p10), %s1416_s14 }
 0x11c   : > { %s1554_s20 = smov (!%p942_p10), %s1343_s8  ;;  %s1431_s21 = smov (!%p942_p10), 0  }
 0x11d   : > { %s1433_s22 = smov (!%p942_p10), 0  }
 0x122 LB: >> { %v712_v20 = vld [vmem:[%s1166_s20] sm:$0xff]  ;;  %v714_v21 = vld [vmem:[%s1166_s20 + $0x8] sm:$0xff]  ;;  %v716_v22 = vld [vmem:[%s1166_s20 + $0x10] sm:$0xff]  ;;  %s776_s23 = sadd.s32 1, %s1170_s21  ;;  %s706_s22 = sadd.s32 1, %s1174_s22   ;;  %s1174_s22 = sphi %s1433_s22, %s706_s22   ;;  %s1170_s21 = sphi %s1431_s21, %s1557_s21   ;;  %s1166_s20 = sphi %s1554_s20, %s1556_s20   ;;  %s1162_s15 = sphi %s1553_s15, %s1555_s15  }
 0x123   : >> { %713 = vst [vmem:[%s1162_s15] sm:$0xff] %v712_v20  ;;  %715 = vst [vmem:[%s1162_s15 + $0x8] sm:$0xff] %v714_v21  ;;  %v718_v23 = vld [vmem:[%s1166_s20 + $0x18] sm:$0xff]  ;;  %v720_v24 = vld [vmem:[%s1166_s20 + $0x20] sm:$0xff]  ;;  %p777_p11 = scmp.ge.s32.totalorder %s776_s23, %s1422_s18  ;;  %p705_p12 = scmp.ge.s32.totalorder %s706_s22, %s1422_s18 }
 0x124   : >> { %717 = vst [vmem:[%s1162_s15 + $0x10] sm:$0xff] %v716_v22  ;;  %v722_v25 = vld [vmem:[%s1166_s20 + $0x28] sm:$0xff]  ;;  %719 = vst [vmem:[%s1162_s15 + $0x18] sm:$0xff] %v718_v23  ;;  %v724_v26 = vld [vmem:[%s1166_s20 + $0x30] sm:$0xff] }
 0x125   : >> { %721 = vst [vmem:[%s1162_s15 + $0x20] sm:$0xff] %v720_v24  ;;  %723 = vst [vmem:[%s1162_s15 + $0x28] sm:$0xff] %v722_v25  ;;  %v726_v27 = vld [vmem:[%s1166_s20 + $0x38] sm:$0xff]  ;;  %v728_v28 = vld [vmem:[%s1166_s20 + $0x40] sm:$0xff]  ;;  %s1564_s23 = smov (%p777_p11, %s776_s23), 0 }
 0x126   : >> { %725 = vst [vmem:[%s1162_s15 + $0x30] sm:$0xff] %v724_v26  ;;  %727 = vst [vmem:[%s1162_s15 + $0x38] sm:$0xff] %v726_v27  ;;  %v730_v29 = vld [vmem:[%s1166_s20 + $0x48] sm:$0xff]  ;;  %v732_v30 = vld [vmem:[%s1166_s20 + $0x50] sm:$0xff]  ;;  %s943_s24 = sshll.u32 %s1564_s23, 8  ;;  %s1557_s21 = smov %s1564_s23 }
 0x127   : >> { %729 = vst [vmem:[%s1162_s15 + $0x40] sm:$0xff] %v728_v28  ;;  %v734_v31 = vld [vmem:[%s1166_s20 + $0x58] sm:$0xff]  ;;  %731 = vst [vmem:[%s1162_s15 + $0x48] sm:$0xff] %v730_v29  ;;  %v736_v32 = vld [vmem:[%s1166_s20 + $0x60] sm:$0xff]  ;;  %s1489_s25 = scalar_lea.vmem %s1343_s8, %s943_s24 [#allocation2]   ;;  %s782_s26 = scalar_lea.vmem %s1416_s14, %s943_s24  }
 0x128   : >> { %733 = vst [vmem:[%s1162_s15 + $0x50] sm:$0xff] %v732_v30  ;;  %735 = vst [vmem:[%s1162_s15 + $0x58] sm:$0xff] %v734_v31  ;;  %v738_v33 = vld [vmem:[%s1166_s20 + $0x68] sm:$0xff]  ;;  %v740_v34 = vld [vmem:[%s1166_s20 + $0x70] sm:$0xff] }
 0x129   : >> { %737 = vst [vmem:[%s1162_s15 + $0x60] sm:$0xff] %v736_v32  ;;  %739 = vst [vmem:[%s1162_s15 + $0x68] sm:$0xff] %v738_v33  ;;  %v742_v35 = vld [vmem:[%s1166_s20 + $0x78] sm:$0xff]  ;;  %v744_v36 = vld [vmem:[%s1166_s20 + $0x80] sm:$0xff] }
 0x12a   : >> { %741 = vst [vmem:[%s1162_s15 + $0x70] sm:$0xff] %v740_v34  ;;  %v746_v37 = vld [vmem:[%s1166_s20 + $0x88] sm:$0xff]  ;;  %743 = vst [vmem:[%s1162_s15 + $0x78] sm:$0xff] %v742_v35  ;;  %v748_v38 = vld [vmem:[%s1166_s20 + $0x90] sm:$0xff] }
 0x12b   : >> { %745 = vst [vmem:[%s1162_s15 + $0x80] sm:$0xff] %v744_v36  ;;  %747 = vst [vmem:[%s1162_s15 + $0x88] sm:$0xff] %v746_v37  ;;  %v750_v39 = vld [vmem:[%s1166_s20 + $0x98] sm:$0xff]  ;;  %v752_v40 = vld [vmem:[%s1166_s20 + $0xa0] sm:$0xff] }
 0x12c   : >> { %749 = vst [vmem:[%s1162_s15 + $0x90] sm:$0xff] %v748_v38  ;;  %751 = vst [vmem:[%s1162_s15 + $0x98] sm:$0xff] %v750_v39  ;;  %v754_v41 = vld [vmem:[%s1166_s20 + $0xa8] sm:$0xff]  ;;  %v756_v42 = vld [vmem:[%s1166_s20 + $0xb0] sm:$0xff]  ;;  %708 = sbr.rel (!%p705_p12) target bundleno = 290 (0x122), region = 122 }
 0x12d   : >> { %753 = vst [vmem:[%s1162_s15 + $0xa0] sm:$0xff] %v752_v40  ;;  %v758_v43 = vld [vmem:[%s1166_s20 + $0xb8] sm:$0xff]  ;;  %755 = vst [vmem:[%s1162_s15 + $0xa8] sm:$0xff] %v754_v41  ;;  %v760_v44 = vld [vmem:[%s1166_s20 + $0xc0] sm:$0xff] }
 0x12e   : >> { %757 = vst [vmem:[%s1162_s15 + $0xb0] sm:$0xff] %v756_v42  ;;  %759 = vst [vmem:[%s1162_s15 + $0xb8] sm:$0xff] %v758_v43  ;;  %v762_v45 = vld [vmem:[%s1166_s20 + $0xc8] sm:$0xff]  ;;  %v764_v46 = vld [vmem:[%s1166_s20 + $0xd0] sm:$0xff] }
 0x12f   : >> { %761 = vst [vmem:[%s1162_s15 + $0xc0] sm:$0xff] %v760_v44  ;;  %763 = vst [vmem:[%s1162_s15 + $0xc8] sm:$0xff] %v762_v45  ;;  %v766_v47 = vld [vmem:[%s1166_s20 + $0xd8] sm:$0xff]  ;;  %v768_v48 = vld [vmem:[%s1166_s20 + $0xe0] sm:$0xff] }
 0x130   : >> { %765 = vst [vmem:[%s1162_s15 + $0xd0] sm:$0xff] %v764_v46  ;;  %v770_v49 = vld [vmem:[%s1166_s20 + $0xe8] sm:$0xff]  ;;  %767 = vst [vmem:[%s1162_s15 + $0xd8] sm:$0xff] %v766_v47  ;;  %v772_v50 = vld [vmem:[%s1166_s20 + $0xf0] sm:$0xff] }
 0x131   : >> { %769 = vst [vmem:[%s1162_s15 + $0xe0] sm:$0xff] %v768_v48  ;;  %771 = vst [vmem:[%s1162_s15 + $0xe8] sm:$0xff] %v770_v49  ;;  %v774_v51 = vld [vmem:[%s1166_s20 + $0xf8] sm:$0xff]  ;;  %s1556_s20 = smov %s1489_s25 }
 0x132   : >> { %773 = vst [vmem:[%s1162_s15 + $0xf0] sm:$0xff] %v772_v50  ;;  %775 = vst [vmem:[%s1162_s15 + $0xf8] sm:$0xff] %v774_v51  ;;  %s1555_s15 = smov %s782_s26 }
 0x133 PF: > { %s1530_s27 = sand.u32 31, %s1562_s9   ;;  %s954_s28 = sshll.u32 %s1422_s18, 8 }
 0x134   : > { %s787_s29 = scalar_lea.vmem %s1343_s8, %s954_s28 [#allocation2]   ;;  %s789_s30 = scalar_lea.vmem %s1416_s14, %s954_s28  }
 0x135   : > { %p948_p13 = scmp.le.s32.totalorder %s1530_s27, 0 }
 0x136   : > { %s1176_s4 = smov (!%p948_p13), %s789_s30   ;;  %s1180_s5 = smov (!%p948_p13), %s787_s29  }
 0x137   : > { %880 = sbr.rel (%p948_p13) target bundleno = 328 (0x148), region = 127  ;;  %s1184_s6 = smov (!%p948_p13), 0  }
 0x138   : > { %s1188_s7 = smov (!%p948_p13), 0  }
 0x13e LB: >> { %v799_v2 = vld [vmem:[%s1182_s5] sm:$0xff]  ;;  %s801_s9 = sadd.s32 1, %s1186_s6  ;;  %s793_s7 = sadd.s32 1, %s1190_s7   ;;  %s1190_s7 = sphi %s1188_s7, %s793_s7   ;;  %s1186_s6 = sphi %s1184_s6, %s1185_s6   ;;  %s1182_s5 = sphi %s1180_s5, %s806_s5   ;;  %s1178_s4 = sphi %s1176_s4, %s807_s4  }
 0x13f   : >> { %800 = vst [vmem:[%s1178_s4] sm:$0xff] %v799_v2  ;;  %p802_p0 = scmp.ge.s32.totalorder %s801_s9, %s1530_s27  ;;  %p792_p1 = scmp.ge.s32.totalorder %s793_s7, %s1530_s27 }
 0x141   : >> { %s1566_s9 = smov (%p802_p0, %s801_s9), 0  ;;  %795 = sbr.rel (!%p792_p1) target bundleno = 318 (0x13e), region = 133 }
 0x142   : >> { %s949_s8 = sshll.u32 %s1566_s9, 3  ;;  %s1185_s6 = smov %s1566_s9  }
 0x143   : >> { %s806_s5 = scalar_lea.vmem %s787_s29, %s949_s8 [#allocation2]   ;;  %s807_s4 = scalar_lea.vmem %s789_s30, %s949_s8  }
 0x148 PF: > { %p10_p2 = scmp.ge.s32.totalorder %s1227_s16, 4   ;;  %s1558_s12 = smov %s1154_s13 }
 0x149   : > { %s1559_s13 = smov %s1235_s19  ;;  %s1560_s14 = smov %s1227_s16 }
 0x14a   :  { %12 = sbr.rel (!%p10_p2) target bundleno = 2 (0x2), region = 144 }

// kernel: vae_forward.11
= control target key start
LH: loop header
LB: loop body
LE: loop exit
PB: predicated region body
PF: predicated region fallthrough
CT: control target
= control target key end

     0   :  { %v15_v0 = vlaneseq  ;;  %v112_v1 = vmov 1983009808   ;;  %vm93_vm0 = vcmask 1041408   ;;  %vm94_vm1 = vcmask 1043458   ;;  %s143_s1 = inlined_call_operand.vmem [shape: f32[1,784], index: 1, kind: input, shape index: {}]   ;;  %s144_s0 = inlined_call_operand.vmem [shape: f32[2,784], index: 0, kind: input, shape index: {}]   ;;  %s145_s2 = inlined_call_operand.vmem [shape: f32[2,784], index: 2, kind: output, shape index: {}]  }
   0x1   :  { %v46_v2 = vunpack.c.l.s4 %v112_v1  ;;  %v13_v4 = vld [vmem:[%s143_s1] sm:$0x7f]  ;;  %v12_v29 = vld [vmem:[%s144_s0 + $0x8] sm:$0x3f]  ;;  %vm95_vm2 = vmor %vm94_vm1, %vm93_vm0  ;;  %vm96_vm3 = vcmask 128004  }
   0x2   :  { %v16_v3 = vshrl.u32 %v15_v0, 7  ;;  %v11_v27 = vld [vmem:[%s144_s0] sm:$0xff]  ;;  %vm97_vm4 = vmor %vm96_vm3, %vm95_vm2 }
   0x3   :  { %v47_v5 = vunpack.c.0.s8 %v46_v2 }
   0x4   :  { %v17_v6 = vsub.s32 0, %v16_v3  ;;  %v21_v7 = vsub.s32 1, %v16_v3  ;;  %v25_v8 = vsub.s32 2, %v16_v3  ;;  %v29_v9 = vsub.s32 3, %v16_v3 }
   0x5   :  { %v33_v10 = vsub.s32 4, %v16_v3  ;;  %v37_v11 = vsub.s32 5, %v16_v3  ;;  %v41_v12 = vsub.s32 6, %v16_v3  ;;  %v50_v13 = vsub.s32 %v47_v5, %v16_v3 }
   0x6   :  { %v18_v14 = vrot.slane %v13_v4, %v17_v6  ;;  %v22_v15 = vrot.slane %v13_v4, %v21_v7  ;;  %v26_v16 = vrot.slane %v13_v4, %v25_v8  ;;  %v30_v17 = vrot.slane %v13_v4, %v29_v9 }
   0x7   :  { %v34_v18 = vrot.slane %v13_v4, %v33_v10  ;;  %v38_v19 = vrot.slane %v13_v4, %v37_v11  ;;  %v42_v20 = vrot.slane %v13_v4, %v41_v12 }
   0x8   :  { %v43_v21 = vcombine.low %v18_v14, %v22_v15  ;;  %v44_v22 = vcombine.low %v26_v16, %v30_v17 }
   0x9   :  { %v60_v23 = vcombine.low %v34_v18, %v38_v19  ;;  %v74_v24 = vrot.slane %v42_v20, %v50_v13 }
   0xa   :  { %v51_v25 = vrot.slane %v43_v21, %v50_v13  ;;  %v58_v26 = vrot.slane %v44_v22, %v50_v13 }
   0xb   :  { %v67_v28 = vrot.slane %v60_v23, %v50_v13 }
   0xc   :  { %v59_v30 = vcombine.low %v51_v25, %v58_v26 }
   0xd   :  { %v75_v31 = vcombine.low %v67_v28, %v74_v24 }
   0xe   :  { %v78_v32 = vadd.f32 %v59_v30, %v11_v27 }
   0xf   :  { %v79_v33 = vadd.f32 %v75_v31, %v12_v29 }
  0x10   :  { %v80_v34 = vsub.f32 0.0, %v78_v32 }
  0x11   :  { %v81_v35 = vsub.f32 0.0, %v79_v33 }
  0x12   :  { %v82_v36 = vmul.f32 1.442695, %v80_v34 }
  0x13   :  { %v84_v37 = vmul.f32 1.442695, %v81_v35 }
  0x14   :  { %104 = vpow2.f32 %v82_v36 }
  0x15   :  { %106 = vpow2.f32 %v84_v37 }
  0x1e   :  { %v105_v38 = vpop.eup %104 }
  0x1f   :  { %v107_v39 = vpop.eup %106  ;;  %v86_v40 = vadd.f32 1.0, %v105_v38 }
  0x20   :  { %v87_v41 = vadd.f32 1.0, %v107_v39 }
  0x21   :  { %108 = vrcp.f32 %v86_v40 }
  0x22   :  { %110 = vrcp.f32 %v87_v41 }
  0x2b   :  { %v109_v42 = vpop.eup %108 }
  0x2c   :  { %v111_v43 = vpop.eup %110  ;;  %92 = vst [vmem:[%s145_s2] sm:$0xff] %v109_v42 }
  0x2d   :  { %98 = vst.msk [vmem:[%s145_s2 + $0x8] sm:$0x3f] %vm97_vm4, %v111_v43 }

</bundles_post_ra>
